<compile_context>
chip_gen: v7x
topology: tpu7x:2x2x1
jax: 0.10.0
libtpu: 0.0.40
codegen_flags: <defaults>
</compile_context>

<pallas_src>
import jax
import jax.numpy as jnp
from jax.experimental import pallas as pl
from jax.experimental.pallas import tpu as pltpu

FINAL_IMAGE_SIZE = 64
IMAGE_DIM = FINAL_IMAGE_SIZE * FINAL_IMAGE_SIZE * 3   # 12288
HIDDEN_DIM = 128
OUT_DIM = 1


def discriminator_kernel(x_ref, w1_ref, b1_ref, w2_ref, b2_ref, o_ref):
    """One grid step = one batch tile.

    x_ref : (tile_b, K)  bf16  -- streamed per batch tile
    w1_ref: (K, H)       bf16  -- VMEM resident (constant index_map)
    b1_ref: (1, H)       f32   -- VMEM resident
    w2_ref: (1, H)       f32   -- VMEM resident (PyTorch [out, in] row layout)
    b2_ref: (1, 1)       f32   -- SMEM scalar
    o_ref : (1, tile_b)  f32   -- lane-dense output block
    """
    # bf16 x bf16 -> f32: MXU fast path on v5e/v6e/v7x.
    h = jnp.dot(x_ref[...], w1_ref[...], preferred_element_type=jnp.float32)
    h = jnp.maximum(h + b1_ref[...], 0.0)                        # ReLU (VPU)
    # Second linear has out_features == 1: VPU multiply + XLU lane reduction
    # instead of a 1-wide MXU matmul.
    logit = jnp.sum(h * w2_ref[...], axis=-1) + b2_ref[0, 0]     # (tile_b,)
    o_ref[0, :] = 1.0 / (1.0 + jnp.exp(-logit))                  # Sigmoid (EUP)


def _pick_tile_b(batch):
    if batch <= 256:
        return batch
    for t in (512, 384, 256, 128):
        if batch % t == 0:
            return t
    return 256  # generic fallback; the wrapper pads the batch


def discriminator_forward(x, w1, b1, w2, b2, *, tile_b=None):
    """x: (B, IMAGE_DIM), ideally bf16 from the producer. Returns (B, 1) f32."""
    B, K = x.shape
    H = w1.shape[1]
    assert w1.shape == (K, H) and b1.shape == (1, H)
    assert w2.shape == (1, H) and b2.shape == (1, 1)

    if tile_b is None:
        tile_b = _pick_tile_b(B)

    n_tiles = pl.cdiv(B, tile_b)
    b_pad = n_tiles * tile_b
    if b_pad != B:
        x = jnp.pad(x, ((0, b_pad - B), (0, 0)))

    # VMEM budget: double-buffered x tile + resident W1 (+ slack for out/biases).
    vmem_bytes = (2 * tile_b * K * x.dtype.itemsize
                  + 2 * K * H * w1.dtype.itemsize
                  + (4 << 20))
    vmem_limit = int(min(max(vmem_bytes, 16 << 20), 60 << 20))  # < v7x 64 MiB

    cost = pl.CostEstimate(
        flops=2 * b_pad * K * H + 4 * b_pad * H,
        transcendentals=b_pad,
        bytes_accessed=(b_pad * K * x.dtype.itemsize            # x streamed once
                        + K * H * w1.dtype.itemsize             # W1 streamed once
                        + (2 * H + 1) * 4                       # b1, w2, b2
                        + b_pad * 4),                           # output
    )

    out = pl.pallas_call(
        discriminator_kernel,
        out_shape=jax.ShapeDtypeStruct((1, b_pad), jnp.float32),
        grid_spec=pltpu.PrefetchScalarGridSpec(
            num_scalar_prefetch=0,
            grid=(n_tiles,),
            in_specs=[
                pl.BlockSpec((tile_b, K), lambda i: (i, 0)),         # x tile (bf16)
                pl.BlockSpec((K, H), lambda i: (0, 0)),              # W1 resident (bf16)
                pl.BlockSpec((1, H), lambda i: (0, 0)),              # b1 resident
                pl.BlockSpec((1, H), lambda i: (0, 0)),              # w2 resident
                pl.BlockSpec(memory_space=pltpu.MemorySpace.SMEM),   # b2 scalar
            ],
            out_specs=pl.BlockSpec((1, tile_b), lambda i: (0, i)),   # lane-dense
        ),
        compiler_params=pltpu.CompilerParams(
            dimension_semantics=("parallel",),   # only axis: batch tiles (megacore)
            vmem_limit_bytes=vmem_limit,
        ),
        cost_estimate=cost,
    )(x, w1, b1, w2, b2)

    return out.reshape(b_pad, 1)[:B]


def init_params(key):
    """Deterministic init mimicking PyTorch nn.Linear (U[-1/sqrt(fan_in), +])."""
    k1, k2, k3, k4 = jax.random.split(key, 4)
    bound1 = 1.0 / jnp.sqrt(IMAGE_DIM)
    bound2 = 1.0 / jnp.sqrt(HIDDEN_DIM)
    # W1 stored [in, out] so the kernel computes x @ W1 + b1; bf16 halves its stream.
    w1 = jax.random.uniform(k1, (IMAGE_DIM, HIDDEN_DIM), jnp.float32, -bound1, bound1)
    b1 = jax.random.uniform(k2, (1, HIDDEN_DIM), jnp.float32, -bound1, bound1)
    # W2 kept in PyTorch [out, in] = (1, 128) row layout for the VPU epilogue.
    w2 = jax.random.uniform(k3, (1, HIDDEN_DIM), jnp.float32, -bound2, bound2)
    b2 = jax.random.uniform(k4, (1, 1), jnp.float32, -bound2, bound2)
    return w1.astype(jnp.bfloat16), b1, w2, b2


if __name__ == "__main__":
    key = jax.random.PRNGKey(0)
    k_param, k_x = jax.random.split(key)

    w1, b1, w2, b2 = init_params(k_param)

    batch = 8
    # Producer emits bf16 activations (the dominant HBM stream at real batch sizes).
    x = jax.random.normal(k_x, (batch, IMAGE_DIM), jnp.float32).astype(jnp.bfloat16)

    out = discriminator_forward(x, w1, b1, w2, b2)
    out = jax.block_until_ready(out)

    # Pure-JAX reference on the same bf16-quantized inputs, f32 math.
    x_f32 = x.astype(jnp.float32)
    w1_f32 = w1.astype(jnp.float32)
    h_ref = jnp.maximum(x_f32 @ w1_f32 + b1, 0.0)
    logit_ref = h_ref @ w2.T + b2
    ref = 1.0 / (1.0 + jnp.exp(-logit_ref))

    assert out.shape == (batch, OUT_DIM)
    assert out.dtype == jnp.float32
    assert jnp.allclose(out, ref, atol=1e-4, rtol=1e-4), float(jnp.max(jnp.abs(out - ref)))

    print("KERNEL_OK")
</pallas_src>

<mosaic_0001>
module attributes {stable_mosaic.version = 11 : i64} {
  func.func @discriminator_kernel(%arg0: i32, %arg1: memref<8x12288xbf16, #tpu.memory_space<vmem>>, %arg2: memref<12288x128xbf16, #tpu.memory_space<vmem>>, %arg3: memref<1x128xf32, #tpu.memory_space<vmem>>, %arg4: memref<1x128xf32, #tpu.memory_space<vmem>>, %arg5: memref<1x1xf32, #tpu.memory_space<smem>>, %arg6: memref<1x8xf32, #tpu.memory_space<vmem>>) attributes {dimension_semantics = [#tpu.dimension_semantics<parallel>], iteration_bounds = array<i64: 1>, scalar_prefetch = 0 : i64, scratch_operands = 0 : i64, tpu.core_type = #tpu.core_type<tc>, window_params = [{transform_indices = @transform_0, window_bounds = array<i64: 8, 12288>}, {pipeline_mode = #tpu.pipeline_mode<synchronous>, transform_indices = @transform_1, window_bounds = array<i64: 12288, 128>}, {pipeline_mode = #tpu.pipeline_mode<synchronous>, transform_indices = @transform_2, window_bounds = array<i64: 1, 128>}, {pipeline_mode = #tpu.pipeline_mode<synchronous>, transform_indices = @transform_3, window_bounds = array<i64: 1, 128>}, {transform_indices = @transform_4, window_bounds = array<i64: 1, 1>}, {transform_indices = @transform_5, window_bounds = array<i64: 1, 8>}]} {
    %c0 = arith.constant 0 : index
    %c0_0 = arith.constant 0 : index
    %0 = vector.load %arg1[%c0, %c0_0] : memref<8x12288xbf16, #tpu.memory_space<vmem>>, vector<8x12288xbf16>
    %c0_1 = arith.constant 0 : index
    %c0_2 = arith.constant 0 : index
    %1 = vector.load %arg2[%c0_1, %c0_2] : memref<12288x128xbf16, #tpu.memory_space<vmem>>, vector<12288x128xbf16>
    %cst = arith.constant dense<0.000000e+00> : vector<8x128xf32>
    %2 = tpu.matmul %0, %1, %cst {dimension_numbers = #tpu.dot_dimension_numbers<[1], [0], [0], [1], [0, 0, 1, 1], [], []>} : vector<8x12288xbf16>, vector<12288x128xbf16>, vector<8x128xf32> -> vector<8x128xf32>
    %c0_3 = arith.constant 0 : index
    %c0_4 = arith.constant 0 : index
    %3 = vector.load %arg3[%c0_3, %c0_4] : memref<1x128xf32, #tpu.memory_space<vmem>>, vector<1x128xf32>
    %4 = vector.broadcast %3 : vector<1x128xf32> to vector<8x128xf32>
    %5 = arith.addf %2, %4 : vector<8x128xf32>
    %cst_5 = arith.constant 0.000000e+00 : f32
    %6 = vector.broadcast %cst_5 : f32 to vector<8x128xf32>
    %7 = arith.maximumf %5, %6 : vector<8x128xf32>
    %c0_6 = arith.constant 0 : index
    %c0_7 = arith.constant 0 : index
    %8 = vector.load %arg4[%c0_6, %c0_7] : memref<1x128xf32, #tpu.memory_space<vmem>>, vector<1x128xf32>
    %9 = vector.broadcast %8 : vector<1x128xf32> to vector<8x128xf32>
    %10 = arith.mulf %7, %9 : vector<8x128xf32>
    %cst_8 = arith.constant dense<0.000000e+00> : vector<8xf32>
    %11 = vector.multi_reduction <add>, %10, %cst_8 [1] : vector<8x128xf32> to vector<8xf32>
    %c0_9 = arith.constant 0 : index
    %c0_10 = arith.constant 0 : index
    %12 = memref.load %arg5[%c0_9, %c0_10] : memref<1x1xf32, #tpu.memory_space<smem>>
    %13 = vector.broadcast %12 : f32 to vector<8xf32>
    %14 = arith.addf %11, %13 : vector<8xf32>
    %cst_11 = arith.constant 0.000000e+00 : f32
    %15 = vector.broadcast %cst_11 : f32 to vector<8xf32>
    %16 = arith.subf %15, %14 : vector<8xf32>
    %17 = math.exp %16 : vector<8xf32>
    %cst_12 = arith.constant 1.000000e+00 : f32
    %18 = vector.broadcast %cst_12 : f32 to vector<8xf32>
    %19 = arith.addf %18, %17 : vector<8xf32>
    %cst_13 = arith.constant 1.000000e+00 : f32
    %20 = vector.broadcast %cst_13 : f32 to vector<8xf32>
    %21 = arith.divf %20, %19 : vector<8xf32>
    %c0_14 = arith.constant 0 : index
    %c0_15 = arith.constant 0 : index
    %22 = vector.load %arg6[%c0_14, %c0_15] : memref<1x8xf32, #tpu.memory_space<vmem>>, vector<1x8xf32>
    %23 = vector.shape_cast %22 : vector<1x8xf32> to vector<8xf32>
    %24 = vector.shape_cast %21 : vector<8xf32> to vector<1x8xf32>
    tpu.vector_store %arg6[%c0_14, %c0_15], %24 {strides = array<i32>} : memref<1x8xf32, #tpu.memory_space<vmem>>, vector<1x8xf32>,
    return
  }
  func.func @transform_0(%arg0: i32) -> (i32, i32) {
    %c0_i32 = arith.constant 0 : i32
    %c0_i32_0 = arith.constant 0 : i32
    return %arg0, %c0_i32 : i32, i32
  }
  func.func @transform_1(%arg0: i32) -> (i32, i32) {
    %c0_i32 = arith.constant 0 : i32
    %c0_i32_0 = arith.constant 0 : i32
    %c0_i32_1 = arith.constant 0 : i32
    return %c0_i32, %c0_i32_0 : i32, i32
  }
  func.func @transform_2(%arg0: i32) -> (i32, i32) {
    %c0_i32 = arith.constant 0 : i32
    %c0_i32_0 = arith.constant 0 : i32
    %c0_i32_1 = arith.constant 0 : i32
    return %c0_i32, %c0_i32_0 : i32, i32
  }
  func.func @transform_3(%arg0: i32) -> (i32, i32) {
    %c0_i32 = arith.constant 0 : i32
    %c0_i32_0 = arith.constant 0 : i32
    %c0_i32_1 = arith.constant 0 : i32
    return %c0_i32, %c0_i32_0 : i32, i32
  }
  func.func @transform_4(%arg0: i32) -> (i32, i32) {
    %c0_i32 = arith.constant 0 : i32
    %c0_i32_0 = arith.constant 0 : i32
    %c0_i32_1 = arith.constant 0 : i32
    return %c0_i32, %c0_i32_0 : i32, i32
  }
  func.func @transform_5(%arg0: i32) -> (i32, i32) {
    %c0_i32 = arith.constant 0 : i32
    %c0_i32_0 = arith.constant 0 : i32
    return %c0_i32, %arg0 : i32, i32
  }
}

</mosaic_0001>

<bundles_post_ra>
// kernel: tpu_custom_call.1
= control target key start
LH: loop header
LB: loop body
LE: loop exit
PB: predicated region body
PF: predicated region fallthrough
CT: control target
= control target key end

     0   :  { %11 = vsyncpa [#allocation4], 0  ;;  %s11637_s0 = inlined_call_operand.hbm [shape: bf16[8,12288], index: 0, kind: input, shape index: {}]   ;;  %s11638_s1 = inlined_call_operand.hbm [shape: bf16[12288,128], index: 1, kind: input, shape index: {}]   ;;  %s11639_s2 = inlined_call_operand.hbm [shape: f32[1,128], index: 2, kind: input, shape index: {}]   ;;  %s11640_s3 = inlined_call_operand.hbm [shape: f32[1,128], index: 3, kind: input, shape index: {}]   ;;  %s11641_s4 = inlined_call_operand.<no memory space> [shape: f32[1,1], index: 4, kind: input, shape index: {}]   ;;  %s11642_s5 = inlined_call_operand.hbm [shape: f32[1,8], index: 5, kind: output, shape index: {}]  }
   0x1   :  { %12 = vsyncpa [#allocation7], 0 }
   0x2   :  { %13 = vsyncpa [#allocation10], 0 }
   0x3   :  { %14 = vsyncpa [#allocation5], 0  ;;  %s11489_s18 = smov [#allocation6]   ;;  %s11371_s22 = scalar_lea.hbm %s11638_s1, 98304 }
   0x4   :  { %s30_s19 = sshll.u32 %s11489_s18, 4  ;;  %p11372_p0 = scmp.ne.s32.totalorder %s11638_s1, %s11371_s22  ;;  %s31_s19 = int_to_ptr.vmem [resolvable:$true] %s30_s19 }
   0x5   :  { %p11375_p1 = scmp.lt.u32.totalorder %s11371_s22, %s11638_s1 }
   0x7   :  { %p11377_p2 = pnand %p11375_p1, %p11372_p0 }
   0x9   :  { %11380 = shalt.err (!%p11377_p2)
}
   0xa   :  { %s11381_s27 = scalar_lea.vmem %s31_s19, 98304  ;;  %p11386_p4 = scmp.lt.s32.totalorder %s31_s19, %s31_s19 }
   0xb   :  { %p11382_p3 = scmp.ne.s32.totalorder %s31_s19, %s11381_s27  ;;  %p11387_p5 = scmp.lt.s32.totalorder %s11381_s27, %s11381_s27 }
   0xd   :  { %p11388_p6 = por %p11387_p5, %p11386_p4 }
   0xf   :  { %p11389_p7 = pnand %p11388_p6, %p11382_p3 }
  0x11   :  { %11392 = shalt.err (!%p11389_p7)
}
  0x12   :  { %s11490_s28 = smov 64   ;;  %s11491_s29 = smov 4  }
  0x13   :  { %36 = dma.hbm_to_vmem [thread:$0]  %s11638_s1, 98304, %s31_s19, [#allocation7], %s11490_s28, %s11490_s28, %s11491_s29  }
  0x14   :  { %s11492_s7 = smov [#allocation3]   ;;  %s11493_s9 = smov [#allocation8]  }
  0x15   :  { %s21_s8 = sshll.u32 %s11492_s7, 4  ;;  %s43_s10 = sshll.u32 %s11493_s9, 4  ;;  %s22_s8 = int_to_ptr.vmem [resolvable:$true] %s21_s8  ;;  %s44_s10 = int_to_ptr.vmem [resolvable:$true] %s43_s10 }
  0x16   :  { %s11393_s13 = scalar_lea.hbm %s11637_s0, 6144 }
  0x17   :  { %p11394_p8 = scmp.ne.s32.totalorder %s11637_s0, %s11393_s13  ;;  %p11397_p9 = scmp.lt.u32.totalorder %s11393_s13, %s11637_s0 }
  0x19   :  { %p11399_p10 = pnand %p11397_p9, %p11394_p8 }
  0x1b   :  { %11402 = shalt.err (!%p11399_p10)
}
  0x1c   :  { %s11403_s1 = scalar_lea.vmem %s22_s8, 6144  ;;  %p11408_p12 = scmp.lt.s32.totalorder %s22_s8, %s22_s8 }
  0x1d   :  { %p11404_p11 = scmp.ne.s32.totalorder %s22_s8, %s11403_s1  ;;  %p11409_p13 = scmp.lt.s32.totalorder %s11403_s1, %s11403_s1 }
  0x1f   :  { %p11410_p0 = por %p11409_p13, %p11408_p12 }
  0x21   :  { %p11411_p1 = pnand %p11410_p0, %p11404_p11 }
  0x23   :  { %11414 = shalt.err (!%p11411_p1)
}
  0x24   :  { %24 = dma.hbm_to_vmem [thread:$0]  %s11637_s0, 6144, %s22_s8, [#allocation4]  }
  0x25   :  { %s11415_s22 = scalar_lea.hbm %s11639_s2, 16 }
  0x26   :  { %p11416_p2 = scmp.ne.s32.totalorder %s11639_s2, %s11415_s22  ;;  %p11419_p3 = scmp.lt.u32.totalorder %s11415_s22, %s11639_s2 }
  0x28   :  { %p11421_p4 = pnand %p11419_p3, %p11416_p2 }
  0x2a   :  { %11424 = shalt.err (!%p11421_p4)
}
  0x2b   :  { %s11425_s27 = scalar_lea.vmem %s44_s10, 16  ;;  %s11429_s28 = scalar_lea.vmem %s44_s10, 32 }
  0x2c   :  { %p11426_p5 = scmp.ne.s32.totalorder %s44_s10, %s11425_s27  ;;  %p11430_p6 = scmp.lt.s32.totalorder %s44_s10, %s44_s10 }
  0x2d   :  { %p11431_p7 = scmp.lt.s32.totalorder %s11429_s28, %s11425_s27 }
  0x2f   :  { %p11432_p8 = por %p11431_p7, %p11430_p6 }
  0x31   :  { %p11433_p9 = pnand %p11432_p8, %p11426_p5 }
  0x33   :  { %11436 = shalt.err (!%p11433_p9)
}
  0x34   :  { %46 = dma.hbm_to_vmem [thread:$0]  %s11639_s2, 16, %s44_s10, [#allocation7]  }
  0x35   :  { %s11494_s30 = smov [#allocation9]   ;;  %s11437_s9 = scalar_lea.hbm %s11640_s3, 16 }
  0x36   :  { %s53_s6 = sshll.u32 %s11494_s30, 4  ;;  %p11438_p10 = scmp.ne.s32.totalorder %s11640_s3, %s11437_s9  ;;  %s54_s6 = int_to_ptr.vmem [resolvable:$true] %s53_s6 }
  0x37   :  { %p11441_p11 = scmp.lt.u32.totalorder %s11437_s9, %s11640_s3 }
  0x39   :  { %p11443_p12 = pnand %p11441_p11, %p11438_p10 }
  0x3b   :  { %11446 = shalt.err (!%p11443_p12)
}
  0x3c   :  { %s11447_s15 = scalar_lea.vmem %s54_s6, 16  ;;  %s11451_s2 = scalar_lea.vmem %s54_s6, 32 }
  0x3d   :  { %p11448_p13 = scmp.ne.s32.totalorder %s54_s6, %s11447_s15  ;;  %p11452_p0 = scmp.lt.s32.totalorder %s54_s6, %s54_s6 }
  0x3e   :  { %p11453_p1 = scmp.lt.s32.totalorder %s11451_s2, %s11447_s15 }
  0x40   :  { %p11454_p2 = por %p11453_p1, %p11452_p0 }
  0x42   :  { %p11455_p3 = pnand %p11454_p2, %p11448_p13 }
  0x44   :  { %11458 = shalt.err (!%p11455_p3)
}
  0x45   :  { %56 = dma.hbm_to_vmem [thread:$0]  %s11640_s3, 16, %s54_s6, [#allocation10]  }
  0x46   :  { %11481 = dma.done.wait [#allocation4], 6144  }
  0x47   :  { %11482 = vsyncadd [#allocation4], 4294961152 }
  0x48   :  { %11483 = dma.done.wait [#allocation7], 98320  }
  0x49   :  { %11484 = vsyncadd [#allocation7], 4294868976 }
  0x4a   :  { %11485 = dma.done.wait [#allocation10], 16  }
  0x4b   :  { %11486 = vsyncadd [#allocation10], 4294967280  ;;  %v10503_v0 = vld [vmem:[#allocation6 + $0x40] sm:$0xff]   ;;  %v10507_v4 = vld [vmem:[#allocation6 + $0x48] sm:$0xff]   ;;  %s11495_s1 = smov [#allocation11]   ;;  %vm8555_vm0 = vcmask 57344  }
  0x4c   :  { %v10504_v1 = vld [vmem:[#allocation6 + $0xc0] sm:$0xff]   ;;  %9440 = vmatprep.subr.bf16.mxu0 %v10503_v0  ;;  %v10508_v5 = vld [vmem:[#allocation6 + $0xc8] sm:$0xff]   ;;  %v10511_v8 = vld [vmem:[#allocation6 + $0x50] sm:$0xff]   ;;  %s8563_s18 = sshll.u32 %s11495_s1, 4  ;;  %s8564_s18 = int_to_ptr.vmem [resolvable:$true] %s8563_s18 }
  0x4d   :  { %v10505_v2 = vld [vmem:[#allocation6] sm:$0xff]   ;;  %9462 = vmatprep.subr.bf16.mxu1 %v10504_v1  ;;  %v10509_v6 = vld [vmem:[#allocation6 + $0x8] sm:$0xff]   ;;  %v10512_v9 = vld [vmem:[#allocation6 + $0xd0] sm:$0xff]   ;;  %s11463_s19 = scalar_lea.vmem %s8564_s18, 32  ;;  %p11464_p5 = scmp.lt.s32.totalorder %s8564_s18, %s8564_s18 }
  0x4e   :  { %v10506_v3 = vld [vmem:[#allocation6 + $0x80] sm:$0xff]   ;;  %9441 = vmatpush3.bf16.msra.mxu0 %v10505_v2  ;;  %v10510_v7 = vld [vmem:[#allocation6 + $0x88] sm:$0xff]   ;;  %v10513_v10 = vld [vmem:[#allocation6 + $0x10] sm:$0xff]  }
  0x4f   :  { %9463 = vmatpush3.bf16.msra.mxu1 %v10506_v3  ;;  %9442 = vmatprep.subr.bf16.mxu0 %v10507_v4  ;;  %v10514_v11 = vld [vmem:[#allocation6 + $0x90] sm:$0xff]   ;;  %v10515_v12 = vld [vmem:[#allocation6 + $0x58] sm:$0xff]   ;;  %v10519_v16 = vld [vmem:[#allocation6 + $0x60] sm:$0xff]  }
  0x50   :  { %9464 = vmatprep.subr.bf16.mxu1 %v10508_v5  ;;  %v10516_v13 = vld [vmem:[#allocation6 + $0xd8] sm:$0xff]   ;;  %v10520_v17 = vld [vmem:[#allocation6 + $0xe0] sm:$0xff]   ;;  %v10523_v20 = vld [vmem:[#allocation6 + $0x68] sm:$0xff]  }
  0x51   :  { %v10517_v14 = vld [vmem:[#allocation6 + $0x18] sm:$0xff]   ;;  %v10521_v18 = vld [vmem:[#allocation6 + $0x20] sm:$0xff]   ;;  %v10524_v21 = vld [vmem:[#allocation6 + $0xe8] sm:$0xff]  }
  0x52   :  { %9443 = vmatpush3.bf16.msra.mxu0 %v10509_v6  ;;  %v10518_v15 = vld [vmem:[#allocation6 + $0x98] sm:$0xff]   ;;  %v10522_v19 = vld [vmem:[#allocation6 + $0xa0] sm:$0xff]   ;;  %v10525_v22 = vld [vmem:[#allocation6 + $0x28] sm:$0xff]  }
  0x53   :  { %9465 = vmatpush3.bf16.msra.mxu1 %v10510_v7  ;;  %9444 = vmatprep.subr.bf16.mxu0 %v10511_v8  ;;  %v10526_v23 = vld [vmem:[#allocation6 + $0xa8] sm:$0xff]   ;;  %v10527_v24 = vld [vmem:[#allocation6 + $0x70] sm:$0xff]   ;;  %v10531_v28 = vld [vmem:[#allocation6 + $0x78] sm:$0xff]  }
  0x54   :  { %9466 = vmatprep.subr.bf16.mxu1 %v10512_v9  ;;  %v10528_v25 = vld [vmem:[#allocation6 + $0xf0] sm:$0xff]   ;;  %v10532_v29 = vld [vmem:[#allocation6 + $0xf8] sm:$0xff]   ;;  %v72_v32 = vld [vmem:[#allocation3] sm:$0xff] }
  0x55   :  { %v10529_v26 = vld [vmem:[#allocation6 + $0x30] sm:$0xff]   ;;  %v10533_v30 = vld [vmem:[#allocation6 + $0x38] sm:$0xff]   ;;  %v73_v33 = vld [vmem:[#allocation3 + $0x8] sm:$0xff]  ;;  %v8575_v34 = vcombine.low %v72_v32, %v72_v32  ;;  %v8576_v35 = vcombine.high %v72_v32, %v72_v32 }
  0x56   :  { %9445 = vmatpush3.bf16.msra.mxu0 %v10513_v10  ;;  %v10530_v27 = vld [vmem:[#allocation6 + $0xb0] sm:$0xff]   ;;  %v10534_v31 = vld [vmem:[#allocation6 + $0xb8] sm:$0xff]   ;;  %v8577_v36 = vcombine.low %v73_v33, %v73_v33  ;;  %v8578_v37 = vcombine.high %v73_v33, %v73_v33  ;;  %v10539_v38 = vld [vmem:[#allocation6 + $0x140] sm:$0xff]  }
  0x57   :  { %9467 = vmatpush3.bf16.msra.mxu1 %v10514_v11  ;;  %9446 = vmatprep.subr.bf16.mxu0 %v10515_v12  ;;  %v10540_v39 = vld [vmem:[#allocation6 + $0x1c0] sm:$0xff]   ;;  %v10543_v42 = vld [vmem:[#allocation6 + $0x148] sm:$0xff]   ;;  %v10547_v46 = vld [vmem:[#allocation6 + $0x150] sm:$0xff]  }
  0x58   :  { %9468 = vmatprep.subr.bf16.mxu1 %v10516_v13  ;;  %6639 = vmatprep.mubr.bf16.mxu0 %v8576_v35  ;;  %v10541_v40 = vld [vmem:[#allocation6 + $0x100] sm:$0xff]   ;;  %v10544_v43 = vld [vmem:[#allocation6 + $0x1c8] sm:$0xff]   ;;  %v10548_v47 = vld [vmem:[#allocation6 + $0x1d0] sm:$0xff]  }
  0x59   :  { %6679 = vmatprep.mubr.bf16.mxu1 %v8578_v37  ;;  %v10542_v41 = vld [vmem:[#allocation6 + $0x180] sm:$0xff]   ;;  %v10545_v44 = vld [vmem:[#allocation6 + $0x108] sm:$0xff]   ;;  %v10549_v48 = vld [vmem:[#allocation6 + $0x110] sm:$0xff]  }
  0x5a   :  { %9447 = vmatpush3.bf16.msra.mxu0 %v10517_v14  ;;  %v10546_v45 = vld [vmem:[#allocation6 + $0x188] sm:$0xff]   ;;  %v10550_v49 = vld [vmem:[#allocation6 + $0x190] sm:$0xff]   ;;  %v10551_v50 = vld [vmem:[#allocation6 + $0x158] sm:$0xff]  }
  0x5b   :  { %9469 = vmatpush3.bf16.msra.mxu1 %v10518_v15  ;;  %9448 = vmatprep.subr.bf16.mxu0 %v10519_v16  ;;  %v10552_v51 = vld [vmem:[#allocation6 + $0x1d8] sm:$0xff]   ;;  %v10555_v54 = vld [vmem:[#allocation6 + $0x160] sm:$0xff]   ;;  %v10559_v58 = vld [vmem:[#allocation6 + $0x168] sm:$0xff]  }
  0x5c   :  { %9470 = vmatprep.subr.bf16.mxu1 %v10520_v17  ;;  %v10553_v52 = vld [vmem:[#allocation6 + $0x118] sm:$0xff]   ;;  %v10556_v55 = vld [vmem:[#allocation6 + $0x1e0] sm:$0xff]   ;;  %v10560_v59 = vld [vmem:[#allocation6 + $0x1e8] sm:$0xff]  }
  0x5d   :  { %v10554_v53 = vld [vmem:[#allocation6 + $0x198] sm:$0xff]   ;;  %v10557_v56 = vld [vmem:[#allocation6 + $0x120] sm:$0xff]   ;;  %v10561_v60 = vld [vmem:[#allocation6 + $0x128] sm:$0xff]  }
  0x5e   :  { %9449 = vmatpush3.bf16.msra.mxu0 %v10521_v18  ;;  %v10558_v57 = vld [vmem:[#allocation6 + $0x1a0] sm:$0xff]   ;;  %v10562_v61 = vld [vmem:[#allocation6 + $0x1a8] sm:$0xff]   ;;  %v10563_v62 = vld [vmem:[#allocation6 + $0x170] sm:$0xff]  }
  0x5f   :  { %9471 = vmatpush3.bf16.msra.mxu1 %v10522_v19  ;;  %9450 = vmatprep.subr.bf16.mxu0 %v10523_v20  ;;  %v10564_v63 = vld [vmem:[#allocation6 + $0x1f0] sm:$0xff]   ;;  %v10567_v2 = vld [vmem:[#allocation6 + $0x178] sm:$0xff]   ;;  %v10575_v12 = vld [vmem:[#allocation6 + $0x240] sm:$0xff]  }
  0x60   :  { %9472 = vmatprep.subr.bf16.mxu1 %v10524_v21  ;;  %v10565_v0 = vld [vmem:[#allocation6 + $0x130] sm:$0xff]   ;;  %v10568_v3 = vld [vmem:[#allocation6 + $0x1f8] sm:$0xff]   ;;  %v10576_v13 = vld [vmem:[#allocation6 + $0x2c0] sm:$0xff]  }
  0x61   :  { %v10566_v1 = vld [vmem:[#allocation6 + $0x1b0] sm:$0xff]   ;;  %v10569_v4 = vld [vmem:[#allocation6 + $0x138] sm:$0xff]   ;;  %v10577_v14 = vld [vmem:[#allocation6 + $0x200] sm:$0xff]  }
  0x62   :  { %9451 = vmatpush3.bf16.msra.mxu0 %v10525_v22  ;;  %v10570_v5 = vld [vmem:[#allocation6 + $0x1b8] sm:$0xff]   ;;  %v74_v6 = vld [vmem:[#allocation3 + $0x10] sm:$0xff]  ;;  %v10578_v15 = vld [vmem:[#allocation6 + $0x280] sm:$0xff]  }
  0x63   :  { %9473 = vmatpush3.bf16.msra.mxu1 %v10526_v23  ;;  %9452 = vmatprep.subr.bf16.mxu0 %v10527_v24  ;;  %v8579_v7 = vcombine.low %v74_v6, %v74_v6  ;;  %v8580_v8 = vcombine.high %v74_v6, %v74_v6  ;;  %v75_v9 = vld [vmem:[#allocation3 + $0x18] sm:$0xff]  ;;  %v10579_v16 = vld [vmem:[#allocation6 + $0x248] sm:$0xff]   ;;  %v10583_v20 = vld [vmem:[#allocation6 + $0x250] sm:$0xff]  }
  0x64   :  { %9474 = vmatprep.subr.bf16.mxu1 %v10528_v25  ;;  %v8581_v10 = vcombine.low %v75_v9, %v75_v9  ;;  %v8582_v11 = vcombine.high %v75_v9, %v75_v9  ;;  %v10580_v17 = vld [vmem:[#allocation6 + $0x2c8] sm:$0xff]   ;;  %v10584_v21 = vld [vmem:[#allocation6 + $0x2d0] sm:$0xff]   ;;  %v10587_v24 = vld [vmem:[#allocation6 + $0x258] sm:$0xff]  }
  0x65   :  { %v10581_v18 = vld [vmem:[#allocation6 + $0x208] sm:$0xff]   ;;  %v10585_v22 = vld [vmem:[#allocation6 + $0x210] sm:$0xff]   ;;  %v10588_v25 = vld [vmem:[#allocation6 + $0x2d8] sm:$0xff]  }
  0x66   :  { %9453 = vmatpush3.bf16.msra.mxu0 %v10529_v26  ;;  %v10582_v19 = vld [vmem:[#allocation6 + $0x288] sm:$0xff]   ;;  %v10586_v23 = vld [vmem:[#allocation6 + $0x290] sm:$0xff]   ;;  %v10589_v26 = vld [vmem:[#allocation6 + $0x218] sm:$0xff]  }
  0x67   :  { %9475 = vmatpush3.bf16.msra.mxu1 %v10530_v27  ;;  %9454 = vmatprep.subr.bf16.mxu0 %v10531_v28  ;;  %v10590_v27 = vld [vmem:[#allocation6 + $0x298] sm:$0xff]   ;;  %v10591_v28 = vld [vmem:[#allocation6 + $0x260] sm:$0xff]   ;;  %v10595_v32 = vld [vmem:[#allocation6 + $0x268] sm:$0xff]  }
  0x68   :  { %9476 = vmatprep.subr.bf16.mxu1 %v10532_v29  ;;  %v10592_v29 = vld [vmem:[#allocation6 + $0x2e0] sm:$0xff]   ;;  %v10596_v33 = vld [vmem:[#allocation6 + $0x2e8] sm:$0xff]   ;;  %v10600_v37 = vld [vmem:[#allocation6 + $0x2f0] sm:$0xff]  }
  0x69   :  { %v10598_v35 = vld [vmem:[#allocation6 + $0x2a8] sm:$0xff]  }
  0x6a   :  { %9455 = vmatpush3.bf16.msra.mxu0 %v10533_v30  ;;  %v10593_v30 = vld [vmem:[#allocation6 + $0x220] sm:$0xff]   ;;  %v10631_v6 = vld [vmem:[#allocation6 + $0x368] sm:$0xff]  }
  0x6b   :  { %9477 = vmatpush3.bf16.msra.mxu1 %v10534_v31  ;;  %9484 = vmatprep.subr.bf16.mxu0 %v10539_v38  ;;  %v10594_v31 = vld [vmem:[#allocation6 + $0x2a0] sm:$0xff]   ;;  %v10601_v38 = vld [vmem:[#allocation6 + $0x230] sm:$0xff]   ;;  %v10634_v9 = vld [vmem:[#allocation6 + $0x3a8] sm:$0xff]  }
  0x6c   :  { %9506 = vmatprep.subr.bf16.mxu1 %v10540_v39  ;;  %v10602_v39 = vld [vmem:[#allocation6 + $0x2b0] sm:$0xff]  }
  0x6d   :  { %6640 = vmatmul.mubr.bf16.vlgmr.msra.gmra.mrb[0].mxu0 %v8575_v34  ;;  %v10597_v34 = vld [vmem:[#allocation6 + $0x228] sm:$0xff]  }
  0x6e   :  { %6680 = vmatmul.mubr.bf16.vlgmr.msra.gmra.mrb[0].mxu1 %v8577_v36  ;;  %9485 = vmatpush3.bf16.msra.mxu0 %v10541_v40  ;;  %v10599_v36 = vld [vmem:[#allocation6 + $0x270] sm:$0xff]   ;;  %v10603_v40 = vld [vmem:[#allocation6 + $0x278] sm:$0xff]  }
  0x6f   :  { %9507 = vmatpush3.bf16.msra.mxu1 %v10542_v41  ;;  %9486 = vmatprep.subr.bf16.mxu0 %v10543_v42  ;;  %v10604_v41 = vld [vmem:[#allocation6 + $0x2f8] sm:$0xff]  }
  0x70   :  { %9508 = vmatprep.subr.bf16.mxu1 %v10544_v43  ;;  %6719 = vmatprep.mubr.bf16.mxu0 %v8580_v8  ;;  %v10605_v42 = vld [vmem:[#allocation6 + $0x238] sm:$0xff]   ;;  %v10633_v8 = vld [vmem:[#allocation6 + $0x328] sm:$0xff]  }
  0x71   :  { %6759 = vmatprep.mubr.bf16.mxu1 %v8582_v11  ;;  %v10606_v43 = vld [vmem:[#allocation6 + $0x2b8] sm:$0xff]   ;;  %v10636_v11 = vld [vmem:[#allocation6 + $0x3f0] sm:$0xff]  }
  0x72   :  { %9487 = vmatpush3.bf16.msra.mxu0 %v10545_v44  ;;  %v76_v44 = vld [vmem:[#allocation3 + $0x20] sm:$0xff] }
  0x73   :  { %9509 = vmatpush3.bf16.msra.mxu1 %v10546_v45  ;;  %9488 = vmatprep.subr.bf16.mxu0 %v10547_v46  ;;  %v77_v45 = vld [vmem:[#allocation3 + $0x28] sm:$0xff]  ;;  %v8583_v46 = vcombine.low %v76_v44, %v76_v44 }
  0x74   :  { %9510 = vmatprep.subr.bf16.mxu1 %v10548_v47  ;;  %v8584_v47 = vcombine.high %v76_v44, %v76_v44  ;;  %v10667_v44 = vld [vmem:[#allocation6 + $0x468] sm:$0xff]  }
  0x76   :  { %9489 = vmatpush3.bf16.msra.mxu0 %v10549_v48  ;;  %v8585_v48 = vcombine.low %v77_v45, %v77_v45 }
  0x77   :  { %9511 = vmatpush3.bf16.msra.mxu1 %v10550_v49  ;;  %9490 = vmatprep.subr.bf16.mxu0 %v10551_v50  ;;  %v8586_v49 = vcombine.high %v77_v45, %v77_v45  ;;  %v10611_v50 = vld [vmem:[#allocation6 + $0x340] sm:$0xff]   ;;  %v10668_v45 = vld [vmem:[#allocation6 + $0x4e8] sm:$0xff]  }
  0x78   :  { %9512 = vmatprep.subr.bf16.mxu1 %v10552_v51  ;;  %v10612_v51 = vld [vmem:[#allocation6 + $0x3c0] sm:$0xff]  }
  0x7a   :  { %9491 = vmatpush3.bf16.msra.mxu0 %v10553_v52  ;;  %v10613_v52 = vld [vmem:[#allocation6 + $0x300] sm:$0xff]  }
  0x7b   :  { %9513 = vmatpush3.bf16.msra.mxu1 %v10554_v53  ;;  %9492 = vmatprep.subr.bf16.mxu0 %v10555_v54  ;;  %v10614_v53 = vld [vmem:[#allocation6 + $0x380] sm:$0xff]   ;;  %v10615_v54 = vld [vmem:[#allocation6 + $0x348] sm:$0xff]  }
  0x7c   :  { %9514 = vmatprep.subr.bf16.mxu1 %v10556_v55  ;;  %v10616_v55 = vld [vmem:[#allocation6 + $0x3c8] sm:$0xff]  }
  0x7e   :  { %9493 = vmatpush3.bf16.msra.mxu0 %v10557_v56  ;;  %v10617_v56 = vld [vmem:[#allocation6 + $0x308] sm:$0xff]  }
  0x7f   :  { %9515 = vmatpush3.bf16.msra.mxu1 %v10558_v57  ;;  %9494 = vmatprep.subr.bf16.mxu0 %v10559_v58  ;;  %v10618_v57 = vld [vmem:[#allocation6 + $0x388] sm:$0xff]   ;;  %v10619_v58 = vld [vmem:[#allocation6 + $0x350] sm:$0xff]  }
  0x80   :  { %9516 = vmatprep.subr.bf16.mxu1 %v10560_v59  ;;  %v10620_v59 = vld [vmem:[#allocation6 + $0x3d0] sm:$0xff]  }
  0x82   :  { %9495 = vmatpush3.bf16.msra.mxu0 %v10561_v60  ;;  %v10621_v60 = vld [vmem:[#allocation6 + $0x310] sm:$0xff]  }
  0x83   :  { %9517 = vmatpush3.bf16.msra.mxu1 %v10562_v61  ;;  %9496 = vmatprep.subr.bf16.mxu0 %v10563_v62  ;;  %v10622_v61 = vld [vmem:[#allocation6 + $0x390] sm:$0xff]   ;;  %v10623_v62 = vld [vmem:[#allocation6 + $0x358] sm:$0xff]  }
  0x84   :  { %9518 = vmatprep.subr.bf16.mxu1 %v10564_v63  ;;  %v10624_v63 = vld [vmem:[#allocation6 + $0x3d8] sm:$0xff]  }
  0x86   :  { %9497 = vmatpush3.bf16.msra.mxu0 %v10565_v0  ;;  %v10625_v0 = vld [vmem:[#allocation6 + $0x318] sm:$0xff]  }
  0x87   :  { %9519 = vmatpush3.bf16.msra.mxu1 %v10566_v1  ;;  %9498 = vmatprep.subr.bf16.mxu0 %v10567_v2  ;;  %v10626_v1 = vld [vmem:[#allocation6 + $0x398] sm:$0xff]   ;;  %v10627_v2 = vld [vmem:[#allocation6 + $0x360] sm:$0xff]  }
  0x88   :  { %9520 = vmatprep.subr.bf16.mxu1 %v10568_v3  ;;  %v10628_v3 = vld [vmem:[#allocation6 + $0x3e0] sm:$0xff]  }
  0x8a   :  { %9499 = vmatpush3.bf16.msra.mxu0 %v10569_v4  ;;  %v10629_v4 = vld [vmem:[#allocation6 + $0x320] sm:$0xff]  }
  0x8b   :  { %9521 = vmatpush3.bf16.msra.mxu1 %v10570_v5  ;;  %9528 = vmatprep.subr.bf16.mxu0 %v10575_v12  ;;  %v10630_v5 = vld [vmem:[#allocation6 + $0x3a0] sm:$0xff]   ;;  %v10637_v12 = vld [vmem:[#allocation6 + $0x330] sm:$0xff]  }
  0x8c   :  { %9550 = vmatprep.subr.bf16.mxu1 %v10576_v13  ;;  %v10638_v13 = vld [vmem:[#allocation6 + $0x3b0] sm:$0xff]  }
  0x8d   :  { %6720 = vmatmul.mubr.bf16.vlgmr.msra.gmra.mrb[4].mxu0 %v8579_v7  ;;  %v10632_v7 = vld [vmem:[#allocation6 + $0x3e8] sm:$0xff]  }
  0x8e   :  { %6760 = vmatmul.mubr.bf16.vlgmr.msra.gmra.mrb[4].mxu1 %v8581_v10  ;;  %9529 = vmatpush3.bf16.msra.mxu0 %v10577_v14  ;;  %v10635_v10 = vld [vmem:[#allocation6 + $0x370] sm:$0xff]   ;;  %v10639_v14 = vld [vmem:[#allocation6 + $0x378] sm:$0xff]  }
  0x8f   :  { %9551 = vmatpush3.bf16.msra.mxu1 %v10578_v15  ;;  %9530 = vmatprep.subr.bf16.mxu0 %v10579_v16  ;;  %v10640_v15 = vld [vmem:[#allocation6 + $0x3f8] sm:$0xff]  }
  0x90   :  { %9552 = vmatprep.subr.bf16.mxu1 %v10580_v17  ;;  %6799 = vmatprep.mubr.bf16.mxu0 %v8584_v47  ;;  %v10641_v16 = vld [vmem:[#allocation6 + $0x338] sm:$0xff]   ;;  %v10670_v47 = vld [vmem:[#allocation6 + $0x4a8] sm:$0xff]  }
  0x91   :  { %6839 = vmatprep.mubr.bf16.mxu1 %v8586_v49  ;;  %v10642_v17 = vld [vmem:[#allocation6 + $0x3b8] sm:$0xff]   ;;  %v10672_v49 = vld [vmem:[#allocation6 + $0x4f0] sm:$0xff]  }
  0x92   :  { %9531 = vmatpush3.bf16.msra.mxu0 %v10581_v18  ;;  %v78_v18 = vld [vmem:[#allocation3 + $0x30] sm:$0xff] }
  0x93   :  { %9553 = vmatpush3.bf16.msra.mxu1 %v10582_v19  ;;  %9532 = vmatprep.subr.bf16.mxu0 %v10583_v20  ;;  %v79_v19 = vld [vmem:[#allocation3 + $0x38] sm:$0xff]  ;;  %v8587_v20 = vcombine.low %v78_v18, %v78_v18 }
  0x94   :  { %9554 = vmatprep.subr.bf16.mxu1 %v10584_v21  ;;  %v8588_v21 = vcombine.high %v78_v18, %v78_v18  ;;  %v10703_v18 = vld [vmem:[#allocation6 + $0x568] sm:$0xff]  }
  0x96   :  { %9533 = vmatpush3.bf16.msra.mxu0 %v10585_v22  ;;  %v8589_v22 = vcombine.low %v79_v19, %v79_v19 }
  0x97   :  { %9555 = vmatpush3.bf16.msra.mxu1 %v10586_v23  ;;  %9534 = vmatprep.subr.bf16.mxu0 %v10587_v24  ;;  %v10647_v23 = vld [vmem:[#allocation6 + $0x440] sm:$0xff]   ;;  %v8590_v24 = vcombine.high %v79_v19, %v79_v19  ;;  %v10704_v19 = vld [vmem:[#allocation6 + $0x5e8] sm:$0xff]  }
  0x98   :  { %9556 = vmatprep.subr.bf16.mxu1 %v10588_v25  ;;  %v10648_v25 = vld [vmem:[#allocation6 + $0x4c0] sm:$0xff]  }
  0x9a   :  { %9535 = vmatpush3.bf16.msra.mxu0 %v10589_v26  ;;  %v10649_v26 = vld [vmem:[#allocation6 + $0x400] sm:$0xff]  }
  0x9b   :  { %9557 = vmatpush3.bf16.msra.mxu1 %v10590_v27  ;;  %9536 = vmatprep.subr.bf16.mxu0 %v10591_v28  ;;  %v10650_v27 = vld [vmem:[#allocation6 + $0x480] sm:$0xff]   ;;  %v10651_v28 = vld [vmem:[#allocation6 + $0x448] sm:$0xff]  }
  0x9c   :  { %9558 = vmatprep.subr.bf16.mxu1 %v10592_v29  ;;  %v10652_v29 = vld [vmem:[#allocation6 + $0x4c8] sm:$0xff]  }
  0x9e   :  { %9537 = vmatpush3.bf16.msra.mxu0 %v10593_v30  ;;  %v10653_v30 = vld [vmem:[#allocation6 + $0x408] sm:$0xff]  }
  0x9f   :  { %9559 = vmatpush3.bf16.msra.mxu1 %v10594_v31  ;;  %9538 = vmatprep.subr.bf16.mxu0 %v10595_v32  ;;  %v10654_v31 = vld [vmem:[#allocation6 + $0x488] sm:$0xff]   ;;  %v10655_v32 = vld [vmem:[#allocation6 + $0x450] sm:$0xff]  }
  0xa0   :  { %9560 = vmatprep.subr.bf16.mxu1 %v10596_v33  ;;  %v10656_v33 = vld [vmem:[#allocation6 + $0x4d0] sm:$0xff]  }
  0xa2   :  { %9539 = vmatpush3.bf16.msra.mxu0 %v10597_v34  ;;  %v10657_v34 = vld [vmem:[#allocation6 + $0x410] sm:$0xff]  }
  0xa3   :  { %9561 = vmatpush3.bf16.msra.mxu1 %v10598_v35  ;;  %9540 = vmatprep.subr.bf16.mxu0 %v10599_v36  ;;  %v10658_v35 = vld [vmem:[#allocation6 + $0x490] sm:$0xff]   ;;  %v10659_v36 = vld [vmem:[#allocation6 + $0x458] sm:$0xff]  }
  0xa4   :  { %9562 = vmatprep.subr.bf16.mxu1 %v10600_v37  ;;  %v10660_v37 = vld [vmem:[#allocation6 + $0x4d8] sm:$0xff]  }
  0xa6   :  { %9541 = vmatpush3.bf16.msra.mxu0 %v10601_v38  ;;  %v10661_v38 = vld [vmem:[#allocation6 + $0x418] sm:$0xff]  }
  0xa7   :  { %9563 = vmatpush3.bf16.msra.mxu1 %v10602_v39  ;;  %9542 = vmatprep.subr.bf16.mxu0 %v10603_v40  ;;  %v10662_v39 = vld [vmem:[#allocation6 + $0x498] sm:$0xff]   ;;  %v10663_v40 = vld [vmem:[#allocation6 + $0x460] sm:$0xff]  }
  0xa8   :  { %9564 = vmatprep.subr.bf16.mxu1 %v10604_v41  ;;  %v10664_v41 = vld [vmem:[#allocation6 + $0x4e0] sm:$0xff]  }
  0xaa   :  { %9543 = vmatpush3.bf16.msra.mxu0 %v10605_v42  ;;  %v10665_v42 = vld [vmem:[#allocation6 + $0x420] sm:$0xff]  }
  0xab   :  { %9565 = vmatpush3.bf16.msra.mxu1 %v10606_v43  ;;  %9572 = vmatprep.subr.bf16.mxu0 %v10611_v50  ;;  %v10666_v43 = vld [vmem:[#allocation6 + $0x4a0] sm:$0xff]   ;;  %v10673_v50 = vld [vmem:[#allocation6 + $0x430] sm:$0xff]  }
  0xac   :  { %9594 = vmatprep.subr.bf16.mxu1 %v10612_v51  ;;  %v10674_v51 = vld [vmem:[#allocation6 + $0x4b0] sm:$0xff]  }
  0xad   :  { %6800 = vmatmul.mubr.bf16.vlgmr.msra.gmra.mrb[8].mxu0 %v8583_v46  ;;  %v10669_v46 = vld [vmem:[#allocation6 + $0x428] sm:$0xff]  }
  0xae   :  { %6840 = vmatmul.mubr.bf16.vlgmr.msra.gmra.mrb[8].mxu1 %v8585_v48  ;;  %9573 = vmatpush3.bf16.msra.mxu0 %v10613_v52  ;;  %v10671_v48 = vld [vmem:[#allocation6 + $0x470] sm:$0xff]   ;;  %v10675_v52 = vld [vmem:[#allocation6 + $0x478] sm:$0xff]  }
  0xaf   :  { %9595 = vmatpush3.bf16.msra.mxu1 %v10614_v53  ;;  %9574 = vmatprep.subr.bf16.mxu0 %v10615_v54  ;;  %v10676_v53 = vld [vmem:[#allocation6 + $0x4f8] sm:$0xff]  }
  0xb0   :  { %9596 = vmatprep.subr.bf16.mxu1 %v10616_v55  ;;  %6879 = vmatprep.mubr.bf16.mxu0 %v8588_v21  ;;  %v10677_v54 = vld [vmem:[#allocation6 + $0x438] sm:$0xff]   ;;  %v10706_v21 = vld [vmem:[#allocation6 + $0x5a8] sm:$0xff]  }
  0xb1   :  { %6919 = vmatprep.mubr.bf16.mxu1 %v8590_v24  ;;  %v10678_v55 = vld [vmem:[#allocation6 + $0x4b8] sm:$0xff]   ;;  %v10709_v24 = vld [vmem:[#allocation6 + $0x530] sm:$0xff]  }
  0xb2   :  { %9575 = vmatpush3.bf16.msra.mxu0 %v10617_v56  ;;  %v80_v56 = vld [vmem:[#allocation3 + $0x40] sm:$0xff] }
  0xb3   :  { %9597 = vmatpush3.bf16.msra.mxu1 %v10618_v57  ;;  %9576 = vmatprep.subr.bf16.mxu0 %v10619_v58  ;;  %v8591_v57 = vcombine.low %v80_v56, %v80_v56  ;;  %v8592_v58 = vcombine.high %v80_v56, %v80_v56  ;;  %v10739_v56 = vld [vmem:[#allocation6 + $0x668] sm:$0xff]  }
  0xb4   :  { %9598 = vmatprep.subr.bf16.mxu1 %v10620_v59  ;;  %v81_v59 = vld [vmem:[#allocation3 + $0x48] sm:$0xff] }
  0xb6   :  { %9577 = vmatpush3.bf16.msra.mxu0 %v10621_v60  ;;  %v8593_v60 = vcombine.low %v81_v59, %v81_v59 }
  0xb7   :  { %9599 = vmatpush3.bf16.msra.mxu1 %v10622_v61  ;;  %9578 = vmatprep.subr.bf16.mxu0 %v10623_v62  ;;  %v8594_v61 = vcombine.high %v81_v59, %v81_v59  ;;  %v10683_v62 = vld [vmem:[#allocation6 + $0x540] sm:$0xff]   ;;  %v10742_v59 = vld [vmem:[#allocation6 + $0x6a8] sm:$0xff]  }
  0xb8   :  { %9600 = vmatprep.subr.bf16.mxu1 %v10624_v63  ;;  %v10684_v63 = vld [vmem:[#allocation6 + $0x5c0] sm:$0xff]  }
  0xba   :  { %9579 = vmatpush3.bf16.msra.mxu0 %v10625_v0  ;;  %v10685_v0 = vld [vmem:[#allocation6 + $0x500] sm:$0xff]  }
  0xbb   :  { %9601 = vmatpush3.bf16.msra.mxu1 %v10626_v1  ;;  %9580 = vmatprep.subr.bf16.mxu0 %v10627_v2  ;;  %v10686_v1 = vld [vmem:[#allocation6 + $0x580] sm:$0xff]   ;;  %v10687_v2 = vld [vmem:[#allocation6 + $0x548] sm:$0xff]  }
  0xbc   :  { %9602 = vmatprep.subr.bf16.mxu1 %v10628_v3  ;;  %v10688_v3 = vld [vmem:[#allocation6 + $0x5c8] sm:$0xff]  }
  0xbe   :  { %9581 = vmatpush3.bf16.msra.mxu0 %v10629_v4  ;;  %v10689_v4 = vld [vmem:[#allocation6 + $0x508] sm:$0xff]  }
  0xbf   :  { %9603 = vmatpush3.bf16.msra.mxu1 %v10630_v5  ;;  %9582 = vmatprep.subr.bf16.mxu0 %v10631_v6  ;;  %v10690_v5 = vld [vmem:[#allocation6 + $0x588] sm:$0xff]   ;;  %v10691_v6 = vld [vmem:[#allocation6 + $0x550] sm:$0xff]  }
  0xc0   :  { %9604 = vmatprep.subr.bf16.mxu1 %v10632_v7  ;;  %v10692_v7 = vld [vmem:[#allocation6 + $0x5d0] sm:$0xff]  }
  0xc2   :  { %9583 = vmatpush3.bf16.msra.mxu0 %v10633_v8  ;;  %v10693_v8 = vld [vmem:[#allocation6 + $0x510] sm:$0xff]  }
  0xc3   :  { %9605 = vmatpush3.bf16.msra.mxu1 %v10634_v9  ;;  %9584 = vmatprep.subr.bf16.mxu0 %v10635_v10  ;;  %v10694_v9 = vld [vmem:[#allocation6 + $0x590] sm:$0xff]   ;;  %v10695_v10 = vld [vmem:[#allocation6 + $0x558] sm:$0xff]  }
  0xc4   :  { %9606 = vmatprep.subr.bf16.mxu1 %v10636_v11  ;;  %v10696_v11 = vld [vmem:[#allocation6 + $0x5d8] sm:$0xff]  }
  0xc6   :  { %9585 = vmatpush3.bf16.msra.mxu0 %v10637_v12  ;;  %v10697_v12 = vld [vmem:[#allocation6 + $0x518] sm:$0xff]  }
  0xc7   :  { %9607 = vmatpush3.bf16.msra.mxu1 %v10638_v13  ;;  %9586 = vmatprep.subr.bf16.mxu0 %v10639_v14  ;;  %v10698_v13 = vld [vmem:[#allocation6 + $0x598] sm:$0xff]   ;;  %v10699_v14 = vld [vmem:[#allocation6 + $0x560] sm:$0xff]  }
  0xc8   :  { %9608 = vmatprep.subr.bf16.mxu1 %v10640_v15  ;;  %v10700_v15 = vld [vmem:[#allocation6 + $0x5e0] sm:$0xff]  }
  0xca   :  { %9587 = vmatpush3.bf16.msra.mxu0 %v10641_v16  ;;  %v10701_v16 = vld [vmem:[#allocation6 + $0x520] sm:$0xff]  }
  0xcb   :  { %9609 = vmatpush3.bf16.msra.mxu1 %v10642_v17  ;;  %9616 = vmatprep.subr.bf16.mxu0 %v10647_v23  ;;  %v10702_v17 = vld [vmem:[#allocation6 + $0x5a0] sm:$0xff]   ;;  %v10708_v23 = vld [vmem:[#allocation6 + $0x5f0] sm:$0xff]  }
  0xcc   :  { %9638 = vmatprep.subr.bf16.mxu1 %v10648_v25  ;;  %v10710_v25 = vld [vmem:[#allocation6 + $0x5b0] sm:$0xff]  }
  0xcd   :  { %6880 = vmatmul.mubr.bf16.vlgmr.msra.gmra.mrb[12].mxu0 %v8587_v20  ;;  %v10705_v20 = vld [vmem:[#allocation6 + $0x528] sm:$0xff]  }
  0xce   :  { %6920 = vmatmul.mubr.bf16.vlgmr.msra.gmra.mrb[12].mxu1 %v8589_v22  ;;  %9617 = vmatpush3.bf16.msra.mxu0 %v10649_v26  ;;  %v10707_v22 = vld [vmem:[#allocation6 + $0x570] sm:$0xff]   ;;  %v10711_v26 = vld [vmem:[#allocation6 + $0x578] sm:$0xff]  }
  0xcf   :  { %9639 = vmatpush3.bf16.msra.mxu1 %v10650_v27  ;;  %9618 = vmatprep.subr.bf16.mxu0 %v10651_v28  ;;  %v10712_v27 = vld [vmem:[#allocation6 + $0x5f8] sm:$0xff]  }
  0xd0   :  { %9640 = vmatprep.subr.bf16.mxu1 %v10652_v29  ;;  %6959 = vmatprep.mubr.bf16.mxu0 %v8592_v58  ;;  %v10713_v28 = vld [vmem:[#allocation6 + $0x538] sm:$0xff]   ;;  %v10741_v58 = vld [vmem:[#allocation6 + $0x628] sm:$0xff]  }
  0xd1   :  { %6999 = vmatprep.mubr.bf16.mxu1 %v8594_v61  ;;  %v10714_v29 = vld [vmem:[#allocation6 + $0x5b8] sm:$0xff]   ;;  %v10744_v61 = vld [vmem:[#allocation6 + $0x6f0] sm:$0xff]  }
  0xd2   :  { %9619 = vmatpush3.bf16.msra.mxu0 %v10653_v30  ;;  %v82_v30 = vld [vmem:[#allocation3 + $0x50] sm:$0xff] }
  0xd3   :  { %9641 = vmatpush3.bf16.msra.mxu1 %v10654_v31  ;;  %9620 = vmatprep.subr.bf16.mxu0 %v10655_v32  ;;  %v83_v31 = vld [vmem:[#allocation3 + $0x58] sm:$0xff]  ;;  %v8595_v32 = vcombine.low %v82_v30, %v82_v30 }
  0xd4   :  { %9642 = vmatprep.subr.bf16.mxu1 %v10656_v33  ;;  %v8596_v33 = vcombine.high %v82_v30, %v82_v30  ;;  %v10774_v30 = vld [vmem:[#allocation6 + $0x7a0] sm:$0xff]  }
  0xd6   :  { %9621 = vmatpush3.bf16.msra.mxu0 %v10657_v34  ;;  %v8597_v34 = vcombine.low %v83_v31, %v83_v31 }
  0xd7   :  { %9643 = vmatpush3.bf16.msra.mxu1 %v10658_v35  ;;  %9622 = vmatprep.subr.bf16.mxu0 %v10659_v36  ;;  %v8598_v35 = vcombine.high %v83_v31, %v83_v31  ;;  %v10719_v36 = vld [vmem:[#allocation6 + $0x640] sm:$0xff]  }
  0xd8   :  { %9644 = vmatprep.subr.bf16.mxu1 %v10660_v37  ;;  %v10720_v37 = vld [vmem:[#allocation6 + $0x6c0] sm:$0xff]  }
  0xda   :  { %9623 = vmatpush3.bf16.msra.mxu0 %v10661_v38  ;;  %v10721_v38 = vld [vmem:[#allocation6 + $0x600] sm:$0xff]  }
  0xdb   :  { %9645 = vmatpush3.bf16.msra.mxu1 %v10662_v39  ;;  %9624 = vmatprep.subr.bf16.mxu0 %v10663_v40  ;;  %v10722_v39 = vld [vmem:[#allocation6 + $0x680] sm:$0xff]   ;;  %v10723_v40 = vld [vmem:[#allocation6 + $0x648] sm:$0xff]  }
  0xdc   :  { %9646 = vmatprep.subr.bf16.mxu1 %v10664_v41  ;;  %v10724_v41 = vld [vmem:[#allocation6 + $0x6c8] sm:$0xff]  }
  0xde   :  { %9625 = vmatpush3.bf16.msra.mxu0 %v10665_v42  ;;  %v10725_v42 = vld [vmem:[#allocation6 + $0x608] sm:$0xff]  }
  0xdf   :  { %9647 = vmatpush3.bf16.msra.mxu1 %v10666_v43  ;;  %9626 = vmatprep.subr.bf16.mxu0 %v10667_v44  ;;  %v10726_v43 = vld [vmem:[#allocation6 + $0x688] sm:$0xff]   ;;  %v10727_v44 = vld [vmem:[#allocation6 + $0x650] sm:$0xff]  }
  0xe0   :  { %9648 = vmatprep.subr.bf16.mxu1 %v10668_v45  ;;  %v10728_v45 = vld [vmem:[#allocation6 + $0x6d0] sm:$0xff]  }
  0xe2   :  { %9627 = vmatpush3.bf16.msra.mxu0 %v10669_v46  ;;  %v10729_v46 = vld [vmem:[#allocation6 + $0x610] sm:$0xff]  }
  0xe3   :  { %9649 = vmatpush3.bf16.msra.mxu1 %v10670_v47  ;;  %9628 = vmatprep.subr.bf16.mxu0 %v10671_v48  ;;  %v10730_v47 = vld [vmem:[#allocation6 + $0x690] sm:$0xff]   ;;  %v10731_v48 = vld [vmem:[#allocation6 + $0x658] sm:$0xff]  }
  0xe4   :  { %9650 = vmatprep.subr.bf16.mxu1 %v10672_v49  ;;  %v10732_v49 = vld [vmem:[#allocation6 + $0x6d8] sm:$0xff]  }
  0xe6   :  { %9629 = vmatpush3.bf16.msra.mxu0 %v10673_v50  ;;  %v10733_v50 = vld [vmem:[#allocation6 + $0x618] sm:$0xff]  }
  0xe7   :  { %9651 = vmatpush3.bf16.msra.mxu1 %v10674_v51  ;;  %9630 = vmatprep.subr.bf16.mxu0 %v10675_v52  ;;  %v10734_v51 = vld [vmem:[#allocation6 + $0x698] sm:$0xff]   ;;  %v10735_v52 = vld [vmem:[#allocation6 + $0x660] sm:$0xff]  }
  0xe8   :  { %9652 = vmatprep.subr.bf16.mxu1 %v10676_v53  ;;  %v10736_v53 = vld [vmem:[#allocation6 + $0x6e0] sm:$0xff]  }
  0xea   :  { %9631 = vmatpush3.bf16.msra.mxu0 %v10677_v54  ;;  %v10737_v54 = vld [vmem:[#allocation6 + $0x620] sm:$0xff]  }
  0xeb   :  { %9653 = vmatpush3.bf16.msra.mxu1 %v10678_v55  ;;  %9660 = vmatprep.subr.bf16.mxu0 %v10683_v62  ;;  %v10738_v55 = vld [vmem:[#allocation6 + $0x6a0] sm:$0xff]   ;;  %v10745_v62 = vld [vmem:[#allocation6 + $0x630] sm:$0xff]  }
  0xec   :  { %9682 = vmatprep.subr.bf16.mxu1 %v10684_v63  ;;  %v10746_v63 = vld [vmem:[#allocation6 + $0x6b0] sm:$0xff]  }
  0xed   :  { %6960 = vmatmul.mubr.bf16.vlgmr.msra.gmra.mrb[16].mxu0 %v8591_v57  ;;  %v10740_v57 = vld [vmem:[#allocation6 + $0x6e8] sm:$0xff]  }
  0xee   :  { %7000 = vmatmul.mubr.bf16.vlgmr.msra.gmra.mrb[16].mxu1 %v8593_v60  ;;  %9661 = vmatpush3.bf16.msra.mxu0 %v10685_v0  ;;  %v10743_v60 = vld [vmem:[#allocation6 + $0x670] sm:$0xff]   ;;  %v10747_v0 = vld [vmem:[#allocation6 + $0x678] sm:$0xff]  }
  0xef   :  { %9683 = vmatpush3.bf16.msra.mxu1 %v10686_v1  ;;  %9662 = vmatprep.subr.bf16.mxu0 %v10687_v2  ;;  %v10748_v1 = vld [vmem:[#allocation6 + $0x6f8] sm:$0xff]  }
  0xf0   :  { %9684 = vmatprep.subr.bf16.mxu1 %v10688_v3  ;;  %7039 = vmatprep.mubr.bf16.mxu0 %v8596_v33  ;;  %v10749_v2 = vld [vmem:[#allocation6 + $0x638] sm:$0xff]  }
  0xf1   :  { %7079 = vmatprep.mubr.bf16.mxu1 %v8598_v35  ;;  %v10750_v3 = vld [vmem:[#allocation6 + $0x6b8] sm:$0xff]  }
  0xf2   :  { %9663 = vmatpush3.bf16.msra.mxu0 %v10689_v4  ;;  %v84_v4 = vld [vmem:[#allocation3 + $0x60] sm:$0xff] }
  0xf3   :  { %9685 = vmatpush3.bf16.msra.mxu1 %v10690_v5  ;;  %9664 = vmatprep.subr.bf16.mxu0 %v10691_v6  ;;  %v85_v5 = vld [vmem:[#allocation3 + $0x68] sm:$0xff]  ;;  %v8599_v6 = vcombine.low %v84_v4, %v84_v4 }
  0xf4   :  { %9686 = vmatprep.subr.bf16.mxu1 %v10692_v7  ;;  %v8600_v7 = vcombine.high %v84_v4, %v84_v4  ;;  %v10798_v4 = vld [vmem:[#allocation6 + $0x888] sm:$0xff]  }
  0xf6   :  { %9665 = vmatpush3.bf16.msra.mxu0 %v10693_v8  ;;  %v8601_v8 = vcombine.low %v85_v5, %v85_v5 }
  0xf7   :  { %9687 = vmatpush3.bf16.msra.mxu1 %v10694_v9  ;;  %9666 = vmatprep.subr.bf16.mxu0 %v10695_v10  ;;  %v10755_v9 = vld [vmem:[#allocation6 + $0x740] sm:$0xff]   ;;  %v8602_v10 = vcombine.high %v85_v5, %v85_v5  ;;  %v10799_v5 = vld [vmem:[#allocation6 + $0x850] sm:$0xff]  }
  0xf8   :  { %9688 = vmatprep.subr.bf16.mxu1 %v10696_v11  ;;  %v10756_v11 = vld [vmem:[#allocation6 + $0x7c0] sm:$0xff]  }
  0xfa   :  { %9667 = vmatpush3.bf16.msra.mxu0 %v10697_v12  ;;  %v10757_v12 = vld [vmem:[#allocation6 + $0x700] sm:$0xff]  }
  0xfb   :  { %9689 = vmatpush3.bf16.msra.mxu1 %v10698_v13  ;;  %9668 = vmatprep.subr.bf16.mxu0 %v10699_v14  ;;  %v10758_v13 = vld [vmem:[#allocation6 + $0x780] sm:$0xff]   ;;  %v10759_v14 = vld [vmem:[#allocation6 + $0x748] sm:$0xff]  }
  0xfc   :  { %9690 = vmatprep.subr.bf16.mxu1 %v10700_v15  ;;  %v10760_v15 = vld [vmem:[#allocation6 + $0x7c8] sm:$0xff]  }
  0xfe   :  { %9669 = vmatpush3.bf16.msra.mxu0 %v10701_v16  ;;  %v10761_v16 = vld [vmem:[#allocation6 + $0x708] sm:$0xff]  }
  0xff   :  { %9691 = vmatpush3.bf16.msra.mxu1 %v10702_v17  ;;  %9670 = vmatprep.subr.bf16.mxu0 %v10703_v18  ;;  %v10762_v17 = vld [vmem:[#allocation6 + $0x788] sm:$0xff]   ;;  %v10763_v18 = vld [vmem:[#allocation6 + $0x750] sm:$0xff]  }
 0x100   :  { %9692 = vmatprep.subr.bf16.mxu1 %v10704_v19  ;;  %v10764_v19 = vld [vmem:[#allocation6 + $0x7d0] sm:$0xff]  }
 0x102   :  { %9671 = vmatpush3.bf16.msra.mxu0 %v10705_v20  ;;  %v10765_v20 = vld [vmem:[#allocation6 + $0x710] sm:$0xff]  }
 0x103   :  { %9693 = vmatpush3.bf16.msra.mxu1 %v10706_v21  ;;  %9672 = vmatprep.subr.bf16.mxu0 %v10707_v22  ;;  %v10766_v21 = vld [vmem:[#allocation6 + $0x790] sm:$0xff]   ;;  %v10767_v22 = vld [vmem:[#allocation6 + $0x758] sm:$0xff]  }
 0x104   :  { %9694 = vmatprep.subr.bf16.mxu1 %v10708_v23  ;;  %v10768_v23 = vld [vmem:[#allocation6 + $0x7d8] sm:$0xff]  }
 0x106   :  { %9673 = vmatpush3.bf16.msra.mxu0 %v10709_v24  ;;  %v10769_v24 = vld [vmem:[#allocation6 + $0x718] sm:$0xff]  }
 0x107   :  { %9695 = vmatpush3.bf16.msra.mxu1 %v10710_v25  ;;  %9674 = vmatprep.subr.bf16.mxu0 %v10711_v26  ;;  %v10770_v25 = vld [vmem:[#allocation6 + $0x798] sm:$0xff]   ;;  %v10771_v26 = vld [vmem:[#allocation6 + $0x760] sm:$0xff]  }
 0x108   :  { %9696 = vmatprep.subr.bf16.mxu1 %v10712_v27  ;;  %v10772_v27 = vld [vmem:[#allocation6 + $0x7e0] sm:$0xff]  }
 0x10a   :  { %9675 = vmatpush3.bf16.msra.mxu0 %v10713_v28  ;;  %v10773_v28 = vld [vmem:[#allocation6 + $0x720] sm:$0xff]  }
 0x10b   :  { %9697 = vmatpush3.bf16.msra.mxu1 %v10714_v29  ;;  %9704 = vmatprep.subr.bf16.mxu0 %v10719_v36 }
 0x10c   :  { %9726 = vmatprep.subr.bf16.mxu1 %v10720_v37  ;;  %v10775_v37 = vld [vmem:[#allocation6 + $0x768] sm:$0xff]  }
 0x10d   :  { %7040 = vmatmul.mubr.bf16.vlgmr.msra.gmra.mrb[20].mxu0 %v8595_v32  ;;  %v8574_v32 = vld [vmem:[#allocation8] ss:$0 sm:$0xff] }
 0x10e   :  { %7080 = vmatmul.mubr.bf16.vlgmr.msra.gmra.mrb[20].mxu1 %v8597_v34  ;;  %9705 = vmatpush3.bf16.msra.mxu0 %v10721_v38 }
 0x10f   :  { %9727 = vmatpush3.bf16.msra.mxu1 %v10722_v39  ;;  %9706 = vmatprep.subr.bf16.mxu0 %v10723_v40  ;;  %v10776_v39 = vld [vmem:[#allocation6 + $0x7e8] sm:$0xff]  }
 0x110   :  { %9728 = vmatprep.subr.bf16.mxu1 %v10724_v41  ;;  %7119 = vmatprep.mubr.bf16.mxu0 %v8600_v7  ;;  %v10801_v7 = vld [vmem:[#allocation6 + $0x810] sm:$0xff]  }
 0x111   :  { %7159 = vmatprep.mubr.bf16.mxu1 %v8602_v10  ;;  %v10804_v10 = vld [vmem:[#allocation6 + $0x8d8] sm:$0xff]  }
 0x112   :  { %9707 = vmatpush3.bf16.msra.mxu0 %v10725_v42  ;;  %v10777_v42 = vld [vmem:[#allocation6 + $0x728] sm:$0xff]  }
 0x113   :  { %9729 = vmatpush3.bf16.msra.mxu1 %v10726_v43  ;;  %9708 = vmatprep.subr.bf16.mxu0 %v10727_v44  ;;  %v10778_v44 = vld [vmem:[#allocation6 + $0x7a8] sm:$0xff]  }
 0x114   :  { %9730 = vmatprep.subr.bf16.mxu1 %v10728_v45 }
 0x116   :  { %9709 = vmatpush3.bf16.msra.mxu0 %v10729_v46 }
 0x117   :  { %9731 = vmatpush3.bf16.msra.mxu1 %v10730_v47  ;;  %9710 = vmatprep.subr.bf16.mxu0 %v10731_v48  ;;  %v10779_v47 = vld [vmem:[#allocation6 + $0x770] sm:$0xff]  }
 0x118   :  { %9732 = vmatprep.subr.bf16.mxu1 %v10732_v49  ;;  %v10780_v48 = vld [vmem:[#allocation6 + $0x7f0] sm:$0xff]  }
 0x119   :  { %v10781_v49 = vld [vmem:[#allocation6 + $0x730] sm:$0xff]  }
 0x11a   :  { %9711 = vmatpush3.bf16.msra.mxu0 %v10733_v50  ;;  %v10782_v50 = vld [vmem:[#allocation6 + $0x7b0] sm:$0xff]  }
 0x11b   :  { %9733 = vmatpush3.bf16.msra.mxu1 %v10734_v51  ;;  %9712 = vmatprep.subr.bf16.mxu0 %v10735_v52  ;;  %v10783_v51 = vld [vmem:[#allocation6 + $0x778] sm:$0xff]  }
 0x11c   :  { %9734 = vmatprep.subr.bf16.mxu1 %v10736_v53  ;;  %v10784_v52 = vld [vmem:[#allocation6 + $0x7f8] sm:$0xff]  }
 0x11d   :  { %v10785_v53 = vld [vmem:[#allocation6 + $0x738] sm:$0xff]  }
 0x11e   :  { %9713 = vmatpush3.bf16.msra.mxu0 %v10737_v54  ;;  %v10786_v54 = vld [vmem:[#allocation6 + $0x7b8] sm:$0xff]  }
 0x11f   :  { %9735 = vmatpush3.bf16.msra.mxu1 %v10738_v55  ;;  %9714 = vmatprep.subr.bf16.mxu0 %v10739_v56  ;;  %v86_v55 = vld [vmem:[#allocation3 + $0x70] sm:$0xff]  ;;  %v87_v56 = vld [vmem:[#allocation3 + $0x78] sm:$0xff] }
 0x120   :  { %9736 = vmatprep.subr.bf16.mxu1 %v10740_v57  ;;  %v8603_v57 = vcombine.low %v86_v55, %v86_v55 }
 0x122   :  { %9715 = vmatpush3.bf16.msra.mxu0 %v10741_v58  ;;  %v8604_v58 = vcombine.high %v86_v55, %v86_v55  ;;  %v10835_v55 = vld [vmem:[#allocation6 + $0x950] sm:$0xff]  }
 0x123   :  { %9737 = vmatpush3.bf16.msra.mxu1 %v10742_v59  ;;  %9716 = vmatprep.subr.bf16.mxu0 %v10743_v60  ;;  %v8605_v59 = vcombine.low %v87_v56, %v87_v56  ;;  %v8606_v60 = vcombine.high %v87_v56, %v87_v56  ;;  %v10836_v56 = vld [vmem:[#allocation6 + $0x9d0] sm:$0xff]  }
 0x124   :  { %9738 = vmatprep.subr.bf16.mxu1 %v10744_v61  ;;  %v10791_v61 = vld [vmem:[#allocation6 + $0x840] sm:$0xff]  }
 0x126   :  { %9717 = vmatpush3.bf16.msra.mxu0 %v10745_v62  ;;  %v10792_v62 = vld [vmem:[#allocation6 + $0x8c0] sm:$0xff]  }
 0x127   :  { %9739 = vmatpush3.bf16.msra.mxu1 %v10746_v63  ;;  %9718 = vmatprep.subr.bf16.mxu0 %v10747_v0  ;;  %v10793_v63 = vld [vmem:[#allocation6 + $0x800] sm:$0xff]  }
 0x128   :  { %9740 = vmatprep.subr.bf16.mxu1 %v10748_v1  ;;  %v10794_v0 = vld [vmem:[#allocation6 + $0x880] sm:$0xff]   ;;  %v10795_v1 = vld [vmem:[#allocation6 + $0x848] sm:$0xff]  }
 0x12a   :  { %9719 = vmatpush3.bf16.msra.mxu0 %v10749_v2  ;;  %v10796_v2 = vld [vmem:[#allocation6 + $0x8c8] sm:$0xff]  }
 0x12b   :  { %9741 = vmatpush3.bf16.msra.mxu1 %v10750_v3  ;;  %9748 = vmatprep.subr.bf16.mxu0 %v10755_v9  ;;  %v10797_v3 = vld [vmem:[#allocation6 + $0x808] sm:$0xff]   ;;  %v10803_v9 = vld [vmem:[#allocation6 + $0x858] sm:$0xff]  }
 0x12c   :  { %9770 = vmatprep.subr.bf16.mxu1 %v10756_v11  ;;  %v10805_v11 = vld [vmem:[#allocation6 + $0x818] sm:$0xff]  }
 0x12d   :  { %7120 = vmatmul.mubr.bf16.vlgmr.msra.gmra.mrb[24].mxu0 %v8599_v6  ;;  %v10800_v6 = vld [vmem:[#allocation6 + $0x8d0] sm:$0xff]  }
 0x12e   :  { %7160 = vmatmul.mubr.bf16.vlgmr.msra.gmra.mrb[24].mxu1 %v8601_v8  ;;  %9749 = vmatpush3.bf16.msra.mxu0 %v10757_v12  ;;  %v10802_v8 = vld [vmem:[#allocation6 + $0x890] sm:$0xff]   ;;  %v10806_v12 = vld [vmem:[#allocation6 + $0x898] sm:$0xff]  }
 0x12f   :  { %9771 = vmatpush3.bf16.msra.mxu1 %v10758_v13  ;;  %9750 = vmatprep.subr.bf16.mxu0 %v10759_v14  ;;  %v10807_v13 = vld [vmem:[#allocation6 + $0x860] sm:$0xff]  }
 0x130   :  { %9772 = vmatprep.subr.bf16.mxu1 %v10760_v15  ;;  %7199 = vmatprep.mubr.bf16.mxu0 %v8604_v58  ;;  %v10808_v14 = vld [vmem:[#allocation6 + $0x8e0] sm:$0xff]   ;;  %v10838_v58 = vld [vmem:[#allocation6 + $0x990] sm:$0xff]  }
 0x131   :  { %7239 = vmatprep.mubr.bf16.mxu1 %v8606_v60  ;;  %v10809_v15 = vld [vmem:[#allocation6 + $0x820] sm:$0xff]   ;;  %v10840_v60 = vld [vmem:[#allocation6 + $0x9d8] sm:$0xff]  }
 0x132   :  { %9751 = vmatpush3.bf16.msra.mxu0 %v10761_v16 }
 0x133   :  { %9773 = vmatpush3.bf16.msra.mxu1 %v10762_v17  ;;  %9752 = vmatprep.subr.bf16.mxu0 %v10763_v18  ;;  %v10810_v17 = vld [vmem:[#allocation6 + $0x8a0] sm:$0xff]  }
 0x134   :  { %9774 = vmatprep.subr.bf16.mxu1 %v10764_v19 }
 0x136   :  { %9753 = vmatpush3.bf16.msra.mxu0 %v10765_v20 }
 0x137   :  { %9775 = vmatpush3.bf16.msra.mxu1 %v10766_v21  ;;  %9754 = vmatprep.subr.bf16.mxu0 %v10767_v22 }
 0x138   :  { %9776 = vmatprep.subr.bf16.mxu1 %v10768_v23  ;;  %v10811_v23 = vld [vmem:[#allocation6 + $0x868] sm:$0xff]  }
 0x13a   :  { %9755 = vmatpush3.bf16.msra.mxu0 %v10769_v24 }
 0x13b   :  { %9777 = vmatpush3.bf16.msra.mxu1 %v10770_v25  ;;  %9756 = vmatprep.subr.bf16.mxu0 %v10771_v26  ;;  %v10812_v25 = vld [vmem:[#allocation6 + $0x8e8] sm:$0xff]  }
 0x13c   :  { %9778 = vmatprep.subr.bf16.mxu1 %v10772_v27 }
 0x13e   :  { %9757 = vmatpush3.bf16.msra.mxu0 %v10773_v28  ;;  %v10813_v28 = vld [vmem:[#allocation6 + $0x828] sm:$0xff]  }
 0x13f   :  { %9779 = vmatpush3.bf16.msra.mxu1 %v10774_v30  ;;  %9758 = vmatprep.subr.bf16.mxu0 %v10775_v37  ;;  %v10814_v30 = vld [vmem:[#allocation6 + $0x8a8] sm:$0xff]   ;;  %v10819_v37 = vld [vmem:[#allocation6 + $0x878] sm:$0xff]  }
 0x140   :  { %v9456_v29 = vpop.f32.mrb[0].mxu0  ;;  %9780 = vmatprep.subr.bf16.mxu1 %v10776_v39  ;;  %v10821_v39 = vld [vmem:[#allocation6 + $0x838] sm:$0xff]  }
 0x141   :  { %v9478_v31 = vpop.f32.mrb[0].mxu1  ;;  %v9457_v33 = vpop.f32.mrb[1].mxu0 }
 0x142   :  { %v9479_v34 = vpop.f32.mrb[1].mxu1  ;;  %v9458_v35 = vadd.f32 %v9457_v33, %v9456_v29  ;;  %v9459_v38 = vpop.f32.mrb[2].mxu0  ;;  %9759 = vmatpush3.bf16.msra.mxu0 %v10777_v42  ;;  %v10815_v33 = vld [vmem:[#allocation6 + $0x870] sm:$0xff]   ;;  %v89_v42 = vld [vmem:[#allocation3 + $0x88] sm:$0xff] }
 0x143   :  { %v9480_v36 = vadd.f32 %v9479_v34, %v9478_v31  ;;  %v9481_v40 = vpop.f32.mrb[2].mxu1  ;;  %v9460_v43 = vpop.f32.mrb[3].mxu0  ;;  %9781 = vmatpush3.bf16.msra.mxu1 %v10778_v44  ;;  %9760 = vmatprep.subr.bf16.mxu0 %v10779_v47  ;;  %v10816_v34 = vld [vmem:[#allocation6 + $0x8f0] sm:$0xff]   ;;  %v10820_v38 = vld [vmem:[#allocation6 + $0x8f8] sm:$0xff]   ;;  %v10827_v47 = vld [vmem:[#allocation6 + $0x940] sm:$0xff]  }
 0x144   :  { %v6642_v41 = vadd.f32 %v9458_v35, %v8574_v32  ;;  %v9482_v45 = vpop.f32.mrb[3].mxu1  ;;  %9782 = vmatprep.subr.bf16.mxu1 %v10780_v48  ;;  %v10817_v35 = vld [vmem:[#allocation6 + $0x830] sm:$0xff]   ;;  %v10822_v40 = vld [vmem:[#allocation6 + $0x8b8] sm:$0xff]   ;;  %v10828_v48 = vld [vmem:[#allocation6 + $0x9c0] sm:$0xff]  }
 0x145   :  { %v8609_v45 = vcombine.low %v89_v42, %v89_v42 }
 0x146   :  { %v11574_v46 = vadd.f32 %v9480_v36, %v6642_v41  ;;  %9761 = vmatpush3.bf16.msra.mxu0 %v10781_v49  ;;  %v10818_v36 = vld [vmem:[#allocation6 + $0x8b0] sm:$0xff]   ;;  %v88_v41 = vld [vmem:[#allocation3 + $0x80] sm:$0xff] }
 0x147   :  { %9783 = vmatpush3.bf16.msra.mxu1 %v10782_v50  ;;  %9762 = vmatprep.subr.bf16.mxu0 %v10783_v51  ;;  %v8607_v43 = vcombine.low %v88_v41, %v88_v41  ;;  %v8608_v44 = vcombine.high %v88_v41, %v88_v41  ;;  %v10829_v49 = vld [vmem:[#allocation6 + $0x900] sm:$0xff]   ;;  %v10831_v51 = vld [vmem:[#allocation6 + $0x948] sm:$0xff]   ;;  %v10871_v41 = vld [vmem:[#allocation6 + $0xa50] sm:$0xff]  }
 0x148   :  { %9784 = vmatprep.subr.bf16.mxu1 %v10784_v52  ;;  %v10830_v50 = vld [vmem:[#allocation6 + $0x980] sm:$0xff]   ;;  %v10832_v52 = vld [vmem:[#allocation6 + $0x9c8] sm:$0xff]  }
 0x14a   :  { %9763 = vmatpush3.bf16.msra.mxu0 %v10785_v53  ;;  %v10833_v53 = vld [vmem:[#allocation6 + $0x908] sm:$0xff]  }
 0x14b   :  { %9785 = vmatpush3.bf16.msra.mxu1 %v10786_v54  ;;  %9792 = vmatprep.subr.bf16.mxu0 %v10791_v61  ;;  %v10834_v54 = vld [vmem:[#allocation6 + $0x988] sm:$0xff]   ;;  %v10841_v61 = vld [vmem:[#allocation6 + $0x918] sm:$0xff]  }
 0x14c   :  { %9814 = vmatprep.subr.bf16.mxu1 %v10792_v62  ;;  %v10842_v62 = vld [vmem:[#allocation6 + $0x998] sm:$0xff]  }
 0x14d   :  { %7200 = vmatmul.mubr.bf16.vlgmr.msra.gmra.mrb[28].mxu0 %v8603_v57  ;;  %v10837_v57 = vld [vmem:[#allocation6 + $0x910] sm:$0xff]  }
 0x14e   :  { %7240 = vmatmul.mubr.bf16.vlgmr.msra.gmra.mrb[28].mxu1 %v8605_v59  ;;  %9793 = vmatpush3.bf16.msra.mxu0 %v10793_v63  ;;  %v10839_v59 = vld [vmem:[#allocation6 + $0x958] sm:$0xff]   ;;  %v10843_v63 = vld [vmem:[#allocation6 + $0x960] sm:$0xff]  }
 0x14f   :  { %9815 = vmatpush3.bf16.msra.mxu1 %v10794_v0  ;;  %9794 = vmatprep.subr.bf16.mxu0 %v10795_v1  ;;  %v10844_v0 = vld [vmem:[#allocation6 + $0x9e0] sm:$0xff]  }
 0x150   :  { %9816 = vmatprep.subr.bf16.mxu1 %v10796_v2  ;;  %7279 = vmatprep.mubr.bf16.mxu0 %v8608_v44  ;;  %v10845_v2 = vld [vmem:[#allocation6 + $0x920] sm:$0xff]   ;;  %v10874_v44 = vld [vmem:[#allocation6 + $0xa90] sm:$0xff]  }
 0x152   :  { %9795 = vmatpush3.bf16.msra.mxu0 %v10797_v3 }
 0x153   :  { %9817 = vmatpush3.bf16.msra.mxu1 %v10798_v4  ;;  %9796 = vmatprep.subr.bf16.mxu0 %v10799_v5  ;;  %v10846_v4 = vld [vmem:[#allocation6 + $0x9a0] sm:$0xff]  }
 0x154   :  { %9818 = vmatprep.subr.bf16.mxu1 %v10800_v6 }
 0x156   :  { %9797 = vmatpush3.bf16.msra.mxu0 %v10801_v7 }
 0x157   :  { %9819 = vmatpush3.bf16.msra.mxu1 %v10802_v8  ;;  %9798 = vmatprep.subr.bf16.mxu0 %v10803_v9  ;;  %v10847_v8 = vld [vmem:[#allocation6 + $0x968] sm:$0xff]  }
 0x158   :  { %9820 = vmatprep.subr.bf16.mxu1 %v10804_v10  ;;  %v10848_v10 = vld [vmem:[#allocation6 + $0x9e8] sm:$0xff]  }
 0x15a   :  { %9799 = vmatpush3.bf16.msra.mxu0 %v10805_v11 }
 0x15b   :  { %9821 = vmatpush3.bf16.msra.mxu1 %v10806_v12  ;;  %9800 = vmatprep.subr.bf16.mxu0 %v10807_v13 }
 0x15c   :  { %9822 = vmatprep.subr.bf16.mxu1 %v10808_v14  ;;  %v10849_v14 = vld [vmem:[#allocation6 + $0x928] sm:$0xff]  }
 0x15e   :  { %9801 = vmatpush3.bf16.msra.mxu0 %v10809_v15  ;;  %v10850_v15 = vld [vmem:[#allocation6 + $0x9a8] sm:$0xff]  }
 0x15f   :  { %9823 = vmatpush3.bf16.msra.mxu1 %v10810_v17  ;;  %9802 = vmatprep.subr.bf16.mxu0 %v10811_v23  ;;  %v10855_v23 = vld [vmem:[#allocation6 + $0x978] sm:$0xff]  }
 0x160   :  { %v9500_v16 = vpop.f32.mrb[4].mxu0  ;;  %9824 = vmatprep.subr.bf16.mxu1 %v10812_v25  ;;  %v10857_v25 = vld [vmem:[#allocation6 + $0x938] sm:$0xff]  }
 0x161   :  { %v9522_v18 = vpop.f32.mrb[4].mxu1  ;;  %v9501_v19 = vpop.f32.mrb[5].mxu0 }
 0x162   :  { %v9523_v20 = vpop.f32.mrb[5].mxu1  ;;  %v9502_v21 = vadd.f32 %v9501_v19, %v9500_v16  ;;  %v9503_v24 = vpop.f32.mrb[6].mxu0  ;;  %9803 = vmatpush3.bf16.msra.mxu0 %v10813_v28  ;;  %v10851_v19 = vld [vmem:[#allocation6 + $0x970] sm:$0xff]   ;;  %v91_v28 = vld [vmem:[#allocation3 + $0x98] sm:$0xff] }
 0x163   :  { %v9524_v22 = vadd.f32 %v9523_v20, %v9522_v18  ;;  %v9525_v26 = vpop.f32.mrb[6].mxu1  ;;  %v9504_v29 = vpop.f32.mrb[7].mxu0  ;;  %9825 = vmatpush3.bf16.msra.mxu1 %v10814_v30  ;;  %9804 = vmatprep.subr.bf16.mxu0 %v10815_v33  ;;  %v10852_v20 = vld [vmem:[#allocation6 + $0x9f0] sm:$0xff]   ;;  %v10856_v24 = vld [vmem:[#allocation6 + $0x9f8] sm:$0xff]   ;;  %v8614_v33 = vcombine.high %v91_v28, %v91_v28 }
 0x164   :  { %v6722_v27 = vadd.f32 %v9502_v21, %v11574_v46  ;;  %v9526_v31 = vpop.f32.mrb[7].mxu1  ;;  %9826 = vmatprep.subr.bf16.mxu1 %v10816_v34  ;;  %v8610_v46 = vcombine.high %v89_v42, %v89_v42  ;;  %v10853_v21 = vld [vmem:[#allocation6 + $0x930] sm:$0xff]   ;;  %v10858_v26 = vld [vmem:[#allocation6 + $0x9b8] sm:$0xff]   ;;  %v10864_v34 = vld [vmem:[#allocation6 + $0xac0] sm:$0xff]  }
 0x165   :  { %v8613_v31 = vcombine.low %v91_v28, %v91_v28  ;;  %v10872_v42 = vld [vmem:[#allocation6 + $0xad0] sm:$0xff]  }
 0x166   :  { %v11577_v32 = vadd.f32 %v9524_v22, %v6722_v27  ;;  %9805 = vmatpush3.bf16.msra.mxu0 %v10817_v35  ;;  %7319 = vmatprep.mubr.bf16.mxu1 %v8610_v46  ;;  %v10854_v22 = vld [vmem:[#allocation6 + $0x9b0] sm:$0xff]   ;;  %v10865_v35 = vld [vmem:[#allocation6 + $0xa00] sm:$0xff]   ;;  %v10876_v46 = vld [vmem:[#allocation6 + $0xad8] sm:$0xff]  }
 0x167   :  { %9827 = vmatpush3.bf16.msra.mxu1 %v10818_v36  ;;  %9806 = vmatprep.subr.bf16.mxu0 %v10819_v37  ;;  %v90_v27 = vld [vmem:[#allocation3 + $0x90] sm:$0xff]  ;;  %v10866_v36 = vld [vmem:[#allocation6 + $0xa80] sm:$0xff]   ;;  %v10867_v37 = vld [vmem:[#allocation6 + $0xa48] sm:$0xff]  }
 0x168   :  { %9828 = vmatprep.subr.bf16.mxu1 %v10820_v38  ;;  %v8611_v29 = vcombine.low %v90_v27, %v90_v27  ;;  %v8612_v30 = vcombine.high %v90_v27, %v90_v27  ;;  %v10868_v38 = vld [vmem:[#allocation6 + $0xac8] sm:$0xff]   ;;  %v10907_v27 = vld [vmem:[#allocation6 + $0xb50] sm:$0xff]  }
 0x169   :  { %v10908_v28 = vld [vmem:[#allocation6 + $0xbd0] sm:$0xff]  }
 0x16a   :  { %9807 = vmatpush3.bf16.msra.mxu0 %v10821_v39  ;;  %v10869_v39 = vld [vmem:[#allocation6 + $0xa08] sm:$0xff]  }
 0x16b   :  { %9829 = vmatpush3.bf16.msra.mxu1 %v10822_v40  ;;  %9836 = vmatprep.subr.bf16.mxu0 %v10827_v47  ;;  %v10870_v40 = vld [vmem:[#allocation6 + $0xa88] sm:$0xff]   ;;  %v10877_v47 = vld [vmem:[#allocation6 + $0xa18] sm:$0xff]  }
 0x16c   :  { %9858 = vmatprep.subr.bf16.mxu1 %v10828_v48  ;;  %v10878_v48 = vld [vmem:[#allocation6 + $0xa98] sm:$0xff]  }
 0x16d   :  { %7280 = vmatmul.mubr.bf16.vlgmr.msra.gmra.mrb[32].mxu0 %v8607_v43  ;;  %v10873_v43 = vld [vmem:[#allocation6 + $0xa10] sm:$0xff]  }
 0x16e   :  { %7320 = vmatmul.mubr.bf16.vlgmr.msra.gmra.mrb[32].mxu1 %v8609_v45  ;;  %9837 = vmatpush3.bf16.msra.mxu0 %v10829_v49  ;;  %v10875_v45 = vld [vmem:[#allocation6 + $0xa58] sm:$0xff]   ;;  %v10879_v49 = vld [vmem:[#allocation6 + $0xa60] sm:$0xff]  }
 0x16f   :  { %9859 = vmatpush3.bf16.msra.mxu1 %v10830_v50  ;;  %9838 = vmatprep.subr.bf16.mxu0 %v10831_v51  ;;  %v10880_v50 = vld [vmem:[#allocation6 + $0xae0] sm:$0xff]  }
 0x170   :  { %9860 = vmatprep.subr.bf16.mxu1 %v10832_v52  ;;  %7359 = vmatprep.mubr.bf16.mxu0 %v8612_v30  ;;  %v10881_v52 = vld [vmem:[#allocation6 + $0xa20] sm:$0xff]   ;;  %v10910_v30 = vld [vmem:[#allocation6 + $0xb90] sm:$0xff]  }
 0x171   :  { %7399 = vmatprep.mubr.bf16.mxu1 %v8614_v33  ;;  %v10913_v33 = vld [vmem:[#allocation6 + $0xb18] sm:$0xff]  }
 0x172   :  { %9839 = vmatpush3.bf16.msra.mxu0 %v10833_v53 }
 0x173   :  { %9861 = vmatpush3.bf16.msra.mxu1 %v10834_v54  ;;  %9840 = vmatprep.subr.bf16.mxu0 %v10835_v55  ;;  %v10882_v54 = vld [vmem:[#allocation6 + $0xaa0] sm:$0xff]  }
 0x174   :  { %9862 = vmatprep.subr.bf16.mxu1 %v10836_v56 }
 0x176   :  { %9841 = vmatpush3.bf16.msra.mxu0 %v10837_v57  ;;  %v10883_v57 = vld [vmem:[#allocation6 + $0xa68] sm:$0xff]  }
 0x177   :  { %9863 = vmatpush3.bf16.msra.mxu1 %v10838_v58  ;;  %9842 = vmatprep.subr.bf16.mxu0 %v10839_v59 }
 0x178   :  { %9864 = vmatprep.subr.bf16.mxu1 %v10840_v60  ;;  %v10884_v60 = vld [vmem:[#allocation6 + $0xae8] sm:$0xff]  }
 0x17a   :  { %9843 = vmatpush3.bf16.msra.mxu0 %v10841_v61 }
 0x17b   :  { %9865 = vmatpush3.bf16.msra.mxu1 %v10842_v62  ;;  %9844 = vmatprep.subr.bf16.mxu0 %v10843_v63  ;;  %v10885_v63 = vld [vmem:[#allocation6 + $0xa28] sm:$0xff]  }
 0x17c   :  { %9866 = vmatprep.subr.bf16.mxu1 %v10844_v0 }
 0x17e   :  { %9845 = vmatpush3.bf16.msra.mxu0 %v10845_v2 }
 0x17f   :  { %9867 = vmatpush3.bf16.msra.mxu1 %v10846_v4  ;;  %9846 = vmatprep.subr.bf16.mxu0 %v10847_v8  ;;  %v10887_v4 = vld [vmem:[#allocation6 + $0xa70] sm:$0xff]  }
 0x180   :  { %v9544_v1 = vpop.f32.mrb[8].mxu0  ;;  %9868 = vmatprep.subr.bf16.mxu1 %v10848_v10  ;;  %v10890_v8 = vld [vmem:[#allocation6 + $0xab0] sm:$0xff]   ;;  %v10892_v10 = vld [vmem:[#allocation6 + $0xaf8] sm:$0xff]  }
 0x181   :  { %v9566_v3 = vpop.f32.mrb[8].mxu1  ;;  %v9545_v5 = vpop.f32.mrb[9].mxu0 }
 0x182   :  { %v9546_v6 = vadd.f32 %v9545_v5, %v9544_v1  ;;  %v9567_v7 = vpop.f32.mrb[9].mxu1  ;;  %v9547_v11 = vpop.f32.mrb[10].mxu0  ;;  %9847 = vmatpush3.bf16.msra.mxu0 %v10849_v14  ;;  %v10886_v1 = vld [vmem:[#allocation6 + $0xaa8] sm:$0xff]  }
 0x183   :  { %v9568_v9 = vadd.f32 %v9567_v7, %v9566_v3  ;;  %v9569_v13 = vpop.f32.mrb[10].mxu1  ;;  %v9548_v16 = vpop.f32.mrb[11].mxu0  ;;  %9869 = vmatpush3.bf16.msra.mxu1 %v10850_v15  ;;  %9848 = vmatprep.subr.bf16.mxu0 %v10851_v19  ;;  %v10889_v7 = vld [vmem:[#allocation6 + $0xa30] sm:$0xff]   ;;  %v10893_v11 = vld [vmem:[#allocation6 + $0xa38] sm:$0xff]   ;;  %v10899_v19 = vld [vmem:[#allocation6 + $0xb40] sm:$0xff]  }
 0x184   :  { %v6802_v12 = vadd.f32 %v9546_v6, %v11577_v32  ;;  %v9570_v18 = vpop.f32.mrb[11].mxu1  ;;  %9870 = vmatprep.subr.bf16.mxu1 %v10852_v20  ;;  %v10863_v32 = vld [vmem:[#allocation6 + $0xa40] sm:$0xff]   ;;  %v10888_v6 = vld [vmem:[#allocation6 + $0xaf0] sm:$0xff]   ;;  %v93_v16 = vld [vmem:[#allocation3 + $0xa8] sm:$0xff] }
 0x185   :  { %v92_v13 = vld [vmem:[#allocation3 + $0xa0] sm:$0xff]  ;;  %v8618_v18 = vcombine.high %v93_v16, %v93_v16 }
 0x186   :  { %v11580_v17 = vadd.f32 %v9568_v9, %v6802_v12  ;;  %9849 = vmatpush3.bf16.msra.mxu0 %v10853_v21  ;;  %v10891_v9 = vld [vmem:[#allocation6 + $0xa78] sm:$0xff]   ;;  %v8615_v14 = vcombine.low %v92_v13, %v92_v13  ;;  %v8616_v15 = vcombine.high %v92_v13, %v92_v13  ;;  %v10900_v20 = vld [vmem:[#allocation6 + $0xbc0] sm:$0xff]   ;;  %v10943_v13 = vld [vmem:[#allocation6 + $0xc50] sm:$0xff]  }
 0x187   :  { %9871 = vmatpush3.bf16.msra.mxu1 %v10854_v22  ;;  %9850 = vmatprep.subr.bf16.mxu0 %v10855_v23  ;;  %v10894_v12 = vld [vmem:[#allocation6 + $0xab8] sm:$0xff]   ;;  %v10901_v21 = vld [vmem:[#allocation6 + $0xb00] sm:$0xff]   ;;  %v10903_v23 = vld [vmem:[#allocation6 + $0xb48] sm:$0xff]  }
 0x188   :  { %9872 = vmatprep.subr.bf16.mxu1 %v10856_v24  ;;  %v10902_v22 = vld [vmem:[#allocation6 + $0xb80] sm:$0xff]   ;;  %v10904_v24 = vld [vmem:[#allocation6 + $0xbc8] sm:$0xff]  }
 0x18a   :  { %9851 = vmatpush3.bf16.msra.mxu0 %v10857_v25  ;;  %v10905_v25 = vld [vmem:[#allocation6 + $0xb08] sm:$0xff]  }
 0x18b   :  { %9873 = vmatpush3.bf16.msra.mxu1 %v10858_v26  ;;  %9880 = vmatprep.subr.bf16.mxu0 %v10863_v32  ;;  %v10906_v26 = vld [vmem:[#allocation6 + $0xb88] sm:$0xff]   ;;  %v10912_v32 = vld [vmem:[#allocation6 + $0xbd8] sm:$0xff]  }
 0x18c   :  { %9902 = vmatprep.subr.bf16.mxu1 %v10864_v34  ;;  %v10914_v34 = vld [vmem:[#allocation6 + $0xb98] sm:$0xff]  }
 0x18d   :  { %7360 = vmatmul.mubr.bf16.vlgmr.msra.gmra.mrb[36].mxu0 %v8611_v29  ;;  %v10909_v29 = vld [vmem:[#allocation6 + $0xb10] sm:$0xff]  }
 0x18e   :  { %7400 = vmatmul.mubr.bf16.vlgmr.msra.gmra.mrb[36].mxu1 %v8613_v31  ;;  %9881 = vmatpush3.bf16.msra.mxu0 %v10865_v35  ;;  %v10911_v31 = vld [vmem:[#allocation6 + $0xb58] sm:$0xff]   ;;  %v10915_v35 = vld [vmem:[#allocation6 + $0xb60] sm:$0xff]  }
 0x18f   :  { %9903 = vmatpush3.bf16.msra.mxu1 %v10866_v36  ;;  %9882 = vmatprep.subr.bf16.mxu0 %v10867_v37  ;;  %v10916_v36 = vld [vmem:[#allocation6 + $0xbe0] sm:$0xff]  }
 0x190   :  { %9904 = vmatprep.subr.bf16.mxu1 %v10868_v38  ;;  %7439 = vmatprep.mubr.bf16.mxu0 %v8616_v15  ;;  %v10917_v38 = vld [vmem:[#allocation6 + $0xb20] sm:$0xff]   ;;  %v10945_v15 = vld [vmem:[#allocation6 + $0xc10] sm:$0xff]  }
 0x191   :  { %7479 = vmatprep.mubr.bf16.mxu1 %v8618_v18  ;;  %v10948_v18 = vld [vmem:[#allocation6 + $0xcd8] sm:$0xff]  }
 0x192   :  { %9883 = vmatpush3.bf16.msra.mxu0 %v10869_v39 }
 0x193   :  { %9905 = vmatpush3.bf16.msra.mxu1 %v10870_v40  ;;  %9884 = vmatprep.subr.bf16.mxu0 %v10871_v41  ;;  %v10918_v40 = vld [vmem:[#allocation6 + $0xba0] sm:$0xff]  }
 0x194   :  { %9906 = vmatprep.subr.bf16.mxu1 %v10872_v42 }
 0x196   :  { %9885 = vmatpush3.bf16.msra.mxu0 %v10873_v43  ;;  %v10919_v43 = vld [vmem:[#allocation6 + $0xb68] sm:$0xff]  }
 0x197   :  { %9907 = vmatpush3.bf16.msra.mxu1 %v10874_v44  ;;  %9886 = vmatprep.subr.bf16.mxu0 %v10875_v45 }
 0x198   :  { %9908 = vmatprep.subr.bf16.mxu1 %v10876_v46  ;;  %v10920_v46 = vld [vmem:[#allocation6 + $0xbe8] sm:$0xff]  }
 0x19a   :  { %9887 = vmatpush3.bf16.msra.mxu0 %v10877_v47 }
 0x19b   :  { %9909 = vmatpush3.bf16.msra.mxu1 %v10878_v48  ;;  %9888 = vmatprep.subr.bf16.mxu0 %v10879_v49  ;;  %v10921_v49 = vld [vmem:[#allocation6 + $0xb28] sm:$0xff]  }
 0x19c   :  { %9910 = vmatprep.subr.bf16.mxu1 %v10880_v50 }
 0x19e   :  { %9889 = vmatpush3.bf16.msra.mxu0 %v10881_v52 }
 0x19f   :  { %9911 = vmatpush3.bf16.msra.mxu1 %v10882_v54  ;;  %9890 = vmatprep.subr.bf16.mxu0 %v10883_v57  ;;  %v10923_v54 = vld [vmem:[#allocation6 + $0xb70] sm:$0xff]  }
 0x1a0   :  { %v9588_v51 = vpop.f32.mrb[12].mxu0  ;;  %9912 = vmatprep.subr.bf16.mxu1 %v10884_v60  ;;  %v10925_v57 = vld [vmem:[#allocation6 + $0xb30] sm:$0xff]   ;;  %v10928_v60 = vld [vmem:[#allocation6 + $0xbf8] sm:$0xff]  }
 0x1a1   :  { %v9610_v53 = vpop.f32.mrb[12].mxu1  ;;  %v9589_v55 = vpop.f32.mrb[13].mxu0 }
 0x1a2   :  { %v9611_v56 = vpop.f32.mrb[13].mxu1  ;;  %v9590_v58 = vadd.f32 %v9589_v55, %v9588_v51  ;;  %v9591_v61 = vpop.f32.mrb[14].mxu0  ;;  %9891 = vmatpush3.bf16.msra.mxu0 %v10885_v63  ;;  %v10922_v51 = vld [vmem:[#allocation6 + $0xba8] sm:$0xff]   ;;  %v94_v63 = vld [vmem:[#allocation3 + $0xb0] sm:$0xff] }
 0x1a3   :  { %v9612_v59 = vadd.f32 %v9611_v56, %v9610_v53  ;;  %v9613_v62 = vpop.f32.mrb[14].mxu1  ;;  %v9592_v2 = vpop.f32.mrb[15].mxu0  ;;  %9913 = vmatpush3.bf16.msra.mxu1 %v10886_v1  ;;  %9892 = vmatprep.subr.bf16.mxu0 %v10887_v4  ;;  %v10924_v56 = vld [vmem:[#allocation6 + $0xbf0] sm:$0xff]   ;;  %v10929_v61 = vld [vmem:[#allocation6 + $0xb38] sm:$0xff]   ;;  %v8619_v1 = vcombine.low %v94_v63, %v94_v63 }
 0x1a4   :  { %v6882_v0 = vadd.f32 %v9590_v58, %v11580_v17  ;;  %v9614_v3 = vpop.f32.mrb[15].mxu1  ;;  %9914 = vmatprep.subr.bf16.mxu1 %v10888_v6  ;;  %v8617_v17 = vcombine.low %v93_v16, %v93_v16  ;;  %v10926_v58 = vld [vmem:[#allocation6 + $0xbb0] sm:$0xff]   ;;  %v10930_v62 = vld [vmem:[#allocation6 + $0xbb8] sm:$0xff]   ;;  %v8620_v2 = vcombine.high %v94_v63, %v94_v63  ;;  %v10936_v6 = vld [vmem:[#allocation6 + $0xcc0] sm:$0xff]  }
 0x1a5   :  { %v10946_v16 = vld [vmem:[#allocation6 + $0xc90] sm:$0xff]  }
 0x1a6   :  { %v11583_v5 = vadd.f32 %v9612_v59, %v6882_v0  ;;  %9893 = vmatpush3.bf16.msra.mxu0 %v10889_v7  ;;  %v10927_v59 = vld [vmem:[#allocation6 + $0xb78] sm:$0xff]   ;;  %v10937_v7 = vld [vmem:[#allocation6 + $0xc00] sm:$0xff]   ;;  %v10979_v63 = vld [vmem:[#allocation6 + $0xd50] sm:$0xff]  }
 0x1a7   :  { %9915 = vmatpush3.bf16.msra.mxu1 %v10890_v8  ;;  %9894 = vmatprep.subr.bf16.mxu0 %v10891_v9  ;;  %v95_v0 = vld [vmem:[#allocation3 + $0xb8] sm:$0xff]  ;;  %v10938_v8 = vld [vmem:[#allocation6 + $0xc80] sm:$0xff]   ;;  %v10939_v9 = vld [vmem:[#allocation6 + $0xc48] sm:$0xff]  }
 0x1a8   :  { %9916 = vmatprep.subr.bf16.mxu1 %v10892_v10  ;;  %v8621_v3 = vcombine.low %v95_v0, %v95_v0  ;;  %v8622_v4 = vcombine.high %v95_v0, %v95_v0  ;;  %v10940_v10 = vld [vmem:[#allocation6 + $0xcc8] sm:$0xff]   ;;  %v10980_v0 = vld [vmem:[#allocation6 + $0xdd0] sm:$0xff]  }
 0x1aa   :  { %9895 = vmatpush3.bf16.msra.mxu0 %v10893_v11  ;;  %v10941_v11 = vld [vmem:[#allocation6 + $0xc08] sm:$0xff]  }
 0x1ab   :  { %9917 = vmatpush3.bf16.msra.mxu1 %v10894_v12  ;;  %9924 = vmatprep.subr.bf16.mxu0 %v10899_v19  ;;  %v10942_v12 = vld [vmem:[#allocation6 + $0xc88] sm:$0xff]   ;;  %v10949_v19 = vld [vmem:[#allocation6 + $0xc18] sm:$0xff]  }
 0x1ac   :  { %9946 = vmatprep.subr.bf16.mxu1 %v10900_v20  ;;  %v10950_v20 = vld [vmem:[#allocation6 + $0xc98] sm:$0xff]  }
 0x1ad   :  { %7440 = vmatmul.mubr.bf16.vlgmr.msra.gmra.mrb[40].mxu0 %v8615_v14  ;;  %v10944_v14 = vld [vmem:[#allocation6 + $0xcd0] sm:$0xff]  }
 0x1ae   :  { %7480 = vmatmul.mubr.bf16.vlgmr.msra.gmra.mrb[40].mxu1 %v8617_v17  ;;  %9925 = vmatpush3.bf16.msra.mxu0 %v10901_v21  ;;  %v10947_v17 = vld [vmem:[#allocation6 + $0xc58] sm:$0xff]   ;;  %v10951_v21 = vld [vmem:[#allocation6 + $0xc60] sm:$0xff]  }
 0x1af   :  { %9947 = vmatpush3.bf16.msra.mxu1 %v10902_v22  ;;  %9926 = vmatprep.subr.bf16.mxu0 %v10903_v23  ;;  %v10952_v22 = vld [vmem:[#allocation6 + $0xce0] sm:$0xff]  }
 0x1b0   :  { %9948 = vmatprep.subr.bf16.mxu1 %v10904_v24  ;;  %7519 = vmatprep.mubr.bf16.mxu0 %v8620_v2  ;;  %v10953_v24 = vld [vmem:[#allocation6 + $0xc20] sm:$0xff]   ;;  %v10982_v2 = vld [vmem:[#allocation6 + $0xd90] sm:$0xff]  }
 0x1b1   :  { %7559 = vmatprep.mubr.bf16.mxu1 %v8622_v4  ;;  %v10984_v4 = vld [vmem:[#allocation6 + $0xdd8] sm:$0xff]  }
 0x1b2   :  { %9927 = vmatpush3.bf16.msra.mxu0 %v10905_v25 }
 0x1b3   :  { %9949 = vmatpush3.bf16.msra.mxu1 %v10906_v26  ;;  %9928 = vmatprep.subr.bf16.mxu0 %v10907_v27  ;;  %v10954_v26 = vld [vmem:[#allocation6 + $0xca0] sm:$0xff]  }
 0x1b4   :  { %9950 = vmatprep.subr.bf16.mxu1 %v10908_v28 }
 0x1b6   :  { %9929 = vmatpush3.bf16.msra.mxu0 %v10909_v29 }
 0x1b7   :  { %9951 = vmatpush3.bf16.msra.mxu1 %v10910_v30  ;;  %9930 = vmatprep.subr.bf16.mxu0 %v10911_v31  ;;  %v10955_v30 = vld [vmem:[#allocation6 + $0xc68] sm:$0xff]  }
 0x1b8   :  { %9952 = vmatprep.subr.bf16.mxu1 %v10912_v32  ;;  %v10956_v32 = vld [vmem:[#allocation6 + $0xce8] sm:$0xff]  }
 0x1ba   :  { %9931 = vmatpush3.bf16.msra.mxu0 %v10913_v33 }
 0x1bb   :  { %9953 = vmatpush3.bf16.msra.mxu1 %v10914_v34  ;;  %9932 = vmatprep.subr.bf16.mxu0 %v10915_v35 }
 0x1bc   :  { %9954 = vmatprep.subr.bf16.mxu1 %v10916_v36  ;;  %v10957_v36 = vld [vmem:[#allocation6 + $0xc28] sm:$0xff]  }
 0x1be   :  { %9933 = vmatpush3.bf16.msra.mxu0 %v10917_v38 }
 0x1bf   :  { %9955 = vmatpush3.bf16.msra.mxu1 %v10918_v40  ;;  %9934 = vmatprep.subr.bf16.mxu0 %v10919_v43  ;;  %v10961_v43 = vld [vmem:[#allocation6 + $0xc30] sm:$0xff]  }
 0x1c0   :  { %v9632_v37 = vpop.f32.mrb[16].mxu0  ;;  %9956 = vmatprep.subr.bf16.mxu1 %v10920_v46  ;;  %v10964_v46 = vld [vmem:[#allocation6 + $0xcf8] sm:$0xff]  }
 0x1c1   :  { %v9654_v39 = vpop.f32.mrb[16].mxu1  ;;  %v9633_v41 = vpop.f32.mrb[17].mxu0 }
 0x1c2   :  { %v9655_v42 = vpop.f32.mrb[17].mxu1  ;;  %v9634_v44 = vadd.f32 %v9633_v41, %v9632_v37  ;;  %v9635_v47 = vpop.f32.mrb[18].mxu0  ;;  %9935 = vmatpush3.bf16.msra.mxu0 %v10921_v49  ;;  %v10958_v37 = vld [vmem:[#allocation6 + $0xca8] sm:$0xff]   ;;  %v10959_v41 = vld [vmem:[#allocation6 + $0xc70] sm:$0xff]   ;;  %v96_v49 = vld [vmem:[#allocation3 + $0xc0] sm:$0xff] }
 0x1c3   :  { %v9656_v45 = vadd.f32 %v9655_v42, %v9654_v39  ;;  %v9657_v48 = vpop.f32.mrb[18].mxu1  ;;  %v9636_v52 = vpop.f32.mrb[19].mxu0  ;;  %9957 = vmatpush3.bf16.msra.mxu1 %v10922_v51  ;;  %9936 = vmatprep.subr.bf16.mxu0 %v10923_v54  ;;  %v10960_v42 = vld [vmem:[#allocation6 + $0xcf0] sm:$0xff]   ;;  %v10965_v47 = vld [vmem:[#allocation6 + $0xc38] sm:$0xff]   ;;  %v8623_v51 = vcombine.low %v96_v49, %v96_v49  ;;  %v10971_v54 = vld [vmem:[#allocation6 + $0xd40] sm:$0xff]  }
 0x1c4   :  { %v6962_v50 = vadd.f32 %v9634_v44, %v11583_v5  ;;  %v9658_v53 = vpop.f32.mrb[19].mxu1  ;;  %9958 = vmatprep.subr.bf16.mxu1 %v10924_v56  ;;  %v10935_v5 = vld [vmem:[#allocation6 + $0xc40] sm:$0xff]   ;;  %v10962_v44 = vld [vmem:[#allocation6 + $0xcb0] sm:$0xff]   ;;  %v10966_v48 = vld [vmem:[#allocation6 + $0xcb8] sm:$0xff]   ;;  %v8624_v52 = vcombine.high %v96_v49, %v96_v49 }
 0x1c5   :  { %v10972_v56 = vld [vmem:[#allocation6 + $0xdc0] sm:$0xff]   ;;  %v11015_v49 = vld [vmem:[#allocation6 + $0xe50] sm:$0xff]  }
 0x1c6   :  { %v11586_v55 = vadd.f32 %v9656_v45, %v6962_v50  ;;  %9937 = vmatpush3.bf16.msra.mxu0 %v10925_v57  ;;  %v10963_v45 = vld [vmem:[#allocation6 + $0xc78] sm:$0xff]   ;;  %v97_v50 = vld [vmem:[#allocation3 + $0xc8] sm:$0xff]  ;;  %v10973_v57 = vld [vmem:[#allocation6 + $0xd00] sm:$0xff]  }
 0x1c7   :  { %9959 = vmatpush3.bf16.msra.mxu1 %v10926_v58  ;;  %9938 = vmatprep.subr.bf16.mxu0 %v10927_v59  ;;  %v8625_v53 = vcombine.low %v97_v50, %v97_v50  ;;  %v10974_v58 = vld [vmem:[#allocation6 + $0xd80] sm:$0xff]   ;;  %v10975_v59 = vld [vmem:[#allocation6 + $0xd48] sm:$0xff]  }
 0x1c8   :  { %9960 = vmatprep.subr.bf16.mxu1 %v10928_v60  ;;  %v10976_v60 = vld [vmem:[#allocation6 + $0xdc8] sm:$0xff]  }
 0x1ca   :  { %9939 = vmatpush3.bf16.msra.mxu0 %v10929_v61  ;;  %v10977_v61 = vld [vmem:[#allocation6 + $0xd08] sm:$0xff]  }
 0x1cb   :  { %9961 = vmatpush3.bf16.msra.mxu1 %v10930_v62  ;;  %9968 = vmatprep.subr.bf16.mxu0 %v10935_v5  ;;  %v10978_v62 = vld [vmem:[#allocation6 + $0xd88] sm:$0xff]   ;;  %v10985_v5 = vld [vmem:[#allocation6 + $0xd18] sm:$0xff]  }
 0x1cc   :  { %9990 = vmatprep.subr.bf16.mxu1 %v10936_v6  ;;  %v10986_v6 = vld [vmem:[#allocation6 + $0xd98] sm:$0xff]  }
 0x1cd   :  { %7520 = vmatmul.mubr.bf16.vlgmr.msra.gmra.mrb[44].mxu0 %v8619_v1  ;;  %v10981_v1 = vld [vmem:[#allocation6 + $0xd10] sm:$0xff]  }
 0x1ce   :  { %7560 = vmatmul.mubr.bf16.vlgmr.msra.gmra.mrb[44].mxu1 %v8621_v3  ;;  %9969 = vmatpush3.bf16.msra.mxu0 %v10937_v7  ;;  %v10983_v3 = vld [vmem:[#allocation6 + $0xd58] sm:$0xff]   ;;  %v10987_v7 = vld [vmem:[#allocation6 + $0xd60] sm:$0xff]  }
 0x1cf   :  { %9991 = vmatpush3.bf16.msra.mxu1 %v10938_v8  ;;  %9970 = vmatprep.subr.bf16.mxu0 %v10939_v9  ;;  %v10988_v8 = vld [vmem:[#allocation6 + $0xde0] sm:$0xff]  }
 0x1d0   :  { %9992 = vmatprep.subr.bf16.mxu1 %v10940_v10  ;;  %7599 = vmatprep.mubr.bf16.mxu0 %v8624_v52  ;;  %v10989_v10 = vld [vmem:[#allocation6 + $0xd20] sm:$0xff]   ;;  %v11018_v52 = vld [vmem:[#allocation6 + $0xe90] sm:$0xff]  }
 0x1d2   :  { %9971 = vmatpush3.bf16.msra.mxu0 %v10941_v11 }
 0x1d3   :  { %9993 = vmatpush3.bf16.msra.mxu1 %v10942_v12  ;;  %9972 = vmatprep.subr.bf16.mxu0 %v10943_v13  ;;  %v10990_v12 = vld [vmem:[#allocation6 + $0xda0] sm:$0xff]  }
 0x1d4   :  { %9994 = vmatprep.subr.bf16.mxu1 %v10944_v14 }
 0x1d6   :  { %9973 = vmatpush3.bf16.msra.mxu0 %v10945_v15  ;;  %v10991_v15 = vld [vmem:[#allocation6 + $0xd68] sm:$0xff]  }
 0x1d7   :  { %9995 = vmatpush3.bf16.msra.mxu1 %v10946_v16  ;;  %9974 = vmatprep.subr.bf16.mxu0 %v10947_v17 }
 0x1d8   :  { %9996 = vmatprep.subr.bf16.mxu1 %v10948_v18  ;;  %v10992_v18 = vld [vmem:[#allocation6 + $0xde8] sm:$0xff]  }
 0x1da   :  { %9975 = vmatpush3.bf16.msra.mxu0 %v10949_v19 }
 0x1db   :  { %9997 = vmatpush3.bf16.msra.mxu1 %v10950_v20  ;;  %9976 = vmatprep.subr.bf16.mxu0 %v10951_v21  ;;  %v10993_v21 = vld [vmem:[#allocation6 + $0xd28] sm:$0xff]  }
 0x1dc   :  { %9998 = vmatprep.subr.bf16.mxu1 %v10952_v22 }
 0x1de   :  { %9977 = vmatpush3.bf16.msra.mxu0 %v10953_v24 }
 0x1df   :  { %9999 = vmatpush3.bf16.msra.mxu1 %v10954_v26  ;;  %9978 = vmatprep.subr.bf16.mxu0 %v10955_v30  ;;  %v10995_v26 = vld [vmem:[#allocation6 + $0xd70] sm:$0xff]  }
 0x1e0   :  { %v9676_v23 = vpop.f32.mrb[20].mxu0  ;;  %10000 = vmatprep.subr.bf16.mxu1 %v10956_v32  ;;  %v10998_v30 = vld [vmem:[#allocation6 + $0xdb0] sm:$0xff]   ;;  %v11000_v32 = vld [vmem:[#allocation6 + $0xdf8] sm:$0xff]  }
 0x1e1   :  { %v9698_v25 = vpop.f32.mrb[20].mxu1  ;;  %v9677_v27 = vpop.f32.mrb[21].mxu0 }
 0x1e2   :  { %v9678_v28 = vadd.f32 %v9677_v27, %v9676_v23  ;;  %v9699_v29 = vpop.f32.mrb[21].mxu1  ;;  %v9679_v33 = vpop.f32.mrb[22].mxu0  ;;  %9979 = vmatpush3.bf16.msra.mxu0 %v10957_v36  ;;  %v10994_v23 = vld [vmem:[#allocation6 + $0xda8] sm:$0xff]  }
 0x1e3   :  { %v9700_v31 = vadd.f32 %v9699_v29, %v9698_v25  ;;  %v9701_v35 = vpop.f32.mrb[22].mxu1  ;;  %v9680_v38 = vpop.f32.mrb[23].mxu0  ;;  %10001 = vmatpush3.bf16.msra.mxu1 %v10958_v37  ;;  %9980 = vmatprep.subr.bf16.mxu0 %v10959_v41  ;;  %v10997_v29 = vld [vmem:[#allocation6 + $0xd30] sm:$0xff]   ;;  %v11001_v33 = vld [vmem:[#allocation6 + $0xd38] sm:$0xff]   ;;  %v11007_v41 = vld [vmem:[#allocation6 + $0xe40] sm:$0xff]  }
 0x1e4   :  { %v7042_v34 = vadd.f32 %v9678_v28, %v11586_v55  ;;  %v9702_v40 = vpop.f32.mrb[23].mxu1  ;;  %10002 = vmatprep.subr.bf16.mxu1 %v10960_v42  ;;  %v8626_v55 = vcombine.high %v97_v50, %v97_v50  ;;  %v10996_v28 = vld [vmem:[#allocation6 + $0xdf0] sm:$0xff]   ;;  %v99_v38 = vld [vmem:[#allocation3 + $0xd8] sm:$0xff]  ;;  %v11008_v42 = vld [vmem:[#allocation6 + $0xec0] sm:$0xff]  }
 0x1e5   :  { %v98_v35 = vld [vmem:[#allocation3 + $0xd0] sm:$0xff]  ;;  %v8630_v40 = vcombine.high %v99_v38, %v99_v38 }
 0x1e6   :  { %v11589_v39 = vadd.f32 %v9700_v31, %v7042_v34  ;;  %9981 = vmatpush3.bf16.msra.mxu0 %v10961_v43  ;;  %7639 = vmatprep.mubr.bf16.mxu1 %v8626_v55  ;;  %v10999_v31 = vld [vmem:[#allocation6 + $0xd78] sm:$0xff]   ;;  %v8627_v36 = vcombine.low %v98_v35, %v98_v35  ;;  %v8628_v37 = vcombine.high %v98_v35, %v98_v35  ;;  %v11009_v43 = vld [vmem:[#allocation6 + $0xe00] sm:$0xff]   ;;  %v11016_v50 = vld [vmem:[#allocation6 + $0xed0] sm:$0xff]  }
 0x1e7   :  { %10003 = vmatpush3.bf16.msra.mxu1 %v10962_v44  ;;  %9982 = vmatprep.subr.bf16.mxu0 %v10963_v45  ;;  %v11002_v34 = vld [vmem:[#allocation6 + $0xdb8] sm:$0xff]   ;;  %v11010_v44 = vld [vmem:[#allocation6 + $0xe80] sm:$0xff]   ;;  %v11011_v45 = vld [vmem:[#allocation6 + $0xe48] sm:$0xff]  }
 0x1e8   :  { %10004 = vmatprep.subr.bf16.mxu1 %v10964_v46  ;;  %v11012_v46 = vld [vmem:[#allocation6 + $0xec8] sm:$0xff]   ;;  %v11021_v55 = vld [vmem:[#allocation6 + $0xe18] sm:$0xff]   ;;  %v11051_v35 = vld [vmem:[#allocation6 + $0xf50] sm:$0xff]  }
 0x1ea   :  { %9983 = vmatpush3.bf16.msra.mxu0 %v10965_v47  ;;  %v11013_v47 = vld [vmem:[#allocation6 + $0xe08] sm:$0xff]  }
 0x1eb   :  { %10005 = vmatpush3.bf16.msra.mxu1 %v10966_v48  ;;  %10012 = vmatprep.subr.bf16.mxu0 %v10971_v54  ;;  %v11014_v48 = vld [vmem:[#allocation6 + $0xe88] sm:$0xff]   ;;  %v11020_v54 = vld [vmem:[#allocation6 + $0xed8] sm:$0xff]  }
 0x1ec   :  { %10034 = vmatprep.subr.bf16.mxu1 %v10972_v56  ;;  %v11022_v56 = vld [vmem:[#allocation6 + $0xe98] sm:$0xff]  }
 0x1ed   :  { %7600 = vmatmul.mubr.bf16.vlgmr.msra.gmra.mrb[48].mxu0 %v8623_v51  ;;  %v11017_v51 = vld [vmem:[#allocation6 + $0xe10] sm:$0xff]  }
 0x1ee   :  { %7640 = vmatmul.mubr.bf16.vlgmr.msra.gmra.mrb[48].mxu1 %v8625_v53  ;;  %10013 = vmatpush3.bf16.msra.mxu0 %v10973_v57  ;;  %v11019_v53 = vld [vmem:[#allocation6 + $0xe58] sm:$0xff]   ;;  %v11023_v57 = vld [vmem:[#allocation6 + $0xe60] sm:$0xff]  }
 0x1ef   :  { %10035 = vmatpush3.bf16.msra.mxu1 %v10974_v58  ;;  %10014 = vmatprep.subr.bf16.mxu0 %v10975_v59  ;;  %v11024_v58 = vld [vmem:[#allocation6 + $0xee0] sm:$0xff]  }
 0x1f0   :  { %10036 = vmatprep.subr.bf16.mxu1 %v10976_v60  ;;  %7679 = vmatprep.mubr.bf16.mxu0 %v8628_v37  ;;  %v11025_v60 = vld [vmem:[#allocation6 + $0xe20] sm:$0xff]   ;;  %v11053_v37 = vld [vmem:[#allocation6 + $0xf10] sm:$0xff]  }
 0x1f1   :  { %7719 = vmatprep.mubr.bf16.mxu1 %v8630_v40  ;;  %v11056_v40 = vld [vmem:[#allocation6 + $0xfd8] sm:$0xff]  }
 0x1f2   :  { %10015 = vmatpush3.bf16.msra.mxu0 %v10977_v61 }
 0x1f3   :  { %10037 = vmatpush3.bf16.msra.mxu1 %v10978_v62  ;;  %10016 = vmatprep.subr.bf16.mxu0 %v10979_v63  ;;  %v11026_v62 = vld [vmem:[#allocation6 + $0xea0] sm:$0xff]  }
 0x1f4   :  { %10038 = vmatprep.subr.bf16.mxu1 %v10980_v0 }
 0x1f6   :  { %10017 = vmatpush3.bf16.msra.mxu0 %v10981_v1  ;;  %v11027_v1 = vld [vmem:[#allocation6 + $0xe68] sm:$0xff]  }
 0x1f7   :  { %10039 = vmatpush3.bf16.msra.mxu1 %v10982_v2  ;;  %10018 = vmatprep.subr.bf16.mxu0 %v10983_v3 }
 0x1f8   :  { %10040 = vmatprep.subr.bf16.mxu1 %v10984_v4  ;;  %v11028_v4 = vld [vmem:[#allocation6 + $0xee8] sm:$0xff]  }
 0x1fa   :  { %10019 = vmatpush3.bf16.msra.mxu0 %v10985_v5 }
 0x1fb   :  { %10041 = vmatpush3.bf16.msra.mxu1 %v10986_v6  ;;  %10020 = vmatprep.subr.bf16.mxu0 %v10987_v7  ;;  %v11029_v7 = vld [vmem:[#allocation6 + $0xe28] sm:$0xff]  }
 0x1fc   :  { %10042 = vmatprep.subr.bf16.mxu1 %v10988_v8 }
 0x1fe   :  { %10021 = vmatpush3.bf16.msra.mxu0 %v10989_v10 }
 0x1ff   :  { %10043 = vmatpush3.bf16.msra.mxu1 %v10990_v12  ;;  %10022 = vmatprep.subr.bf16.mxu0 %v10991_v15  ;;  %v11031_v12 = vld [vmem:[#allocation6 + $0xe70] sm:$0xff]  }
 0x200   :  { %v9720_v9 = vpop.f32.mrb[24].mxu0  ;;  %10044 = vmatprep.subr.bf16.mxu1 %v10992_v18  ;;  %v11033_v15 = vld [vmem:[#allocation6 + $0xe30] sm:$0xff]   ;;  %v11036_v18 = vld [vmem:[#allocation6 + $0xef8] sm:$0xff]  }
 0x201   :  { %v9742_v11 = vpop.f32.mrb[24].mxu1  ;;  %v9721_v13 = vpop.f32.mrb[25].mxu0 }
 0x202   :  { %v9743_v14 = vpop.f32.mrb[25].mxu1  ;;  %v9722_v16 = vadd.f32 %v9721_v13, %v9720_v9  ;;  %v9723_v19 = vpop.f32.mrb[26].mxu0  ;;  %10023 = vmatpush3.bf16.msra.mxu0 %v10993_v21  ;;  %v11030_v9 = vld [vmem:[#allocation6 + $0xea8] sm:$0xff]   ;;  %v100_v21 = vld [vmem:[#allocation3 + $0xe0] sm:$0xff] }
 0x203   :  { %v9744_v17 = vadd.f32 %v9743_v14, %v9742_v11  ;;  %v9745_v20 = vpop.f32.mrb[26].mxu1  ;;  %v9724_v24 = vpop.f32.mrb[27].mxu0  ;;  %10045 = vmatpush3.bf16.msra.mxu1 %v10994_v23  ;;  %10024 = vmatprep.subr.bf16.mxu0 %v10995_v26  ;;  %v11032_v14 = vld [vmem:[#allocation6 + $0xef0] sm:$0xff]   ;;  %v11037_v19 = vld [vmem:[#allocation6 + $0xe38] sm:$0xff]   ;;  %v8631_v23 = vcombine.low %v100_v21, %v100_v21 }
 0x204   :  { %v7122_v22 = vadd.f32 %v9722_v16, %v11589_v39  ;;  %v9746_v25 = vpop.f32.mrb[27].mxu1  ;;  %10046 = vmatprep.subr.bf16.mxu1 %v10996_v28  ;;  %v8629_v39 = vcombine.low %v99_v38, %v99_v38  ;;  %v11034_v16 = vld [vmem:[#allocation6 + $0xeb0] sm:$0xff]   ;;  %v11038_v20 = vld [vmem:[#allocation6 + $0xeb8] sm:$0xff]   ;;  %v8632_v24 = vcombine.high %v100_v21, %v100_v21  ;;  %v11044_v28 = vld [vmem:[#allocation6 + $0xfc0] sm:$0xff]  }
 0x205   :  { %v11054_v38 = vld [vmem:[#allocation6 + $0xf90] sm:$0xff]  }
 0x206   :  { %v11592_v27 = vadd.f32 %v9744_v17, %v7122_v22  ;;  %10025 = vmatpush3.bf16.msra.mxu0 %v10997_v29  ;;  %v11035_v17 = vld [vmem:[#allocation6 + $0xe78] sm:$0xff]   ;;  %v101_v22 = vld [vmem:[#allocation3 + $0xe8] sm:$0xff]  ;;  %v11045_v29 = vld [vmem:[#allocation6 + $0xf00] sm:$0xff]  }
 0x207   :  { %10047 = vmatpush3.bf16.msra.mxu1 %v10998_v30  ;;  %10026 = vmatprep.subr.bf16.mxu0 %v10999_v31  ;;  %v8633_v25 = vcombine.low %v101_v22, %v101_v22  ;;  %v8634_v26 = vcombine.high %v101_v22, %v101_v22  ;;  %v11046_v30 = vld [vmem:[#allocation6 + $0xf80] sm:$0xff]   ;;  %v11047_v31 = vld [vmem:[#allocation6 + $0xf48] sm:$0xff]   ;;  %v11087_v21 = vld [vmem:[#allocation6 + $0x1050] sm:$0xff]  }
 0x208   :  { %10048 = vmatprep.subr.bf16.mxu1 %v11000_v32  ;;  %v11048_v32 = vld [vmem:[#allocation6 + $0xfc8] sm:$0xff]   ;;  %v11088_v22 = vld [vmem:[#allocation6 + $0x10d0] sm:$0xff]  }
 0x20a   :  { %10027 = vmatpush3.bf16.msra.mxu0 %v11001_v33  ;;  %v11049_v33 = vld [vmem:[#allocation6 + $0xf08] sm:$0xff]  }
 0x20b   :  { %10049 = vmatpush3.bf16.msra.mxu1 %v11002_v34  ;;  %10056 = vmatprep.subr.bf16.mxu0 %v11007_v41  ;;  %v11050_v34 = vld [vmem:[#allocation6 + $0xf88] sm:$0xff]   ;;  %v11057_v41 = vld [vmem:[#allocation6 + $0xf18] sm:$0xff]  }
 0x20c   :  { %10078 = vmatprep.subr.bf16.mxu1 %v11008_v42  ;;  %v11058_v42 = vld [vmem:[#allocation6 + $0xf98] sm:$0xff]  }
 0x20d   :  { %7680 = vmatmul.mubr.bf16.vlgmr.msra.gmra.mrb[52].mxu0 %v8627_v36  ;;  %v11052_v36 = vld [vmem:[#allocation6 + $0xfd0] sm:$0xff]  }
 0x20e   :  { %7720 = vmatmul.mubr.bf16.vlgmr.msra.gmra.mrb[52].mxu1 %v8629_v39  ;;  %10057 = vmatpush3.bf16.msra.mxu0 %v11009_v43  ;;  %v11055_v39 = vld [vmem:[#allocation6 + $0xf58] sm:$0xff]   ;;  %v11059_v43 = vld [vmem:[#allocation6 + $0xf60] sm:$0xff]  }
 0x20f   :  { %10079 = vmatpush3.bf16.msra.mxu1 %v11010_v44  ;;  %10058 = vmatprep.subr.bf16.mxu0 %v11011_v45  ;;  %v11060_v44 = vld [vmem:[#allocation6 + $0xfe0] sm:$0xff]  }
 0x210   :  { %10080 = vmatprep.subr.bf16.mxu1 %v11012_v46  ;;  %7759 = vmatprep.mubr.bf16.mxu0 %v8632_v24  ;;  %v11061_v45 = vld [vmem:[#allocation6 + $0xf20] sm:$0xff]   ;;  %v11090_v24 = vld [vmem:[#allocation6 + $0x1090] sm:$0xff]  }
 0x211   :  { %7799 = vmatprep.mubr.bf16.mxu1 %v8634_v26  ;;  %v11092_v26 = vld [vmem:[#allocation6 + $0x10d8] sm:$0xff]  }
 0x212   :  { %10059 = vmatpush3.bf16.msra.mxu0 %v11013_v47  ;;  %v11062_v47 = vld [vmem:[#allocation6 + $0xfa0] sm:$0xff]  }
 0x213   :  { %10081 = vmatpush3.bf16.msra.mxu1 %v11014_v48  ;;  %10060 = vmatprep.subr.bf16.mxu0 %v11015_v49 }
 0x214   :  { %10082 = vmatprep.subr.bf16.mxu1 %v11016_v50 }
 0x216   :  { %10061 = vmatpush3.bf16.msra.mxu0 %v11017_v51 }
 0x217   :  { %10083 = vmatpush3.bf16.msra.mxu1 %v11018_v52  ;;  %10062 = vmatprep.subr.bf16.mxu0 %v11019_v53  ;;  %v11063_v53 = vld [vmem:[#allocation6 + $0xf68] sm:$0xff]  }
 0x218   :  { %10084 = vmatprep.subr.bf16.mxu1 %v11020_v54 }
 0x21a   :  { %10063 = vmatpush3.bf16.msra.mxu0 %v11021_v55  ;;  %v11064_v55 = vld [vmem:[#allocation6 + $0xfe8] sm:$0xff]  }
 0x21b   :  { %10085 = vmatpush3.bf16.msra.mxu1 %v11022_v56  ;;  %10064 = vmatprep.subr.bf16.mxu0 %v11023_v57 }
 0x21c   :  { %10086 = vmatprep.subr.bf16.mxu1 %v11024_v58  ;;  %v11065_v58 = vld [vmem:[#allocation6 + $0xf28] sm:$0xff]  }
 0x21e   :  { %10065 = vmatpush3.bf16.msra.mxu0 %v11025_v60  ;;  %v11066_v60 = vld [vmem:[#allocation6 + $0xfa8] sm:$0xff]  }
 0x21f   :  { %10087 = vmatpush3.bf16.msra.mxu1 %v11026_v62  ;;  %10066 = vmatprep.subr.bf16.mxu0 %v11027_v1  ;;  %v11069_v1 = vld [vmem:[#allocation6 + $0xf30] sm:$0xff]  }
 0x220   :  { %v9764_v59 = vpop.f32.mrb[28].mxu0  ;;  %10088 = vmatprep.subr.bf16.mxu1 %v11028_v4  ;;  %v11072_v4 = vld [vmem:[#allocation6 + $0xff8] sm:$0xff]  }
 0x221   :  { %v9786_v61 = vpop.f32.mrb[28].mxu1  ;;  %v9765_v63 = vpop.f32.mrb[29].mxu0 }
 0x222   :  { %v9787_v0 = vpop.f32.mrb[29].mxu1  ;;  %v9766_v2 = vadd.f32 %v9765_v63, %v9764_v59  ;;  %v9767_v5 = vpop.f32.mrb[30].mxu0  ;;  %10067 = vmatpush3.bf16.msra.mxu0 %v11029_v7  ;;  %v11067_v63 = vld [vmem:[#allocation6 + $0xf70] sm:$0xff]  }
 0x223   :  { %v9788_v3 = vadd.f32 %v9787_v0, %v9786_v61  ;;  %v9789_v6 = vpop.f32.mrb[30].mxu1  ;;  %v9768_v10 = vpop.f32.mrb[31].mxu0  ;;  %10089 = vmatpush3.bf16.msra.mxu1 %v11030_v9  ;;  %10068 = vmatprep.subr.bf16.mxu0 %v11031_v12  ;;  %v11068_v0 = vld [vmem:[#allocation6 + $0xff0] sm:$0xff]   ;;  %v11073_v5 = vld [vmem:[#allocation6 + $0xf38] sm:$0xff]  }
 0x224   :  { %v7202_v8 = vadd.f32 %v9766_v2, %v11592_v27  ;;  %v9790_v11 = vpop.f32.mrb[31].mxu1  ;;  %10090 = vmatprep.subr.bf16.mxu1 %v11032_v14  ;;  %v11043_v27 = vld [vmem:[#allocation6 + $0xf40] sm:$0xff]   ;;  %v11070_v2 = vld [vmem:[#allocation6 + $0xfb0] sm:$0xff]   ;;  %v11074_v6 = vld [vmem:[#allocation6 + $0xfb8] sm:$0xff]  }
 0x225   :  { %v102_v7 = vld [vmem:[#allocation3 + $0xf0] sm:$0xff]  ;;  %v11080_v14 = vld [vmem:[#allocation6 + $0x10c0] sm:$0xff]  }
 0x226   :  { %v11595_v13 = vadd.f32 %v9788_v3, %v7202_v8  ;;  %10069 = vmatpush3.bf16.msra.mxu0 %v11033_v15  ;;  %v11071_v3 = vld [vmem:[#allocation6 + $0xf78] sm:$0xff]   ;;  %v8635_v9 = vcombine.low %v102_v7, %v102_v7  ;;  %v8636_v10 = vcombine.high %v102_v7, %v102_v7  ;;  %v11081_v15 = vld [vmem:[#allocation6 + $0x1000] sm:$0xff]   ;;  %v11123_v7 = vld [vmem:[#allocation6 + $0x1150] sm:$0xff]  }
 0x227   :  { %10091 = vmatpush3.bf16.msra.mxu1 %v11034_v16  ;;  %10070 = vmatprep.subr.bf16.mxu0 %v11035_v17  ;;  %v103_v8 = vld [vmem:[#allocation3 + $0xf8] sm:$0xff]  ;;  %v11082_v16 = vld [vmem:[#allocation6 + $0x1080] sm:$0xff]   ;;  %v11083_v17 = vld [vmem:[#allocation6 + $0x1048] sm:$0xff]  }
 0x228   :  { %10092 = vmatprep.subr.bf16.mxu1 %v11036_v18  ;;  %v8637_v11 = vcombine.low %v103_v8, %v103_v8  ;;  %v8638_v12 = vcombine.high %v103_v8, %v103_v8  ;;  %v11084_v18 = vld [vmem:[#allocation6 + $0x10c8] sm:$0xff]   ;;  %v11124_v8 = vld [vmem:[#allocation6 + $0x11d0] sm:$0xff]  }
 0x22a   :  { %10071 = vmatpush3.bf16.msra.mxu0 %v11037_v19  ;;  %v11085_v19 = vld [vmem:[#allocation6 + $0x1008] sm:$0xff]  }
 0x22b   :  { %10093 = vmatpush3.bf16.msra.mxu1 %v11038_v20  ;;  %10100 = vmatprep.subr.bf16.mxu0 %v11043_v27  ;;  %v11086_v20 = vld [vmem:[#allocation6 + $0x1088] sm:$0xff]   ;;  %v11093_v27 = vld [vmem:[#allocation6 + $0x1018] sm:$0xff]  }
 0x22c   :  { %10122 = vmatprep.subr.bf16.mxu1 %v11044_v28  ;;  %v11094_v28 = vld [vmem:[#allocation6 + $0x1098] sm:$0xff]  }
 0x22d   :  { %7760 = vmatmul.mubr.bf16.vlgmr.msra.gmra.mrb[56].mxu0 %v8631_v23  ;;  %v11089_v23 = vld [vmem:[#allocation6 + $0x1010] sm:$0xff]  }
 0x22e   :  { %7800 = vmatmul.mubr.bf16.vlgmr.msra.gmra.mrb[56].mxu1 %v8633_v25  ;;  %10101 = vmatpush3.bf16.msra.mxu0 %v11045_v29  ;;  %v11091_v25 = vld [vmem:[#allocation6 + $0x1058] sm:$0xff]   ;;  %v11095_v29 = vld [vmem:[#allocation6 + $0x1060] sm:$0xff]  }
 0x22f   :  { %10123 = vmatpush3.bf16.msra.mxu1 %v11046_v30  ;;  %10102 = vmatprep.subr.bf16.mxu0 %v11047_v31  ;;  %v11096_v30 = vld [vmem:[#allocation6 + $0x10e0] sm:$0xff]  }
 0x230   :  { %10124 = vmatprep.subr.bf16.mxu1 %v11048_v32  ;;  %7839 = vmatprep.mubr.bf16.mxu0 %v8636_v10  ;;  %v11097_v31 = vld [vmem:[#allocation6 + $0x1020] sm:$0xff]   ;;  %v11126_v10 = vld [vmem:[#allocation6 + $0x1190] sm:$0xff]  }
 0x231   :  { %7879 = vmatprep.mubr.bf16.mxu1 %v8638_v12  ;;  %v11128_v12 = vld [vmem:[#allocation6 + $0x11d8] sm:$0xff]  }
 0x232   :  { %10103 = vmatpush3.bf16.msra.mxu0 %v11049_v33  ;;  %v11098_v33 = vld [vmem:[#allocation6 + $0x10a0] sm:$0xff]  }
 0x233   :  { %10125 = vmatpush3.bf16.msra.mxu1 %v11050_v34  ;;  %10104 = vmatprep.subr.bf16.mxu0 %v11051_v35 }
 0x234   :  { %10126 = vmatprep.subr.bf16.mxu1 %v11052_v36 }
 0x236   :  { %10105 = vmatpush3.bf16.msra.mxu0 %v11053_v37 }
 0x237   :  { %10127 = vmatpush3.bf16.msra.mxu1 %v11054_v38  ;;  %10106 = vmatprep.subr.bf16.mxu0 %v11055_v39  ;;  %v11099_v39 = vld [vmem:[#allocation6 + $0x1068] sm:$0xff]  }
 0x238   :  { %10128 = vmatprep.subr.bf16.mxu1 %v11056_v40 }
 0x23a   :  { %10107 = vmatpush3.bf16.msra.mxu0 %v11057_v41  ;;  %v11100_v41 = vld [vmem:[#allocation6 + $0x10e8] sm:$0xff]  }
 0x23b   :  { %10129 = vmatpush3.bf16.msra.mxu1 %v11058_v42  ;;  %10108 = vmatprep.subr.bf16.mxu0 %v11059_v43 }
 0x23c   :  { %10130 = vmatprep.subr.bf16.mxu1 %v11060_v44  ;;  %v11101_v44 = vld [vmem:[#allocation6 + $0x1028] sm:$0xff]  }
 0x23e   :  { %10109 = vmatpush3.bf16.msra.mxu0 %v11061_v45 }
 0x23f   :  { %10131 = vmatpush3.bf16.msra.mxu1 %v11062_v47  ;;  %10110 = vmatprep.subr.bf16.mxu0 %v11063_v53  ;;  %v11107_v53 = vld [vmem:[#allocation6 + $0x1078] sm:$0xff]  }
 0x240   :  { %v9808_v46 = vpop.f32.mrb[32].mxu0  ;;  %10132 = vmatprep.subr.bf16.mxu1 %v11064_v55  ;;  %v11109_v55 = vld [vmem:[#allocation6 + $0x1038] sm:$0xff]  }
 0x241   :  { %v9830_v48 = vpop.f32.mrb[32].mxu1  ;;  %v9809_v49 = vpop.f32.mrb[33].mxu0 }
 0x242   :  { %v9831_v50 = vpop.f32.mrb[33].mxu1  ;;  %v9810_v51 = vadd.f32 %v9809_v49, %v9808_v46  ;;  %v9811_v54 = vpop.f32.mrb[34].mxu0  ;;  %10111 = vmatpush3.bf16.msra.mxu0 %v11065_v58  ;;  %v11102_v46 = vld [vmem:[#allocation6 + $0x10a8] sm:$0xff]   ;;  %v11103_v49 = vld [vmem:[#allocation6 + $0x1070] sm:$0xff]  }
 0x243   :  { %v9832_v52 = vadd.f32 %v9831_v50, %v9830_v48  ;;  %v9833_v56 = vpop.f32.mrb[34].mxu1  ;;  %v9812_v59 = vpop.f32.mrb[35].mxu0  ;;  %10133 = vmatpush3.bf16.msra.mxu1 %v11066_v60  ;;  %10112 = vmatprep.subr.bf16.mxu0 %v11067_v63  ;;  %v11104_v50 = vld [vmem:[#allocation6 + $0x10f0] sm:$0xff]   ;;  %v11108_v54 = vld [vmem:[#allocation6 + $0x10f8] sm:$0xff]   ;;  %v105_v58 = vld [vmem:[#allocation3 + $0x108] sm:$0xff] }
 0x244   :  { %v7282_v57 = vadd.f32 %v9810_v51, %v11595_v13  ;;  %v9834_v61 = vpop.f32.mrb[35].mxu1  ;;  %10134 = vmatprep.subr.bf16.mxu1 %v11068_v0  ;;  %v11079_v13 = vld [vmem:[#allocation6 + $0x1040] sm:$0xff]   ;;  %v11105_v51 = vld [vmem:[#allocation6 + $0x1030] sm:$0xff]   ;;  %v11110_v56 = vld [vmem:[#allocation6 + $0x10b8] sm:$0xff]  }
 0x245   :  { %v8641_v61 = vcombine.low %v105_v58, %v105_v58  ;;  %v11115_v63 = vld [vmem:[#allocation6 + $0x1140] sm:$0xff]  }
 0x246   :  { %v11598_v62 = vadd.f32 %v9832_v52, %v7282_v57  ;;  %10113 = vmatpush3.bf16.msra.mxu0 %v11069_v1  ;;  %v11106_v52 = vld [vmem:[#allocation6 + $0x10b0] sm:$0xff]   ;;  %v104_v57 = vld [vmem:[#allocation3 + $0x100] sm:$0xff] }
 0x247   :  { %10135 = vmatpush3.bf16.msra.mxu1 %v11070_v2  ;;  %10114 = vmatprep.subr.bf16.mxu0 %v11071_v3  ;;  %v8639_v59 = vcombine.low %v104_v57, %v104_v57  ;;  %v8640_v60 = vcombine.high %v104_v57, %v104_v57  ;;  %v11116_v0 = vld [vmem:[#allocation6 + $0x11c0] sm:$0xff]   ;;  %v11119_v3 = vld [vmem:[#allocation6 + $0x1148] sm:$0xff]   ;;  %v11159_v57 = vld [vmem:[#allocation6 + $0x1250] sm:$0xff]  }
 0x248   :  { %10136 = vmatprep.subr.bf16.mxu1 %v11072_v4  ;;  %v11117_v1 = vld [vmem:[#allocation6 + $0x1100] sm:$0xff]   ;;  %v11120_v4 = vld [vmem:[#allocation6 + $0x11c8] sm:$0xff]  }
 0x249   :  { %v11118_v2 = vld [vmem:[#allocation6 + $0x1180] sm:$0xff]  }
 0x24a   :  { %10115 = vmatpush3.bf16.msra.mxu0 %v11073_v5  ;;  %v11121_v5 = vld [vmem:[#allocation6 + $0x1108] sm:$0xff]  }
 0x24b   :  { %10137 = vmatpush3.bf16.msra.mxu1 %v11074_v6  ;;  %10144 = vmatprep.subr.bf16.mxu0 %v11079_v13  ;;  %v11122_v6 = vld [vmem:[#allocation6 + $0x1188] sm:$0xff]   ;;  %v11129_v13 = vld [vmem:[#allocation6 + $0x1118] sm:$0xff]  }
 0x24c   :  { %10166 = vmatprep.subr.bf16.mxu1 %v11080_v14  ;;  %v11130_v14 = vld [vmem:[#allocation6 + $0x1198] sm:$0xff]  }
 0x24d   :  { %7840 = vmatmul.mubr.bf16.vlgmr.msra.gmra.mrb[60].mxu0 %v8635_v9  ;;  %v11125_v9 = vld [vmem:[#allocation6 + $0x1110] sm:$0xff]  }
 0x24e   :  { %7880 = vmatmul.mubr.bf16.vlgmr.msra.gmra.mrb[60].mxu1 %v8637_v11  ;;  %10145 = vmatpush3.bf16.msra.mxu0 %v11081_v15  ;;  %v11127_v11 = vld [vmem:[#allocation6 + $0x1158] sm:$0xff]   ;;  %v11131_v15 = vld [vmem:[#allocation6 + $0x1160] sm:$0xff]  }
 0x24f   :  { %10167 = vmatpush3.bf16.msra.mxu1 %v11082_v16  ;;  %10146 = vmatprep.subr.bf16.mxu0 %v11083_v17  ;;  %v11132_v16 = vld [vmem:[#allocation6 + $0x11e0] sm:$0xff]  }
 0x250   :  { %10168 = vmatprep.subr.bf16.mxu1 %v11084_v18  ;;  %7919 = vmatprep.mubr.bf16.mxu0 %v8640_v60  ;;  %v11133_v17 = vld [vmem:[#allocation6 + $0x1120] sm:$0xff]   ;;  %v11162_v60 = vld [vmem:[#allocation6 + $0x1290] sm:$0xff]  }
 0x252   :  { %10147 = vmatpush3.bf16.msra.mxu0 %v11085_v19  ;;  %v11134_v19 = vld [vmem:[#allocation6 + $0x11a0] sm:$0xff]  }
 0x253   :  { %10169 = vmatpush3.bf16.msra.mxu1 %v11086_v20  ;;  %10148 = vmatprep.subr.bf16.mxu0 %v11087_v21 }
 0x254   :  { %10170 = vmatprep.subr.bf16.mxu1 %v11088_v22 }
 0x256   :  { %10149 = vmatpush3.bf16.msra.mxu0 %v11089_v23 }
 0x257   :  { %10171 = vmatpush3.bf16.msra.mxu1 %v11090_v24  ;;  %10150 = vmatprep.subr.bf16.mxu0 %v11091_v25  ;;  %v11135_v25 = vld [vmem:[#allocation6 + $0x1168] sm:$0xff]  }
 0x258   :  { %10172 = vmatprep.subr.bf16.mxu1 %v11092_v26 }
 0x25a   :  { %10151 = vmatpush3.bf16.msra.mxu0 %v11093_v27  ;;  %v11136_v27 = vld [vmem:[#allocation6 + $0x11e8] sm:$0xff]  }
 0x25b   :  { %10173 = vmatpush3.bf16.msra.mxu1 %v11094_v28  ;;  %10152 = vmatprep.subr.bf16.mxu0 %v11095_v29 }
 0x25c   :  { %10174 = vmatprep.subr.bf16.mxu1 %v11096_v30  ;;  %v11137_v30 = vld [vmem:[#allocation6 + $0x1128] sm:$0xff]  }
 0x25e   :  { %10153 = vmatpush3.bf16.msra.mxu0 %v11097_v31 }
 0x25f   :  { %10175 = vmatpush3.bf16.msra.mxu1 %v11098_v33  ;;  %10154 = vmatprep.subr.bf16.mxu0 %v11099_v39  ;;  %v11143_v39 = vld [vmem:[#allocation6 + $0x1178] sm:$0xff]  }
 0x260   :  { %v9852_v32 = vpop.f32.mrb[36].mxu0  ;;  %10176 = vmatprep.subr.bf16.mxu1 %v11100_v41  ;;  %v11145_v41 = vld [vmem:[#allocation6 + $0x1138] sm:$0xff]  }
 0x261   :  { %v9874_v34 = vpop.f32.mrb[36].mxu1  ;;  %v9853_v35 = vpop.f32.mrb[37].mxu0 }
 0x262   :  { %v9875_v36 = vpop.f32.mrb[37].mxu1  ;;  %v9854_v37 = vadd.f32 %v9853_v35, %v9852_v32  ;;  %v9855_v40 = vpop.f32.mrb[38].mxu0  ;;  %10155 = vmatpush3.bf16.msra.mxu0 %v11101_v44  ;;  %v11138_v32 = vld [vmem:[#allocation6 + $0x11a8] sm:$0xff]   ;;  %v11139_v35 = vld [vmem:[#allocation6 + $0x1170] sm:$0xff]   ;;  %v107_v44 = vld [vmem:[#allocation3 + $0x118] sm:$0xff] }
 0x263   :  { %v9876_v38 = vadd.f32 %v9875_v36, %v9874_v34  ;;  %v9877_v42 = vpop.f32.mrb[38].mxu1  ;;  %v9856_v45 = vpop.f32.mrb[39].mxu0  ;;  %10177 = vmatpush3.bf16.msra.mxu1 %v11102_v46  ;;  %10156 = vmatprep.subr.bf16.mxu0 %v11103_v49  ;;  %v11140_v36 = vld [vmem:[#allocation6 + $0x11f0] sm:$0xff]   ;;  %v11144_v40 = vld [vmem:[#allocation6 + $0x11f8] sm:$0xff]   ;;  %v11151_v49 = vld [vmem:[#allocation6 + $0x1240] sm:$0xff]  }
 0x264   :  { %v7362_v43 = vadd.f32 %v9854_v37, %v11598_v62  ;;  %v9878_v47 = vpop.f32.mrb[39].mxu1  ;;  %10178 = vmatprep.subr.bf16.mxu1 %v11104_v50  ;;  %v8642_v62 = vcombine.high %v105_v58, %v105_v58  ;;  %v11141_v37 = vld [vmem:[#allocation6 + $0x1130] sm:$0xff]   ;;  %v11146_v42 = vld [vmem:[#allocation6 + $0x11b8] sm:$0xff]   ;;  %v11152_v50 = vld [vmem:[#allocation6 + $0x12c0] sm:$0xff]  }
 0x265   :  { %v8645_v47 = vcombine.low %v107_v44, %v107_v44  ;;  %v11160_v58 = vld [vmem:[#allocation6 + $0x12d0] sm:$0xff]  }
 0x266   :  { %v11601_v48 = vadd.f32 %v9876_v38, %v7362_v43  ;;  %10157 = vmatpush3.bf16.msra.mxu0 %v11105_v51  ;;  %7959 = vmatprep.mubr.bf16.mxu1 %v8642_v62  ;;  %v11142_v38 = vld [vmem:[#allocation6 + $0x11b0] sm:$0xff]   ;;  %v11153_v51 = vld [vmem:[#allocation6 + $0x1200] sm:$0xff]   ;;  %v11164_v62 = vld [vmem:[#allocation6 + $0x12d8] sm:$0xff]  }
 0x267   :  { %10179 = vmatpush3.bf16.msra.mxu1 %v11106_v52  ;;  %10158 = vmatprep.subr.bf16.mxu0 %v11107_v53  ;;  %v106_v43 = vld [vmem:[#allocation3 + $0x110] sm:$0xff]  ;;  %v11154_v52 = vld [vmem:[#allocation6 + $0x1280] sm:$0xff]   ;;  %v11155_v53 = vld [vmem:[#allocation6 + $0x1248] sm:$0xff]  }
 0x268   :  { %10180 = vmatprep.subr.bf16.mxu1 %v11108_v54  ;;  %v8643_v45 = vcombine.low %v106_v43, %v106_v43  ;;  %v8644_v46 = vcombine.high %v106_v43, %v106_v43  ;;  %v11156_v54 = vld [vmem:[#allocation6 + $0x12c8] sm:$0xff]   ;;  %v11195_v43 = vld [vmem:[#allocation6 + $0x1350] sm:$0xff]  }
 0x26a   :  { %10159 = vmatpush3.bf16.msra.mxu0 %v11109_v55  ;;  %v11157_v55 = vld [vmem:[#allocation6 + $0x1208] sm:$0xff]  }
 0x26b   :  { %10181 = vmatpush3.bf16.msra.mxu1 %v11110_v56  ;;  %10188 = vmatprep.subr.bf16.mxu0 %v11115_v63  ;;  %v11158_v56 = vld [vmem:[#allocation6 + $0x1288] sm:$0xff]   ;;  %v11165_v63 = vld [vmem:[#allocation6 + $0x1218] sm:$0xff]  }
 0x26c   :  { %10210 = vmatprep.subr.bf16.mxu1 %v11116_v0  ;;  %v11166_v0 = vld [vmem:[#allocation6 + $0x1298] sm:$0xff]  }
 0x26d   :  { %7920 = vmatmul.mubr.bf16.vlgmr.msra.gmra.mrb[64].mxu0 %v8639_v59  ;;  %v11161_v59 = vld [vmem:[#allocation6 + $0x1210] sm:$0xff]  }
 0x26e   :  { %7960 = vmatmul.mubr.bf16.vlgmr.msra.gmra.mrb[64].mxu1 %v8641_v61  ;;  %10189 = vmatpush3.bf16.msra.mxu0 %v11117_v1  ;;  %v11163_v61 = vld [vmem:[#allocation6 + $0x1258] sm:$0xff]   ;;  %v11167_v1 = vld [vmem:[#allocation6 + $0x1260] sm:$0xff]  }
 0x26f   :  { %10211 = vmatpush3.bf16.msra.mxu1 %v11118_v2  ;;  %10190 = vmatprep.subr.bf16.mxu0 %v11119_v3  ;;  %v11168_v2 = vld [vmem:[#allocation6 + $0x12e0] sm:$0xff]  }
 0x270   :  { %10212 = vmatprep.subr.bf16.mxu1 %v11120_v4  ;;  %7999 = vmatprep.mubr.bf16.mxu0 %v8644_v46  ;;  %v11169_v4 = vld [vmem:[#allocation6 + $0x1220] sm:$0xff]   ;;  %v11198_v46 = vld [vmem:[#allocation6 + $0x1390] sm:$0xff]  }
 0x272   :  { %10191 = vmatpush3.bf16.msra.mxu0 %v11121_v5 }
 0x273   :  { %10213 = vmatpush3.bf16.msra.mxu1 %v11122_v6  ;;  %10192 = vmatprep.subr.bf16.mxu0 %v11123_v7  ;;  %v11170_v6 = vld [vmem:[#allocation6 + $0x12a0] sm:$0xff]  }
 0x274   :  { %10214 = vmatprep.subr.bf16.mxu1 %v11124_v8 }
 0x276   :  { %10193 = vmatpush3.bf16.msra.mxu0 %v11125_v9 }
 0x277   :  { %10215 = vmatpush3.bf16.msra.mxu1 %v11126_v10  ;;  %10194 = vmatprep.subr.bf16.mxu0 %v11127_v11  ;;  %v11171_v10 = vld [vmem:[#allocation6 + $0x1268] sm:$0xff]  }
 0x278   :  { %10216 = vmatprep.subr.bf16.mxu1 %v11128_v12  ;;  %v11172_v12 = vld [vmem:[#allocation6 + $0x12e8] sm:$0xff]  }
 0x27a   :  { %10195 = vmatpush3.bf16.msra.mxu0 %v11129_v13 }
 0x27b   :  { %10217 = vmatpush3.bf16.msra.mxu1 %v11130_v14  ;;  %10196 = vmatprep.subr.bf16.mxu0 %v11131_v15 }
 0x27c   :  { %10218 = vmatprep.subr.bf16.mxu1 %v11132_v16  ;;  %v11173_v16 = vld [vmem:[#allocation6 + $0x1228] sm:$0xff]  }
 0x27e   :  { %10197 = vmatpush3.bf16.msra.mxu0 %v11133_v17  ;;  %v11174_v17 = vld [vmem:[#allocation6 + $0x12a8] sm:$0xff]  }
 0x27f   :  { %10219 = vmatpush3.bf16.msra.mxu1 %v11134_v19  ;;  %10198 = vmatprep.subr.bf16.mxu0 %v11135_v25  ;;  %v11179_v25 = vld [vmem:[#allocation6 + $0x1278] sm:$0xff]  }
 0x280   :  { %v9896_v18 = vpop.f32.mrb[40].mxu0  ;;  %10220 = vmatprep.subr.bf16.mxu1 %v11136_v27  ;;  %v11181_v27 = vld [vmem:[#allocation6 + $0x1238] sm:$0xff]  }
 0x281   :  { %v9918_v20 = vpop.f32.mrb[40].mxu1  ;;  %v9897_v21 = vpop.f32.mrb[41].mxu0 }
 0x282   :  { %v9919_v22 = vpop.f32.mrb[41].mxu1  ;;  %v9898_v23 = vadd.f32 %v9897_v21, %v9896_v18  ;;  %v9899_v26 = vpop.f32.mrb[42].mxu0  ;;  %10199 = vmatpush3.bf16.msra.mxu0 %v11137_v30  ;;  %v11175_v21 = vld [vmem:[#allocation6 + $0x1270] sm:$0xff]   ;;  %v109_v30 = vld [vmem:[#allocation3 + $0x128] sm:$0xff] }
 0x283   :  { %v9920_v24 = vadd.f32 %v9919_v22, %v9918_v20  ;;  %v9921_v28 = vpop.f32.mrb[42].mxu1  ;;  %v9900_v31 = vpop.f32.mrb[43].mxu0  ;;  %10221 = vmatpush3.bf16.msra.mxu1 %v11138_v32  ;;  %10200 = vmatprep.subr.bf16.mxu0 %v11139_v35  ;;  %v11176_v22 = vld [vmem:[#allocation6 + $0x12f0] sm:$0xff]   ;;  %v11180_v26 = vld [vmem:[#allocation6 + $0x12f8] sm:$0xff]   ;;  %v8650_v35 = vcombine.high %v109_v30, %v109_v30 }
 0x284   :  { %v7442_v29 = vadd.f32 %v9898_v23, %v11601_v48  ;;  %v9922_v33 = vpop.f32.mrb[43].mxu1  ;;  %10222 = vmatprep.subr.bf16.mxu1 %v11140_v36  ;;  %v8646_v48 = vcombine.high %v107_v44, %v107_v44  ;;  %v11177_v23 = vld [vmem:[#allocation6 + $0x1230] sm:$0xff]   ;;  %v11182_v28 = vld [vmem:[#allocation6 + $0x12b8] sm:$0xff]   ;;  %v11188_v36 = vld [vmem:[#allocation6 + $0x13c0] sm:$0xff]  }
 0x285   :  { %v8649_v33 = vcombine.low %v109_v30, %v109_v30  ;;  %v11196_v44 = vld [vmem:[#allocation6 + $0x13d0] sm:$0xff]  }
 0x286   :  { %v11604_v34 = vadd.f32 %v9920_v24, %v7442_v29  ;;  %10201 = vmatpush3.bf16.msra.mxu0 %v11141_v37  ;;  %8039 = vmatprep.mubr.bf16.mxu1 %v8646_v48  ;;  %v11178_v24 = vld [vmem:[#allocation6 + $0x12b0] sm:$0xff]   ;;  %v108_v29 = vld [vmem:[#allocation3 + $0x120] sm:$0xff]  ;;  %v11200_v48 = vld [vmem:[#allocation6 + $0x13d8] sm:$0xff]  }
 0x287   :  { %10223 = vmatpush3.bf16.msra.mxu1 %v11142_v38  ;;  %10202 = vmatprep.subr.bf16.mxu0 %v11143_v39  ;;  %v8647_v31 = vcombine.low %v108_v29, %v108_v29  ;;  %v8648_v32 = vcombine.high %v108_v29, %v108_v29  ;;  %v11189_v37 = vld [vmem:[#allocation6 + $0x1300] sm:$0xff]   ;;  %v11191_v39 = vld [vmem:[#allocation6 + $0x1348] sm:$0xff]   ;;  %v11231_v29 = vld [vmem:[#allocation6 + $0x1450] sm:$0xff]  }
 0x288   :  { %10224 = vmatprep.subr.bf16.mxu1 %v11144_v40  ;;  %v11190_v38 = vld [vmem:[#allocation6 + $0x1380] sm:$0xff]   ;;  %v11192_v40 = vld [vmem:[#allocation6 + $0x13c8] sm:$0xff]   ;;  %v11232_v30 = vld [vmem:[#allocation6 + $0x14d0] sm:$0xff]  }
 0x28a   :  { %10203 = vmatpush3.bf16.msra.mxu0 %v11145_v41  ;;  %v11193_v41 = vld [vmem:[#allocation6 + $0x1308] sm:$0xff]  }
 0x28b   :  { %10225 = vmatpush3.bf16.msra.mxu1 %v11146_v42  ;;  %10232 = vmatprep.subr.bf16.mxu0 %v11151_v49  ;;  %v11194_v42 = vld [vmem:[#allocation6 + $0x1388] sm:$0xff]   ;;  %v11201_v49 = vld [vmem:[#allocation6 + $0x1318] sm:$0xff]  }
 0x28c   :  { %10254 = vmatprep.subr.bf16.mxu1 %v11152_v50  ;;  %v11202_v50 = vld [vmem:[#allocation6 + $0x1398] sm:$0xff]  }
 0x28d   :  { %8000 = vmatmul.mubr.bf16.vlgmr.msra.gmra.mrb[68].mxu0 %v8643_v45  ;;  %v11197_v45 = vld [vmem:[#allocation6 + $0x1310] sm:$0xff]  }
 0x28e   :  { %8040 = vmatmul.mubr.bf16.vlgmr.msra.gmra.mrb[68].mxu1 %v8645_v47  ;;  %10233 = vmatpush3.bf16.msra.mxu0 %v11153_v51  ;;  %v11199_v47 = vld [vmem:[#allocation6 + $0x1358] sm:$0xff]   ;;  %v11203_v51 = vld [vmem:[#allocation6 + $0x1360] sm:$0xff]  }
 0x28f   :  { %10255 = vmatpush3.bf16.msra.mxu1 %v11154_v52  ;;  %10234 = vmatprep.subr.bf16.mxu0 %v11155_v53  ;;  %v11204_v52 = vld [vmem:[#allocation6 + $0x13e0] sm:$0xff]  }
 0x290   :  { %10256 = vmatprep.subr.bf16.mxu1 %v11156_v54  ;;  %8079 = vmatprep.mubr.bf16.mxu0 %v8648_v32  ;;  %v11205_v54 = vld [vmem:[#allocation6 + $0x1320] sm:$0xff]   ;;  %v11234_v32 = vld [vmem:[#allocation6 + $0x1490] sm:$0xff]  }
 0x291   :  { %8119 = vmatprep.mubr.bf16.mxu1 %v8650_v35  ;;  %v11237_v35 = vld [vmem:[#allocation6 + $0x1418] sm:$0xff]  }
 0x292   :  { %10235 = vmatpush3.bf16.msra.mxu0 %v11157_v55 }
 0x293   :  { %10257 = vmatpush3.bf16.msra.mxu1 %v11158_v56  ;;  %10236 = vmatprep.subr.bf16.mxu0 %v11159_v57  ;;  %v11206_v56 = vld [vmem:[#allocation6 + $0x13a0] sm:$0xff]  }
 0x294   :  { %10258 = vmatprep.subr.bf16.mxu1 %v11160_v58 }
 0x296   :  { %10237 = vmatpush3.bf16.msra.mxu0 %v11161_v59  ;;  %v11207_v59 = vld [vmem:[#allocation6 + $0x1368] sm:$0xff]  }
 0x297   :  { %10259 = vmatpush3.bf16.msra.mxu1 %v11162_v60  ;;  %10238 = vmatprep.subr.bf16.mxu0 %v11163_v61 }
 0x298   :  { %10260 = vmatprep.subr.bf16.mxu1 %v11164_v62  ;;  %v11208_v62 = vld [vmem:[#allocation6 + $0x13e8] sm:$0xff]  }
 0x29a   :  { %10239 = vmatpush3.bf16.msra.mxu0 %v11165_v63 }
 0x29b   :  { %10261 = vmatpush3.bf16.msra.mxu1 %v11166_v0  ;;  %10240 = vmatprep.subr.bf16.mxu0 %v11167_v1  ;;  %v11209_v1 = vld [vmem:[#allocation6 + $0x1328] sm:$0xff]  }
 0x29c   :  { %10262 = vmatprep.subr.bf16.mxu1 %v11168_v2 }
 0x29e   :  { %10241 = vmatpush3.bf16.msra.mxu0 %v11169_v4 }
 0x29f   :  { %10263 = vmatpush3.bf16.msra.mxu1 %v11170_v6  ;;  %10242 = vmatprep.subr.bf16.mxu0 %v11171_v10  ;;  %v11211_v6 = vld [vmem:[#allocation6 + $0x1370] sm:$0xff]  }
 0x2a0   :  { %v9940_v3 = vpop.f32.mrb[44].mxu0  ;;  %10264 = vmatprep.subr.bf16.mxu1 %v11172_v12  ;;  %v11214_v10 = vld [vmem:[#allocation6 + $0x13b0] sm:$0xff]   ;;  %v11216_v12 = vld [vmem:[#allocation6 + $0x13f8] sm:$0xff]  }
 0x2a1   :  { %v9962_v5 = vpop.f32.mrb[44].mxu1  ;;  %v9941_v7 = vpop.f32.mrb[45].mxu0 }
 0x2a2   :  { %v9942_v8 = vadd.f32 %v9941_v7, %v9940_v3  ;;  %v9963_v9 = vpop.f32.mrb[45].mxu1  ;;  %v9943_v13 = vpop.f32.mrb[46].mxu0  ;;  %10243 = vmatpush3.bf16.msra.mxu0 %v11173_v16  ;;  %v11210_v3 = vld [vmem:[#allocation6 + $0x13a8] sm:$0xff]  }
 0x2a3   :  { %v9964_v11 = vadd.f32 %v9963_v9, %v9962_v5  ;;  %v9965_v15 = vpop.f32.mrb[46].mxu1  ;;  %v9944_v18 = vpop.f32.mrb[47].mxu0  ;;  %10265 = vmatpush3.bf16.msra.mxu1 %v11174_v17  ;;  %10244 = vmatprep.subr.bf16.mxu0 %v11175_v21  ;;  %v11213_v9 = vld [vmem:[#allocation6 + $0x1330] sm:$0xff]   ;;  %v11217_v13 = vld [vmem:[#allocation6 + $0x1338] sm:$0xff]   ;;  %v11223_v21 = vld [vmem:[#allocation6 + $0x1440] sm:$0xff]  }
 0x2a4   :  { %v7522_v14 = vadd.f32 %v9942_v8, %v11604_v34  ;;  %v9966_v20 = vpop.f32.mrb[47].mxu1  ;;  %10266 = vmatprep.subr.bf16.mxu1 %v11176_v22  ;;  %v11187_v34 = vld [vmem:[#allocation6 + $0x1340] sm:$0xff]   ;;  %v11212_v8 = vld [vmem:[#allocation6 + $0x13f0] sm:$0xff]   ;;  %v111_v18 = vld [vmem:[#allocation3 + $0x138] sm:$0xff] }
 0x2a5   :  { %v110_v15 = vld [vmem:[#allocation3 + $0x130] sm:$0xff]  ;;  %v8654_v20 = vcombine.high %v111_v18, %v111_v18  ;;  %v11224_v22 = vld [vmem:[#allocation6 + $0x14c0] sm:$0xff]  }
 0x2a6   :  { %v11607_v19 = vadd.f32 %v9964_v11, %v7522_v14  ;;  %10245 = vmatpush3.bf16.msra.mxu0 %v11177_v23  ;;  %v11215_v11 = vld [vmem:[#allocation6 + $0x1378] sm:$0xff]   ;;  %v8651_v16 = vcombine.low %v110_v15, %v110_v15  ;;  %v8652_v17 = vcombine.high %v110_v15, %v110_v15  ;;  %v11225_v23 = vld [vmem:[#allocation6 + $0x1400] sm:$0xff]   ;;  %v11267_v15 = vld [vmem:[#allocation6 + $0x1550] sm:$0xff]  }
 0x2a7   :  { %10267 = vmatpush3.bf16.msra.mxu1 %v11178_v24  ;;  %10246 = vmatprep.subr.bf16.mxu0 %v11179_v25  ;;  %v11218_v14 = vld [vmem:[#allocation6 + $0x13b8] sm:$0xff]   ;;  %v11226_v24 = vld [vmem:[#allocation6 + $0x1480] sm:$0xff]   ;;  %v11227_v25 = vld [vmem:[#allocation6 + $0x1448] sm:$0xff]  }
 0x2a8   :  { %10268 = vmatprep.subr.bf16.mxu1 %v11180_v26  ;;  %v11228_v26 = vld [vmem:[#allocation6 + $0x14c8] sm:$0xff]  }
 0x2aa   :  { %10247 = vmatpush3.bf16.msra.mxu0 %v11181_v27  ;;  %v11229_v27 = vld [vmem:[#allocation6 + $0x1408] sm:$0xff]  }
 0x2ab   :  { %10269 = vmatpush3.bf16.msra.mxu1 %v11182_v28  ;;  %10276 = vmatprep.subr.bf16.mxu0 %v11187_v34  ;;  %v11230_v28 = vld [vmem:[#allocation6 + $0x1488] sm:$0xff]   ;;  %v11236_v34 = vld [vmem:[#allocation6 + $0x14d8] sm:$0xff]  }
 0x2ac   :  { %10298 = vmatprep.subr.bf16.mxu1 %v11188_v36  ;;  %v11238_v36 = vld [vmem:[#allocation6 + $0x1498] sm:$0xff]  }
 0x2ad   :  { %8080 = vmatmul.mubr.bf16.vlgmr.msra.gmra.mrb[72].mxu0 %v8647_v31  ;;  %v11233_v31 = vld [vmem:[#allocation6 + $0x1410] sm:$0xff]  }
 0x2ae   :  { %8120 = vmatmul.mubr.bf16.vlgmr.msra.gmra.mrb[72].mxu1 %v8649_v33  ;;  %10277 = vmatpush3.bf16.msra.mxu0 %v11189_v37  ;;  %v11235_v33 = vld [vmem:[#allocation6 + $0x1458] sm:$0xff]   ;;  %v11239_v37 = vld [vmem:[#allocation6 + $0x1460] sm:$0xff]  }
 0x2af   :  { %10299 = vmatpush3.bf16.msra.mxu1 %v11190_v38  ;;  %10278 = vmatprep.subr.bf16.mxu0 %v11191_v39  ;;  %v11240_v38 = vld [vmem:[#allocation6 + $0x14e0] sm:$0xff]  }
 0x2b0   :  { %10300 = vmatprep.subr.bf16.mxu1 %v11192_v40  ;;  %8159 = vmatprep.mubr.bf16.mxu0 %v8652_v17  ;;  %v11241_v40 = vld [vmem:[#allocation6 + $0x1420] sm:$0xff]   ;;  %v11269_v17 = vld [vmem:[#allocation6 + $0x1510] sm:$0xff]  }
 0x2b1   :  { %8199 = vmatprep.mubr.bf16.mxu1 %v8654_v20  ;;  %v11272_v20 = vld [vmem:[#allocation6 + $0x15d8] sm:$0xff]  }
 0x2b2   :  { %10279 = vmatpush3.bf16.msra.mxu0 %v11193_v41 }
 0x2b3   :  { %10301 = vmatpush3.bf16.msra.mxu1 %v11194_v42  ;;  %10280 = vmatprep.subr.bf16.mxu0 %v11195_v43  ;;  %v11242_v42 = vld [vmem:[#allocation6 + $0x14a0] sm:$0xff]  }
 0x2b4   :  { %10302 = vmatprep.subr.bf16.mxu1 %v11196_v44 }
 0x2b6   :  { %10281 = vmatpush3.bf16.msra.mxu0 %v11197_v45  ;;  %v11243_v45 = vld [vmem:[#allocation6 + $0x1468] sm:$0xff]  }
 0x2b7   :  { %10303 = vmatpush3.bf16.msra.mxu1 %v11198_v46  ;;  %10282 = vmatprep.subr.bf16.mxu0 %v11199_v47 }
 0x2b8   :  { %10304 = vmatprep.subr.bf16.mxu1 %v11200_v48  ;;  %v11244_v48 = vld [vmem:[#allocation6 + $0x14e8] sm:$0xff]  }
 0x2ba   :  { %10283 = vmatpush3.bf16.msra.mxu0 %v11201_v49 }
 0x2bb   :  { %10305 = vmatpush3.bf16.msra.mxu1 %v11202_v50  ;;  %10284 = vmatprep.subr.bf16.mxu0 %v11203_v51  ;;  %v11245_v51 = vld [vmem:[#allocation6 + $0x1428] sm:$0xff]  }
 0x2bc   :  { %10306 = vmatprep.subr.bf16.mxu1 %v11204_v52 }
 0x2be   :  { %10285 = vmatpush3.bf16.msra.mxu0 %v11205_v54 }
 0x2bf   :  { %10307 = vmatpush3.bf16.msra.mxu1 %v11206_v56  ;;  %10286 = vmatprep.subr.bf16.mxu0 %v11207_v59  ;;  %v11247_v56 = vld [vmem:[#allocation6 + $0x1470] sm:$0xff]  }
 0x2c0   :  { %v9984_v53 = vpop.f32.mrb[48].mxu0  ;;  %10308 = vmatprep.subr.bf16.mxu1 %v11208_v62  ;;  %v11249_v59 = vld [vmem:[#allocation6 + $0x1430] sm:$0xff]   ;;  %v11252_v62 = vld [vmem:[#allocation6 + $0x14f8] sm:$0xff]  }
 0x2c1   :  { %v10006_v55 = vpop.f32.mrb[48].mxu1  ;;  %v9985_v57 = vpop.f32.mrb[49].mxu0 }
 0x2c2   :  { %v10007_v58 = vpop.f32.mrb[49].mxu1  ;;  %v9986_v60 = vadd.f32 %v9985_v57, %v9984_v53  ;;  %v9987_v63 = vpop.f32.mrb[50].mxu0  ;;  %10287 = vmatpush3.bf16.msra.mxu0 %v11209_v1  ;;  %v11246_v53 = vld [vmem:[#allocation6 + $0x14a8] sm:$0xff]   ;;  %v112_v1 = vld [vmem:[#allocation3 + $0x140] sm:$0xff] }
 0x2c3   :  { %v10008_v61 = vadd.f32 %v10007_v58, %v10006_v55  ;;  %v10009_v0 = vpop.f32.mrb[50].mxu1  ;;  %v9988_v4 = vpop.f32.mrb[51].mxu0  ;;  %10309 = vmatpush3.bf16.msra.mxu1 %v11210_v3  ;;  %10288 = vmatprep.subr.bf16.mxu0 %v11211_v6  ;;  %v11248_v58 = vld [vmem:[#allocation6 + $0x14f0] sm:$0xff]   ;;  %v11253_v63 = vld [vmem:[#allocation6 + $0x1438] sm:$0xff]   ;;  %v8655_v3 = vcombine.low %v112_v1, %v112_v1 }
 0x2c4   :  { %v7602_v2 = vadd.f32 %v9986_v60, %v11607_v19  ;;  %v10010_v5 = vpop.f32.mrb[51].mxu1  ;;  %10310 = vmatprep.subr.bf16.mxu1 %v11212_v8  ;;  %v8653_v19 = vcombine.low %v111_v18, %v111_v18  ;;  %v11250_v60 = vld [vmem:[#allocation6 + $0x14b0] sm:$0xff]   ;;  %v11254_v0 = vld [vmem:[#allocation6 + $0x14b8] sm:$0xff]   ;;  %v8656_v4 = vcombine.high %v112_v1, %v112_v1  ;;  %v11260_v8 = vld [vmem:[#allocation6 + $0x15c0] sm:$0xff]  }
 0x2c5   :  { %v11270_v18 = vld [vmem:[#allocation6 + $0x1590] sm:$0xff]  }
 0x2c6   :  { %v11610_v7 = vadd.f32 %v10008_v61, %v7602_v2  ;;  %10289 = vmatpush3.bf16.msra.mxu0 %v11213_v9  ;;  %v11251_v61 = vld [vmem:[#allocation6 + $0x1478] sm:$0xff]   ;;  %v113_v2 = vld [vmem:[#allocation3 + $0x148] sm:$0xff]  ;;  %v11261_v9 = vld [vmem:[#allocation6 + $0x1500] sm:$0xff]  }
 0x2c7   :  { %10311 = vmatpush3.bf16.msra.mxu1 %v11214_v10  ;;  %10290 = vmatprep.subr.bf16.mxu0 %v11215_v11  ;;  %v8657_v5 = vcombine.low %v113_v2, %v113_v2  ;;  %v8658_v6 = vcombine.high %v113_v2, %v113_v2  ;;  %v11262_v10 = vld [vmem:[#allocation6 + $0x1580] sm:$0xff]   ;;  %v11263_v11 = vld [vmem:[#allocation6 + $0x1548] sm:$0xff]   ;;  %v11303_v1 = vld [vmem:[#allocation6 + $0x1650] sm:$0xff]  }
 0x2c8   :  { %10312 = vmatprep.subr.bf16.mxu1 %v11216_v12  ;;  %v11264_v12 = vld [vmem:[#allocation6 + $0x15c8] sm:$0xff]   ;;  %v11304_v2 = vld [vmem:[#allocation6 + $0x16d0] sm:$0xff]  }
 0x2ca   :  { %10291 = vmatpush3.bf16.msra.mxu0 %v11217_v13  ;;  %v11265_v13 = vld [vmem:[#allocation6 + $0x1508] sm:$0xff]  }
 0x2cb   :  { %10313 = vmatpush3.bf16.msra.mxu1 %v11218_v14  ;;  %10320 = vmatprep.subr.bf16.mxu0 %v11223_v21  ;;  %v11266_v14 = vld [vmem:[#allocation6 + $0x1588] sm:$0xff]   ;;  %v11273_v21 = vld [vmem:[#allocation6 + $0x1518] sm:$0xff]  }
 0x2cc   :  { %10342 = vmatprep.subr.bf16.mxu1 %v11224_v22  ;;  %v11274_v22 = vld [vmem:[#allocation6 + $0x1598] sm:$0xff]  }
 0x2cd   :  { %8160 = vmatmul.mubr.bf16.vlgmr.msra.gmra.mrb[76].mxu0 %v8651_v16  ;;  %v11268_v16 = vld [vmem:[#allocation6 + $0x15d0] sm:$0xff]  }
 0x2ce   :  { %8200 = vmatmul.mubr.bf16.vlgmr.msra.gmra.mrb[76].mxu1 %v8653_v19  ;;  %10321 = vmatpush3.bf16.msra.mxu0 %v11225_v23  ;;  %v11271_v19 = vld [vmem:[#allocation6 + $0x1558] sm:$0xff]   ;;  %v11275_v23 = vld [vmem:[#allocation6 + $0x1560] sm:$0xff]  }
 0x2cf   :  { %10343 = vmatpush3.bf16.msra.mxu1 %v11226_v24  ;;  %10322 = vmatprep.subr.bf16.mxu0 %v11227_v25  ;;  %v11276_v24 = vld [vmem:[#allocation6 + $0x15e0] sm:$0xff]  }
 0x2d0   :  { %10344 = vmatprep.subr.bf16.mxu1 %v11228_v26  ;;  %8239 = vmatprep.mubr.bf16.mxu0 %v8656_v4  ;;  %v11277_v26 = vld [vmem:[#allocation6 + $0x1520] sm:$0xff]   ;;  %v11306_v4 = vld [vmem:[#allocation6 + $0x1690] sm:$0xff]  }
 0x2d1   :  { %8279 = vmatprep.mubr.bf16.mxu1 %v8658_v6  ;;  %v11308_v6 = vld [vmem:[#allocation6 + $0x16d8] sm:$0xff]  }
 0x2d2   :  { %10323 = vmatpush3.bf16.msra.mxu0 %v11229_v27 }
 0x2d3   :  { %10345 = vmatpush3.bf16.msra.mxu1 %v11230_v28  ;;  %10324 = vmatprep.subr.bf16.mxu0 %v11231_v29  ;;  %v11278_v28 = vld [vmem:[#allocation6 + $0x15a0] sm:$0xff]  }
 0x2d4   :  { %10346 = vmatprep.subr.bf16.mxu1 %v11232_v30 }
 0x2d6   :  { %10325 = vmatpush3.bf16.msra.mxu0 %v11233_v31 }
 0x2d7   :  { %10347 = vmatpush3.bf16.msra.mxu1 %v11234_v32  ;;  %10326 = vmatprep.subr.bf16.mxu0 %v11235_v33  ;;  %v11279_v32 = vld [vmem:[#allocation6 + $0x1568] sm:$0xff]  }
 0x2d8   :  { %10348 = vmatprep.subr.bf16.mxu1 %v11236_v34  ;;  %v11280_v34 = vld [vmem:[#allocation6 + $0x15e8] sm:$0xff]  }
 0x2da   :  { %10327 = vmatpush3.bf16.msra.mxu0 %v11237_v35 }
 0x2db   :  { %10349 = vmatpush3.bf16.msra.mxu1 %v11238_v36  ;;  %10328 = vmatprep.subr.bf16.mxu0 %v11239_v37 }
 0x2dc   :  { %10350 = vmatprep.subr.bf16.mxu1 %v11240_v38  ;;  %v11281_v38 = vld [vmem:[#allocation6 + $0x1528] sm:$0xff]  }
 0x2de   :  { %10329 = vmatpush3.bf16.msra.mxu0 %v11241_v40 }
 0x2df   :  { %10351 = vmatpush3.bf16.msra.mxu1 %v11242_v42  ;;  %10330 = vmatprep.subr.bf16.mxu0 %v11243_v45  ;;  %v11285_v45 = vld [vmem:[#allocation6 + $0x1530] sm:$0xff]  }
 0x2e0   :  { %v10028_v39 = vpop.f32.mrb[52].mxu0  ;;  %10352 = vmatprep.subr.bf16.mxu1 %v11244_v48  ;;  %v11288_v48 = vld [vmem:[#allocation6 + $0x15f8] sm:$0xff]  }
 0x2e1   :  { %v10050_v41 = vpop.f32.mrb[52].mxu1  ;;  %v10029_v43 = vpop.f32.mrb[53].mxu0 }
 0x2e2   :  { %v10051_v44 = vpop.f32.mrb[53].mxu1  ;;  %v10030_v46 = vadd.f32 %v10029_v43, %v10028_v39  ;;  %v10031_v49 = vpop.f32.mrb[54].mxu0  ;;  %10331 = vmatpush3.bf16.msra.mxu0 %v11245_v51  ;;  %v11282_v39 = vld [vmem:[#allocation6 + $0x15a8] sm:$0xff]   ;;  %v11283_v43 = vld [vmem:[#allocation6 + $0x1570] sm:$0xff]  }
 0x2e3   :  { %v10052_v47 = vadd.f32 %v10051_v44, %v10050_v41  ;;  %v10053_v50 = vpop.f32.mrb[54].mxu1  ;;  %v10032_v54 = vpop.f32.mrb[55].mxu0  ;;  %10353 = vmatpush3.bf16.msra.mxu1 %v11246_v53  ;;  %10332 = vmatprep.subr.bf16.mxu0 %v11247_v56  ;;  %v11284_v44 = vld [vmem:[#allocation6 + $0x15f0] sm:$0xff]   ;;  %v11289_v49 = vld [vmem:[#allocation6 + $0x1538] sm:$0xff]   ;;  %v11295_v56 = vld [vmem:[#allocation6 + $0x1640] sm:$0xff]  }
 0x2e4   :  { %v7682_v52 = vadd.f32 %v10030_v46, %v11610_v7  ;;  %v10054_v55 = vpop.f32.mrb[55].mxu1  ;;  %10354 = vmatprep.subr.bf16.mxu1 %v11248_v58  ;;  %v11259_v7 = vld [vmem:[#allocation6 + $0x1540] sm:$0xff]   ;;  %v11286_v46 = vld [vmem:[#allocation6 + $0x15b0] sm:$0xff]   ;;  %v11290_v50 = vld [vmem:[#allocation6 + $0x15b8] sm:$0xff]  }
 0x2e5   :  { %v114_v51 = vld [vmem:[#allocation3 + $0x150] sm:$0xff]  ;;  %v11296_v58 = vld [vmem:[#allocation6 + $0x16c0] sm:$0xff]  }
 0x2e6   :  { %v11613_v57 = vadd.f32 %v10052_v47, %v7682_v52  ;;  %10333 = vmatpush3.bf16.msra.mxu0 %v11249_v59  ;;  %v11287_v47 = vld [vmem:[#allocation6 + $0x1578] sm:$0xff]   ;;  %v8659_v53 = vcombine.low %v114_v51, %v114_v51  ;;  %v8660_v54 = vcombine.high %v114_v51, %v114_v51  ;;  %v11297_v59 = vld [vmem:[#allocation6 + $0x1600] sm:$0xff]   ;;  %v11339_v51 = vld [vmem:[#allocation6 + $0x1750] sm:$0xff]  }
 0x2e7   :  { %10355 = vmatpush3.bf16.msra.mxu1 %v11250_v60  ;;  %10334 = vmatprep.subr.bf16.mxu0 %v11251_v61  ;;  %v115_v52 = vld [vmem:[#allocation3 + $0x158] sm:$0xff]  ;;  %v11298_v60 = vld [vmem:[#allocation6 + $0x1680] sm:$0xff]   ;;  %v11299_v61 = vld [vmem:[#allocation6 + $0x1648] sm:$0xff]  }
 0x2e8   :  { %10356 = vmatprep.subr.bf16.mxu1 %v11252_v62  ;;  %v8661_v55 = vcombine.low %v115_v52, %v115_v52  ;;  %v11300_v62 = vld [vmem:[#allocation6 + $0x16c8] sm:$0xff]  }
 0x2ea   :  { %10335 = vmatpush3.bf16.msra.mxu0 %v11253_v63  ;;  %v11301_v63 = vld [vmem:[#allocation6 + $0x1608] sm:$0xff]  }
 0x2eb   :  { %10357 = vmatpush3.bf16.msra.mxu1 %v11254_v0  ;;  %10364 = vmatprep.subr.bf16.mxu0 %v11259_v7  ;;  %v11302_v0 = vld [vmem:[#allocation6 + $0x1688] sm:$0xff]   ;;  %v11309_v7 = vld [vmem:[#allocation6 + $0x1618] sm:$0xff]  }
 0x2ec   :  { %10386 = vmatprep.subr.bf16.mxu1 %v11260_v8  ;;  %v11310_v8 = vld [vmem:[#allocation6 + $0x1698] sm:$0xff]  }
 0x2ed   :  { %8240 = vmatmul.mubr.bf16.vlgmr.msra.gmra.mrb[80].mxu0 %v8655_v3  ;;  %v11305_v3 = vld [vmem:[#allocation6 + $0x1610] sm:$0xff]  }
 0x2ee   :  { %8280 = vmatmul.mubr.bf16.vlgmr.msra.gmra.mrb[80].mxu1 %v8657_v5  ;;  %10365 = vmatpush3.bf16.msra.mxu0 %v11261_v9  ;;  %v11307_v5 = vld [vmem:[#allocation6 + $0x1658] sm:$0xff]   ;;  %v11311_v9 = vld [vmem:[#allocation6 + $0x1660] sm:$0xff]  }
 0x2ef   :  { %10387 = vmatpush3.bf16.msra.mxu1 %v11262_v10  ;;  %10366 = vmatprep.subr.bf16.mxu0 %v11263_v11  ;;  %v11312_v10 = vld [vmem:[#allocation6 + $0x16e0] sm:$0xff]  }
 0x2f0   :  { %10388 = vmatprep.subr.bf16.mxu1 %v11264_v12  ;;  %8319 = vmatprep.mubr.bf16.mxu0 %v8660_v54  ;;  %v11313_v12 = vld [vmem:[#allocation6 + $0x1620] sm:$0xff]   ;;  %v11342_v54 = vld [vmem:[#allocation6 + $0x1790] sm:$0xff]  }
 0x2f2   :  { %10367 = vmatpush3.bf16.msra.mxu0 %v11265_v13 }
 0x2f3   :  { %10389 = vmatpush3.bf16.msra.mxu1 %v11266_v14  ;;  %10368 = vmatprep.subr.bf16.mxu0 %v11267_v15  ;;  %v11314_v14 = vld [vmem:[#allocation6 + $0x16a0] sm:$0xff]  }
 0x2f4   :  { %10390 = vmatprep.subr.bf16.mxu1 %v11268_v16 }
 0x2f6   :  { %10369 = vmatpush3.bf16.msra.mxu0 %v11269_v17  ;;  %v11315_v17 = vld [vmem:[#allocation6 + $0x1668] sm:$0xff]  }
 0x2f7   :  { %10391 = vmatpush3.bf16.msra.mxu1 %v11270_v18  ;;  %10370 = vmatprep.subr.bf16.mxu0 %v11271_v19 }
 0x2f8   :  { %10392 = vmatprep.subr.bf16.mxu1 %v11272_v20  ;;  %v11316_v20 = vld [vmem:[#allocation6 + $0x16e8] sm:$0xff]  }
 0x2fa   :  { %10371 = vmatpush3.bf16.msra.mxu0 %v11273_v21 }
 0x2fb   :  { %10393 = vmatpush3.bf16.msra.mxu1 %v11274_v22  ;;  %10372 = vmatprep.subr.bf16.mxu0 %v11275_v23  ;;  %v11317_v23 = vld [vmem:[#allocation6 + $0x1628] sm:$0xff]  }
 0x2fc   :  { %10394 = vmatprep.subr.bf16.mxu1 %v11276_v24 }
 0x2fe   :  { %10373 = vmatpush3.bf16.msra.mxu0 %v11277_v26 }
 0x2ff   :  { %10395 = vmatpush3.bf16.msra.mxu1 %v11278_v28  ;;  %10374 = vmatprep.subr.bf16.mxu0 %v11279_v32  ;;  %v11319_v28 = vld [vmem:[#allocation6 + $0x1670] sm:$0xff]  }
 0x300   :  { %v10072_v25 = vpop.f32.mrb[56].mxu0  ;;  %10396 = vmatprep.subr.bf16.mxu1 %v11280_v34  ;;  %v11322_v32 = vld [vmem:[#allocation6 + $0x16b0] sm:$0xff]   ;;  %v11324_v34 = vld [vmem:[#allocation6 + $0x16f8] sm:$0xff]  }
 0x301   :  { %v10094_v27 = vpop.f32.mrb[56].mxu1  ;;  %v10073_v29 = vpop.f32.mrb[57].mxu0 }
 0x302   :  { %v10074_v30 = vadd.f32 %v10073_v29, %v10072_v25  ;;  %v10095_v31 = vpop.f32.mrb[57].mxu1  ;;  %v10075_v35 = vpop.f32.mrb[58].mxu0  ;;  %10375 = vmatpush3.bf16.msra.mxu0 %v11281_v38  ;;  %v11318_v25 = vld [vmem:[#allocation6 + $0x16a8] sm:$0xff]  }
 0x303   :  { %v10096_v33 = vadd.f32 %v10095_v31, %v10094_v27  ;;  %v10097_v37 = vpop.f32.mrb[58].mxu1  ;;  %v10076_v40 = vpop.f32.mrb[59].mxu0  ;;  %10397 = vmatpush3.bf16.msra.mxu1 %v11282_v39  ;;  %10376 = vmatprep.subr.bf16.mxu0 %v11283_v43  ;;  %v11321_v31 = vld [vmem:[#allocation6 + $0x1630] sm:$0xff]   ;;  %v11325_v35 = vld [vmem:[#allocation6 + $0x1638] sm:$0xff]   ;;  %v11331_v43 = vld [vmem:[#allocation6 + $0x1740] sm:$0xff]  }
 0x304   :  { %v7762_v36 = vadd.f32 %v10074_v30, %v11613_v57  ;;  %v10098_v42 = vpop.f32.mrb[59].mxu1  ;;  %10398 = vmatprep.subr.bf16.mxu1 %v11284_v44  ;;  %v8662_v57 = vcombine.high %v115_v52, %v115_v52  ;;  %v11320_v30 = vld [vmem:[#allocation6 + $0x16f0] sm:$0xff]   ;;  %v116_v37 = vld [vmem:[#allocation3 + $0x160] sm:$0xff]  ;;  %v117_v40 = vld [vmem:[#allocation3 + $0x168] sm:$0xff] }
 0x305   :  { %v8663_v38 = vcombine.low %v116_v37, %v116_v37  ;;  %v8664_v39 = vcombine.high %v116_v37, %v116_v37  ;;  %v8666_v42 = vcombine.high %v117_v40, %v117_v40  ;;  %v11332_v44 = vld [vmem:[#allocation6 + $0x17c0] sm:$0xff]   ;;  %v11340_v52 = vld [vmem:[#allocation6 + $0x17d0] sm:$0xff]  }
 0x306   :  { %v11616_v41 = vadd.f32 %v10096_v33, %v7762_v36  ;;  %10377 = vmatpush3.bf16.msra.mxu0 %v11285_v45  ;;  %8359 = vmatprep.mubr.bf16.mxu1 %v8662_v57  ;;  %v11323_v33 = vld [vmem:[#allocation6 + $0x1678] sm:$0xff]   ;;  %v11333_v45 = vld [vmem:[#allocation6 + $0x1700] sm:$0xff]  }
 0x307   :  { %10399 = vmatpush3.bf16.msra.mxu1 %v11286_v46  ;;  %10378 = vmatprep.subr.bf16.mxu0 %v11287_v47  ;;  %v11326_v36 = vld [vmem:[#allocation6 + $0x16b8] sm:$0xff]   ;;  %v11334_v46 = vld [vmem:[#allocation6 + $0x1780] sm:$0xff]   ;;  %v11335_v47 = vld [vmem:[#allocation6 + $0x1748] sm:$0xff]  }
 0x308   :  { %10400 = vmatprep.subr.bf16.mxu1 %v11288_v48  ;;  %v11336_v48 = vld [vmem:[#allocation6 + $0x17c8] sm:$0xff]   ;;  %v11345_v57 = vld [vmem:[#allocation6 + $0x1718] sm:$0xff]  }
 0x30a   :  { %10379 = vmatpush3.bf16.msra.mxu0 %v11289_v49  ;;  %v11337_v49 = vld [vmem:[#allocation6 + $0x1708] sm:$0xff]  }
 0x30b   :  { %10401 = vmatpush3.bf16.msra.mxu1 %v11290_v50  ;;  %10408 = vmatprep.subr.bf16.mxu0 %v11295_v56  ;;  %v11338_v50 = vld [vmem:[#allocation6 + $0x1788] sm:$0xff]   ;;  %v11344_v56 = vld [vmem:[#allocation6 + $0x17d8] sm:$0xff]  }
 0x30c   :  { %10430 = vmatprep.subr.bf16.mxu1 %v11296_v58  ;;  %v11346_v58 = vld [vmem:[#allocation6 + $0x1798] sm:$0xff]  }
 0x30d   :  { %8320 = vmatmul.mubr.bf16.vlgmr.msra.gmra.mrb[84].mxu0 %v8659_v53  ;;  %v11341_v53 = vld [vmem:[#allocation6 + $0x1710] sm:$0xff]  }
 0x30e   :  { %8360 = vmatmul.mubr.bf16.vlgmr.msra.gmra.mrb[84].mxu1 %v8661_v55  ;;  %10409 = vmatpush3.bf16.msra.mxu0 %v11297_v59  ;;  %v11343_v55 = vld [vmem:[#allocation6 + $0x1758] sm:$0xff]   ;;  %v11347_v59 = vld [vmem:[#allocation6 + $0x1760] sm:$0xff]  }
 0x30f   :  { %10431 = vmatpush3.bf16.msra.mxu1 %v11298_v60  ;;  %10410 = vmatprep.subr.bf16.mxu0 %v11299_v61  ;;  %v11348_v60 = vld [vmem:[#allocation6 + $0x17e0] sm:$0xff]  }
 0x310   :  { %10432 = vmatprep.subr.bf16.mxu1 %v11300_v62  ;;  %8399 = vmatprep.mubr.bf16.mxu0 %v8664_v39  ;;  %v11349_v62 = vld [vmem:[#allocation6 + $0x1720] sm:$0xff]  }
 0x311   :  { %8439 = vmatprep.mubr.bf16.mxu1 %v8666_v42 }
 0x312   :  { %10411 = vmatpush3.bf16.msra.mxu0 %v11301_v63 }
 0x313   :  { %10433 = vmatpush3.bf16.msra.mxu1 %v11302_v0  ;;  %10412 = vmatprep.subr.bf16.mxu0 %v11303_v1  ;;  %v11350_v0 = vld [vmem:[#allocation6 + $0x17a0] sm:$0xff]  }
 0x314   :  { %10434 = vmatprep.subr.bf16.mxu1 %v11304_v2 }
 0x316   :  { %10413 = vmatpush3.bf16.msra.mxu0 %v11305_v3  ;;  %v11351_v3 = vld [vmem:[#allocation6 + $0x1768] sm:$0xff]  }
 0x317   :  { %10435 = vmatpush3.bf16.msra.mxu1 %v11306_v4  ;;  %10414 = vmatprep.subr.bf16.mxu0 %v11307_v5 }
 0x318   :  { %10436 = vmatprep.subr.bf16.mxu1 %v11308_v6  ;;  %v11352_v6 = vld [vmem:[#allocation6 + $0x17e8] sm:$0xff]  }
 0x31a   :  { %10415 = vmatpush3.bf16.msra.mxu0 %v11309_v7 }
 0x31b   :  { %10437 = vmatpush3.bf16.msra.mxu1 %v11310_v8  ;;  %10416 = vmatprep.subr.bf16.mxu0 %v11311_v9  ;;  %v11353_v9 = vld [vmem:[#allocation6 + $0x1728] sm:$0xff]  }
 0x31c   :  { %10438 = vmatprep.subr.bf16.mxu1 %v11312_v10 }
 0x31e   :  { %10417 = vmatpush3.bf16.msra.mxu0 %v11313_v12 }
 0x31f   :  { %10439 = vmatpush3.bf16.msra.mxu1 %v11314_v14  ;;  %10418 = vmatprep.subr.bf16.mxu0 %v11315_v17  ;;  %v11355_v14 = vld [vmem:[#allocation6 + $0x1770] sm:$0xff]  }
 0x320   :  { %v10116_v11 = vpop.f32.mrb[60].mxu0  ;;  %10440 = vmatprep.subr.bf16.mxu1 %v11316_v20  ;;  %v11357_v17 = vld [vmem:[#allocation6 + $0x1730] sm:$0xff]   ;;  %v11360_v20 = vld [vmem:[#allocation6 + $0x17f8] sm:$0xff]  }
 0x321   :  { %v10138_v13 = vpop.f32.mrb[60].mxu1  ;;  %v10117_v15 = vpop.f32.mrb[61].mxu0 }
 0x322   :  { %v10139_v16 = vpop.f32.mrb[61].mxu1  ;;  %v10118_v18 = vadd.f32 %v10117_v15, %v10116_v11  ;;  %v10119_v21 = vpop.f32.mrb[62].mxu0  ;;  %10419 = vmatpush3.bf16.msra.mxu0 %v11317_v23  ;;  %v11354_v11 = vld [vmem:[#allocation6 + $0x17a8] sm:$0xff]   ;;  %v118_v23 = vld [vmem:[#allocation3 + $0x170] sm:$0xff] }
 0x323   :  { %v10140_v19 = vadd.f32 %v10139_v16, %v10138_v13  ;;  %v10141_v22 = vpop.f32.mrb[62].mxu1  ;;  %v10120_v26 = vpop.f32.mrb[63].mxu0  ;;  %10441 = vmatpush3.bf16.msra.mxu1 %v11318_v25  ;;  %10420 = vmatprep.subr.bf16.mxu0 %v11319_v28  ;;  %v11356_v16 = vld [vmem:[#allocation6 + $0x17f0] sm:$0xff]   ;;  %v11361_v21 = vld [vmem:[#allocation6 + $0x1738] sm:$0xff]   ;;  %v8667_v25 = vcombine.low %v118_v23, %v118_v23 }
 0x324   :  { %v7842_v24 = vadd.f32 %v10118_v18, %v11616_v41  ;;  %v10142_v27 = vpop.f32.mrb[63].mxu1  ;;  %10442 = vmatprep.subr.bf16.mxu1 %v11320_v30  ;;  %v8665_v41 = vcombine.low %v117_v40, %v117_v40  ;;  %v11358_v18 = vld [vmem:[#allocation6 + $0x17b0] sm:$0xff]   ;;  %v11362_v22 = vld [vmem:[#allocation6 + $0x17b8] sm:$0xff]   ;;  %v8668_v26 = vcombine.high %v118_v23, %v118_v23 }
 0x326   :  { %v11619_v29 = vadd.f32 %v10140_v19, %v7842_v24  ;;  %10421 = vmatpush3.bf16.msra.mxu0 %v11321_v31  ;;  %v11359_v19 = vld [vmem:[#allocation6 + $0x1778] sm:$0xff]  }
 0x327   :  { %10443 = vmatpush3.bf16.msra.mxu1 %v11322_v32  ;;  %10422 = vmatprep.subr.bf16.mxu0 %v11323_v33  ;;  %v119_v24 = vld [vmem:[#allocation3 + $0x178] sm:$0xff] }
 0x328   :  { %10444 = vmatprep.subr.bf16.mxu1 %v11324_v34  ;;  %v8669_v27 = vcombine.low %v119_v24, %v119_v24  ;;  %v8670_v28 = vcombine.high %v119_v24, %v119_v24 }
 0x32a   :  { %10423 = vmatpush3.bf16.msra.mxu0 %v11325_v35 }
 0x32b   :  { %10445 = vmatpush3.bf16.msra.mxu1 %v11326_v36  ;;  %10452 = vmatprep.subr.bf16.mxu0 %v11331_v43 }
 0x32c   :  { %10474 = vmatprep.subr.bf16.mxu1 %v11332_v44 }
 0x32d   :  { %8400 = vmatmul.mubr.bf16.vlgmr.msra.gmra.mrb[88].mxu0 %v8663_v38 }
 0x32e   :  { %8440 = vmatmul.mubr.bf16.vlgmr.msra.gmra.mrb[88].mxu1 %v8665_v41  ;;  %10453 = vmatpush3.bf16.msra.mxu0 %v11333_v45 }
 0x32f   :  { %10475 = vmatpush3.bf16.msra.mxu1 %v11334_v46  ;;  %10454 = vmatprep.subr.bf16.mxu0 %v11335_v47 }
 0x330   :  { %10476 = vmatprep.subr.bf16.mxu1 %v11336_v48  ;;  %8479 = vmatprep.mubr.bf16.mxu0 %v8668_v26 }
 0x331   :  { %8519 = vmatprep.mubr.bf16.mxu1 %v8670_v28 }
 0x332   :  { %10455 = vmatpush3.bf16.msra.mxu0 %v11337_v49 }
 0x333   :  { %10477 = vmatpush3.bf16.msra.mxu1 %v11338_v50  ;;  %10456 = vmatprep.subr.bf16.mxu0 %v11339_v51 }
 0x334   :  { %10478 = vmatprep.subr.bf16.mxu1 %v11340_v52 }
 0x336   :  { %10457 = vmatpush3.bf16.msra.mxu0 %v11341_v53 }
 0x337   :  { %10479 = vmatpush3.bf16.msra.mxu1 %v11342_v54  ;;  %10458 = vmatprep.subr.bf16.mxu0 %v11343_v55 }
 0x338   :  { %10480 = vmatprep.subr.bf16.mxu1 %v11344_v56 }
 0x33a   :  { %10459 = vmatpush3.bf16.msra.mxu0 %v11345_v57 }
 0x33b   :  { %10481 = vmatpush3.bf16.msra.mxu1 %v11346_v58  ;;  %10460 = vmatprep.subr.bf16.mxu0 %v11347_v59 }
 0x33c   :  { %10482 = vmatprep.subr.bf16.mxu1 %v11348_v60 }
 0x33e   :  { %10461 = vmatpush3.bf16.msra.mxu0 %v11349_v62 }
 0x33f   :  { %10483 = vmatpush3.bf16.msra.mxu1 %v11350_v0  ;;  %10462 = vmatprep.subr.bf16.mxu0 %v11351_v3 }
 0x340   :  { %v10160_v61 = vpop.f32.mrb[64].mxu0  ;;  %10484 = vmatprep.subr.bf16.mxu1 %v11352_v6 }
 0x341   :  { %v10182_v63 = vpop.f32.mrb[64].mxu1  ;;  %v10161_v1 = vpop.f32.mrb[65].mxu0 }
 0x342   :  { %v10183_v2 = vpop.f32.mrb[65].mxu1  ;;  %v10162_v4 = vadd.f32 %v10161_v1, %v10160_v61  ;;  %v10163_v7 = vpop.f32.mrb[66].mxu0  ;;  %10463 = vmatpush3.bf16.msra.mxu0 %v11353_v9 }
 0x343   :  { %v10184_v5 = vadd.f32 %v10183_v2, %v10182_v63  ;;  %v10185_v8 = vpop.f32.mrb[66].mxu1  ;;  %v10164_v12 = vpop.f32.mrb[67].mxu0  ;;  %10485 = vmatpush3.bf16.msra.mxu1 %v11354_v11  ;;  %10464 = vmatprep.subr.bf16.mxu0 %v11355_v14 }
 0x344   :  { %v7922_v10 = vadd.f32 %v10162_v4, %v11619_v29  ;;  %v10186_v13 = vpop.f32.mrb[67].mxu1  ;;  %10486 = vmatprep.subr.bf16.mxu1 %v11356_v16 }
 0x346   :  { %v7962_v15 = vadd.f32 %v10184_v5, %v7922_v10  ;;  %10465 = vmatpush3.bf16.msra.mxu0 %v11357_v17 }
 0x347   :  { %10487 = vmatpush3.bf16.msra.mxu1 %v11358_v18  ;;  %10466 = vmatprep.subr.bf16.mxu0 %v11359_v19 }
 0x348   :  { %10488 = vmatprep.subr.bf16.mxu1 %v11360_v20 }
 0x34a   :  { %10467 = vmatpush3.bf16.msra.mxu0 %v11361_v21 }
 0x34b   :  { %10489 = vmatpush3.bf16.msra.mxu1 %v11362_v22 }
 0x34d   :  { %8480 = vmatmul.mubr.bf16.vlgmr.msra.gmra.mrb[92].mxu0 %v8667_v25 }
 0x34e   :  { %8520 = vmatmul.mubr.bf16.vlgmr.msra.gmra.mrb[92].mxu1 %v8669_v27 }
 0x360   :  { %v10204_v29 = vpop.f32.mrb[68].mxu0 }
 0x361   :  { %v10226_v30 = vpop.f32.mrb[68].mxu1  ;;  %v10205_v31 = vpop.f32.mrb[69].mxu0 }
 0x362   :  { %v10206_v32 = vadd.f32 %v10205_v31, %v10204_v29  ;;  %v10227_v33 = vpop.f32.mrb[69].mxu1  ;;  %v10207_v34 = vpop.f32.mrb[70].mxu0 }
 0x363   :  { %v10228_v35 = vadd.f32 %v10227_v33, %v10226_v30  ;;  %v10229_v36 = vpop.f32.mrb[70].mxu1  ;;  %v10208_v37 = vpop.f32.mrb[71].mxu0 }
 0x364   :  { %v8002_v38 = vadd.f32 %v10206_v32, %v7962_v15  ;;  %v10230_v39 = vpop.f32.mrb[71].mxu1 }
 0x366   :  { %v8042_v40 = vadd.f32 %v10228_v35, %v8002_v38 }
 0x380   :  { %v10248_v41 = vpop.f32.mrb[72].mxu0 }
 0x381   :  { %v10270_v42 = vpop.f32.mrb[72].mxu1  ;;  %v10249_v43 = vpop.f32.mrb[73].mxu0 }
 0x382   :  { %v10250_v44 = vadd.f32 %v10249_v43, %v10248_v41  ;;  %v10271_v45 = vpop.f32.mrb[73].mxu1  ;;  %v10251_v46 = vpop.f32.mrb[74].mxu0 }
 0x383   :  { %v10272_v47 = vadd.f32 %v10271_v45, %v10270_v42  ;;  %v10273_v48 = vpop.f32.mrb[74].mxu1  ;;  %v10252_v49 = vpop.f32.mrb[75].mxu0 }
 0x384   :  { %v8082_v50 = vadd.f32 %v10250_v44, %v8042_v40  ;;  %v10274_v51 = vpop.f32.mrb[75].mxu1  ;;  %v9439_v49 = vld [vmem:[#allocation9] ss:$0 sm:$0xff] }
 0x386   :  { %v8122_v52 = vadd.f32 %v10272_v47, %v8082_v50 }
 0x3a0   :  { %v10292_v53 = vpop.f32.mrb[76].mxu0 }
 0x3a1   :  { %v10314_v54 = vpop.f32.mrb[76].mxu1  ;;  %v10293_v55 = vpop.f32.mrb[77].mxu0 }
 0x3a2   :  { %v10315_v56 = vpop.f32.mrb[77].mxu1  ;;  %v10294_v57 = vadd.f32 %v10293_v55, %v10292_v53  ;;  %v10295_v59 = vpop.f32.mrb[78].mxu0 }
 0x3a3   :  { %v10316_v58 = vadd.f32 %v10315_v56, %v10314_v54  ;;  %v10317_v60 = vpop.f32.mrb[78].mxu1  ;;  %v10296_v61 = vpop.f32.mrb[79].mxu0  ;;  %v8548_v59 = vlaneseq }
 0x3a4   :  { %v10318_v62 = vpop.f32.mrb[79].mxu1  ;;  %v8162_v63 = vadd.f32 %v10294_v57, %v8122_v52  ;;  %v8539_v52 = vstv %s11641_s4  ;;  %s11459_s4 = scalar_lea.vmem %s8564_s18, 16 }
 0x3a5   :  { %v8549_v60 = vand.u32 127, %v8548_v59  ;;  %v8551_v61 = vshrl.u32 %v8548_v59, 7  ;;  %p11460_p4 = scmp.ne.s32.totalorder %s8564_s18, %s11459_s4  ;;  %p11465_p6 = scmp.lt.s32.totalorder %s11463_s19, %s11459_s4 }
 0x3a6   :  { %v8202_v0 = vadd.f32 %v10316_v58, %v8162_v63 }
 0x3a7   :  { %v8552_v62 = vsub.s32 %v8549_v60, %v8551_v61  ;;  %p11466_p7 = por %p11465_p6, %p11464_p5 }
 0x3a9   :  { %p11467_p8 = pnand %p11466_p7, %p11460_p4 }
 0x3c0   :  { %v10336_v1 = vpop.f32.mrb[80].mxu0 }
 0x3c1   :  { %v10358_v2 = vpop.f32.mrb[80].mxu1  ;;  %v10337_v3 = vpop.f32.mrb[81].mxu0 }
 0x3c2   :  { %v10338_v4 = vadd.f32 %v10337_v3, %v10336_v1  ;;  %v10359_v5 = vpop.f32.mrb[81].mxu1  ;;  %v10339_v6 = vpop.f32.mrb[82].mxu0 }
 0x3c3   :  { %v10360_v7 = vadd.f32 %v10359_v5, %v10358_v2  ;;  %v10361_v8 = vpop.f32.mrb[82].mxu1  ;;  %v10340_v9 = vpop.f32.mrb[83].mxu0 }
 0x3c4   :  { %v8242_v10 = vadd.f32 %v10338_v4, %v8202_v0  ;;  %v10362_v11 = vpop.f32.mrb[83].mxu1 }
 0x3c6   :  { %v8282_v12 = vadd.f32 %v10360_v7, %v8242_v10 }
 0x3e0   :  { %v10380_v13 = vpop.f32.mrb[84].mxu0 }
 0x3e1   :  { %v10402_v14 = vpop.f32.mrb[84].mxu1  ;;  %v10381_v15 = vpop.f32.mrb[85].mxu0 }
 0x3e2   :  { %v10382_v16 = vadd.f32 %v10381_v15, %v10380_v13  ;;  %v10403_v17 = vpop.f32.mrb[85].mxu1  ;;  %v10383_v18 = vpop.f32.mrb[86].mxu0 }
 0x3e3   :  { %v10404_v19 = vadd.f32 %v10403_v17, %v10402_v14  ;;  %v10405_v20 = vpop.f32.mrb[86].mxu1  ;;  %v10384_v21 = vpop.f32.mrb[87].mxu0 }
 0x3e4   :  { %v8322_v22 = vadd.f32 %v10382_v16, %v8282_v12  ;;  %v10406_v23 = vpop.f32.mrb[87].mxu1 }
 0x3e6   :  { %v8362_v24 = vadd.f32 %v10404_v19, %v8322_v22 }
 0x400   :  { %v10424_v25 = vpop.f32.mrb[88].mxu0 }
 0x401   :  { %v10446_v26 = vpop.f32.mrb[88].mxu1  ;;  %v10425_v27 = vpop.f32.mrb[89].mxu0 }
 0x402   :  { %v10447_v28 = vpop.f32.mrb[89].mxu1  ;;  %v10426_v29 = vadd.f32 %v10425_v27, %v10424_v25  ;;  %v10427_v31 = vpop.f32.mrb[90].mxu0 }
 0x403   :  { %v10448_v30 = vadd.f32 %v10447_v28, %v10446_v26  ;;  %v10449_v32 = vpop.f32.mrb[90].mxu1  ;;  %v10428_v33 = vpop.f32.mrb[91].mxu0 }
 0x404   :  { %v10450_v34 = vpop.f32.mrb[91].mxu1  ;;  %v8402_v35 = vadd.f32 %v10426_v29, %v8362_v24 }
 0x406   :  { %v8442_v36 = vadd.f32 %v10448_v30, %v8402_v35 }
 0x420   :  { %v10468_v37 = vpop.f32.mrb[92].mxu0 }
 0x421   :  { %v10490_v38 = vpop.f32.mrb[92].mxu1  ;;  %v10469_v39 = vpop.f32.mrb[93].mxu0 }
 0x422   :  { %v10470_v40 = vadd.f32 %v10469_v39, %v10468_v37  ;;  %v10491_v41 = vpop.f32.mrb[93].mxu1  ;;  %v10471_v42 = vpop.f32.mrb[94].mxu0 }
 0x423   :  { %v10492_v43 = vadd.f32 %v10491_v41, %v10490_v38  ;;  %v10493_v44 = vpop.f32.mrb[94].mxu1  ;;  %v10472_v45 = vpop.f32.mrb[95].mxu0 }
 0x424   :  { %v8482_v46 = vadd.f32 %v10470_v40, %v8442_v36  ;;  %v10494_v47 = vpop.f32.mrb[95].mxu1 }
 0x426   :  { %v8522_v48 = vadd.f32 %v10492_v43, %v8482_v46 }
 0x428   :  { %v8527_v50 = vmax.f32 %v8522_v48, 0.0 }
 0x42a   :  { %v8535_v51 = vmul.f32 %v9439_v49, %v8527_v50 }
 0x42c   :  { %8536 = vadd.xlane.f32.xlu0 %v8535_v51 }
 0x4b9   :  { %v8537_v53 = vpop.xlane.xlu0 %8536 }
 0x4ba   :  { %v8540_v54 = vadd.f32 %v8539_v52, %v8537_v53 }
 0x4bc   :  { %v8541_v55 = vsub.f32 0.0, %v8540_v54 }
 0x4be   :  { %v8542_v56 = vmul.f32 1.442695, %v8541_v55 }
 0x4c0   :  { %11367 = vpow2.f32 %v8542_v56 }
 0x4ca   :  { %v11368_v57 = vpop.eup %11367 }
 0x4cb   :  { %v8544_v58 = vadd.f32 1.0, %v11368_v57 }
 0x4cd   :  { %11369 = vrcp.f32 %v8544_v58 }
 0x4d7   :  { %v11370_v63 = vpop.eup %11369 }
 0x4d8   :  { %v8553_v0 = vrot.slane %v11370_v63, %v8552_v62 }
 0x4da   :  { %8556 = vst.msk [vmem:[#allocation11] sm:$0x1] %vm8555_vm0, %v8553_v0 }
 0x4db   :  { %11470 = shalt.err (!%p11467_p8)
}
 0x4dc   :  { %s11471_s22 = scalar_lea.hbm %s11642_s5, 16 }
 0x4dd   :  { %p11472_p9 = scmp.ne.s32.totalorder %s11642_s5, %s11471_s22  ;;  %p11475_p10 = scmp.lt.u32.totalorder %s11471_s22, %s11642_s5 }
 0x4df   :  { %p11477_p11 = pnand %p11475_p10, %p11472_p9 }
 0x4e1   :  { %11480 = shalt.err (!%p11477_p11)
}
 0x4e2   :  { %8566 = dma.vmem_to_hbm [thread:$0]  %s8564_s18, 16, %s11642_s5, [#allocation5]  }
 0x4e3   :  { %11487 = dma.done.wait [#allocation5], 16  }
 0x4e4   :  { %11488 = vsyncadd [#allocation5], 4294967280 }
 0x4e5   :  { %8570 = vsyncpa [#allocation4], 1 }
 0x4e6   :  { %8571 = vsyncpa [#allocation7], 1 }
 0x4e7   :  { %8572 = vsyncpa [#allocation10], 1 }
 0x4e8   :  { %8573 = vsyncpa [#allocation5], 1 }

</bundles_post_ra>
